<compile_context>
chip_gen: v7x
topology: tpu7x:2x2x1
jax: 0.10.0
libtpu: 0.0.40
codegen_flags: <defaults>
</compile_context>

<pallas_src>
import jax
import jax.numpy as jnp
from jax.experimental import pallas as pl
from jax.experimental.pallas import tpu as pltpu

IN_FEATURES = 2048
MID = 1000
N_PAD = 1024                    # 1000 padded up to a multiple of 128 lanes
TILE_N = 512                    # 2 grid steps over the padded output axis
N_TILES = N_PAD // TILE_N


def midfeature_kernel(f_ref, l_ref, wf_ref, wl_ref, b_ref, o_ref):
    # f: (B, 2048) f32, l: (B, 1000) f32
    # wf: (2048, TILE_N) bf16, wl: (1000, TILE_N) bf16, b: (1, TILE_N) f32
    f = f_ref[...].astype(jnp.bfloat16)
    l = l_ref[...].astype(jnp.bfloat16)
    acc = jnp.dot(f, wf_ref[...], preferred_element_type=jnp.float32)
    acc = acc + jnp.dot(l, wl_ref[...], preferred_element_type=jnp.float32)
    o_ref[...] = (acc + b_ref[...]).astype(o_ref.dtype)


def prepare_params(wf, bf, wl, bl):
    """One-time parameter packing (at load/init time, NOT per call).

    wf: (1000, 2048) torch-layout weight, bf: (1000,)
    wl: (1000, 1000) torch-layout weight, bl: (1000,)
    Returns tile-major packed weights so each grid step's stripe is one
    contiguous HBM region:
      wf_packed: (N_TILES, 2048, TILE_N) bfloat16
      wl_packed: (N_TILES, 1000, TILE_N) bfloat16
      b_packed : (1, N_PAD)              float32   (bf + bl, zero-padded)
    """
    wf_t = jnp.pad(wf.T, ((0, 0), (0, N_PAD - MID)))          # (2048, 1024)
    wl_t = jnp.pad(wl.T, ((0, 0), (0, N_PAD - MID)))          # (1000, 1024)
    # tile-major repack: (N_TILES, K, TILE_N), row-major => contiguous stripes
    wf_p = wf_t.reshape(IN_FEATURES, N_TILES, TILE_N).transpose(1, 0, 2)
    wl_p = wl_t.reshape(MID, N_TILES, TILE_N).transpose(1, 0, 2)
    b = jnp.pad((bf + bl).reshape(1, MID), ((0, 0), (0, N_PAD - MID)))
    return (wf_p.astype(jnp.bfloat16),
            wl_p.astype(jnp.bfloat16),
            b.astype(jnp.float32))


def midfeature_forward(features, logits, wf_packed, wl_packed, b_packed):
    """features: (B, 2048, 1, 1) or (B, 2048); logits: (B, 1000) -> (B, 1000)."""
    B = features.shape[0]
    f2d = features.reshape(B, -1)                              # free view
    assert f2d.shape[1] == IN_FEATURES
    assert logits.shape == (B, MID)
    # Full batch stays resident in VMEM with the current specs.
    assert B <= 512, "TODO(synk): add M (batch) tiling for large B"

    out_pad = pl.pallas_call(
        midfeature_kernel,
        out_shape=jax.ShapeDtypeStruct((B, N_PAD), jnp.float32),
        grid=(N_TILES,),
        in_specs=[
            # activations: same block every step -> DMA'd once, kept in VMEM
            pl.BlockSpec((B, IN_FEATURES), lambda j: (0, 0)),
            pl.BlockSpec((B, MID), lambda j: (0, 0)),
            # weights: one contiguous tile-major stripe per grid step
            pl.BlockSpec((pl.Squeezed(), IN_FEATURES, TILE_N),
                         lambda j: (j, 0, 0)),
            pl.BlockSpec((pl.Squeezed(), MID, TILE_N),
                         lambda j: (j, 0, 0)),
            # fused-bias stripe
            pl.BlockSpec((1, TILE_N), lambda j: (0, j)),
        ],
        out_specs=pl.BlockSpec((B, TILE_N), lambda j: (0, j)),
        compiler_params=pltpu.CompilerParams(
            # independent N tiles -> shard across v7x's 2 TensorCores;
            # plain double-buffered pipeline on v5e/v6e
            dimension_semantics=("parallel",),
            # ~6 MiB double-buffered weight stripes + tiny activations:
            # well under every generation's physical VMEM (64 MiB/TC on v7x)
            vmem_limit_bytes=32 << 20,
        ),
    )(f2d, logits, wf_packed, wl_packed, b_packed)

    return out_pad[:, :MID]


if __name__ == "__main__":
    key = jax.random.PRNGKey(0)
    k_f, k_l, k_wf, k_bf, k_wl, k_bl = jax.random.split(key, 6)

    B = 2
    # features come from a 2048-channel feature map (NCHW) that gets flattened
    features = jax.random.normal(k_f, (B, IN_FEATURES, 1, 1), dtype=jnp.float32)
    logits = jax.random.normal(k_l, (B, MID), dtype=jnp.float32)

    # deterministic params (shapes match nn.Linear(2048,1000)/nn.Linear(1000,1000))
    wf = jax.random.normal(k_wf, (MID, IN_FEATURES), dtype=jnp.float32) * 0.02
    bf = jax.random.normal(k_bf, (MID,), dtype=jnp.float32) * 0.02
    wl = jax.random.normal(k_wl, (MID, MID), dtype=jnp.float32) * 0.02
    bl = jax.random.normal(k_bl, (MID,), dtype=jnp.float32) * 0.02

    # One-time prep (transpose / pad / tile-major repack / bf16 cast)
    wf_packed, wl_packed, b_packed = jax.block_until_ready(
        prepare_params(wf, bf, wl, bl))

    out = midfeature_forward(features, logits, wf_packed, wl_packed, b_packed)
    out = jax.block_until_ready(out)
    assert out.shape == (B, MID)

    f2d = features.reshape(B, -1)

    # Reference 1: exact semantics of what the kernel computes (bf16-quantized
    # weights/activations, f32 accumulate) -- must match tightly.
    f_q = f2d.astype(jnp.bfloat16).astype(jnp.float32)
    l_q = logits.astype(jnp.bfloat16).astype(jnp.float32)
    wf_q = wf.astype(jnp.bfloat16).astype(jnp.float32)
    wl_q = wl.astype(jnp.bfloat16).astype(jnp.float32)
    ref_q = f_q @ wf_q.T + l_q @ wl_q.T + (bf + bl)
    assert jnp.allclose(out, ref_q, atol=2e-3, rtol=2e-3), "mismatch vs bf16 reference"

    # Reference 2: original fp32 PyTorch semantics -- must match within
    # bf16 weight/activation-compression error.
    ref_f32 = (f2d @ wf.T + bf) + (logits @ wl.T + bl)
    assert jnp.allclose(out, ref_f32, atol=5e-2, rtol=5e-2), "mismatch vs fp32 reference"

    print("KERNEL_OK")
</pallas_src>

<mosaic_0001>
module attributes {stable_mosaic.version = 11 : i64} {
  func.func @midfeature_kernel(%arg0: i32, %arg1: memref<2x2048xf32, #tpu.memory_space<vmem>>, %arg2: memref<2x1000xf32, #tpu.memory_space<vmem>>, %arg3: memref<1x2048x512xbf16, #tpu.memory_space<vmem>>, %arg4: memref<1x1000x512xbf16, #tpu.memory_space<vmem>>, %arg5: memref<1x512xf32, #tpu.memory_space<vmem>>, %arg6: memref<2x512xf32, #tpu.memory_space<vmem>>) attributes {dimension_semantics = [#tpu.dimension_semantics<parallel>], iteration_bounds = array<i64: 2>, scalar_prefetch = 0 : i64, scratch_operands = 0 : i64, tpu.core_type = #tpu.core_type<tc>, window_params = [{pipeline_mode = #tpu.pipeline_mode<synchronous>, transform_indices = @transform_0, window_bounds = array<i64: 2, 2048>}, {pipeline_mode = #tpu.pipeline_mode<synchronous>, transform_indices = @transform_1, window_bounds = array<i64: 2, 1000>}, {transform_indices = @transform_2, window_bounds = array<i64: 1, 2048, 512>}, {transform_indices = @transform_3, window_bounds = array<i64: 1, 1000, 512>}, {transform_indices = @transform_4, window_bounds = array<i64: 1, 512>}, {transform_indices = @transform_5, window_bounds = array<i64: 2, 512>}]} {
    %c0 = arith.constant 0 : index
    %c0_0 = arith.constant 0 : index
    %0 = vector.load %arg1[%c0, %c0_0] : memref<2x2048xf32, #tpu.memory_space<vmem>>, vector<2x2048xf32>
    %1 = arith.truncf %0 : vector<2x2048xf32> to vector<2x2048xbf16>
    %c0_1 = arith.constant 0 : index
    %c0_2 = arith.constant 0 : index
    %2 = vector.load %arg2[%c0_1, %c0_2] : memref<2x1000xf32, #tpu.memory_space<vmem>>, vector<2x1000xf32>
    %3 = arith.truncf %2 : vector<2x1000xf32> to vector<2x1000xbf16>
    %c0_3 = arith.constant 0 : index
    %c0_4 = arith.constant 0 : index
    %c0_5 = arith.constant 0 : index
    %4 = vector.load %arg3[%c0_3, %c0_4, %c0_5] : memref<1x2048x512xbf16, #tpu.memory_space<vmem>>, vector<1x2048x512xbf16>
    %5 = vector.shape_cast %4 : vector<1x2048x512xbf16> to vector<2048x512xbf16>
    %cst = arith.constant dense<0.000000e+00> : vector<2x512xf32>
    %6 = tpu.matmul %1, %5, %cst {dimension_numbers = #tpu.dot_dimension_numbers<[1], [0], [0], [1], [0, 0, 1, 1], [], []>} : vector<2x2048xbf16>, vector<2048x512xbf16>, vector<2x512xf32> -> vector<2x512xf32>
    %c0_6 = arith.constant 0 : index
    %c0_7 = arith.constant 0 : index
    %c0_8 = arith.constant 0 : index
    %7 = vector.load %arg4[%c0_6, %c0_7, %c0_8] : memref<1x1000x512xbf16, #tpu.memory_space<vmem>>, vector<1x1000x512xbf16>
    %8 = vector.shape_cast %7 : vector<1x1000x512xbf16> to vector<1000x512xbf16>
    %cst_9 = arith.constant dense<0.000000e+00> : vector<2x512xf32>
    %9 = tpu.matmul %3, %8, %cst_9 {dimension_numbers = #tpu.dot_dimension_numbers<[1], [0], [0], [1], [0, 0, 1, 1], [], []>} : vector<2x1000xbf16>, vector<1000x512xbf16>, vector<2x512xf32> -> vector<2x512xf32>
    %10 = arith.addf %6, %9 : vector<2x512xf32>
    %c0_10 = arith.constant 0 : index
    %c0_11 = arith.constant 0 : index
    %11 = vector.load %arg5[%c0_10, %c0_11] : memref<1x512xf32, #tpu.memory_space<vmem>>, vector<1x512xf32>
    %12 = vector.broadcast %11 : vector<1x512xf32> to vector<2x512xf32>
    %13 = arith.addf %10, %12 : vector<2x512xf32>
    %c0_12 = arith.constant 0 : index
    %c0_13 = arith.constant 0 : index
    %14 = vector.load %arg6[%c0_12, %c0_13] : memref<2x512xf32, #tpu.memory_space<vmem>>, vector<2x512xf32>
    tpu.vector_store %arg6[%c0_12, %c0_13], %13 {strides = array<i32>} : memref<2x512xf32, #tpu.memory_space<vmem>>, vector<2x512xf32>,
    return
  }
  func.func @transform_0(%arg0: i32) -> (i32, i32) {
    %c0_i32 = arith.constant 0 : i32
    %c0_i32_0 = arith.constant 0 : i32
    %c0_i32_1 = arith.constant 0 : i32
    return %c0_i32, %c0_i32_0 : i32, i32
  }
  func.func @transform_1(%arg0: i32) -> (i32, i32) {
    %c0_i32 = arith.constant 0 : i32
    %c0_i32_0 = arith.constant 0 : i32
    %c0_i32_1 = arith.constant 0 : i32
    return %c0_i32, %c0_i32_0 : i32, i32
  }
  func.func @transform_2(%arg0: i32) -> (i32, i32, i32) {
    %c0_i32 = arith.constant 0 : i32
    %c0_i32_0 = arith.constant 0 : i32
    %c0_i32_1 = arith.constant 0 : i32
    return %arg0, %c0_i32, %c0_i32_0 : i32, i32, i32
  }
  func.func @transform_3(%arg0: i32) -> (i32, i32, i32) {
    %c0_i32 = arith.constant 0 : i32
    %c0_i32_0 = arith.constant 0 : i32
    %c0_i32_1 = arith.constant 0 : i32
    return %arg0, %c0_i32, %c0_i32_0 : i32, i32, i32
  }
  func.func @transform_4(%arg0: i32) -> (i32, i32) {
    %c0_i32 = arith.constant 0 : i32
    %c0_i32_0 = arith.constant 0 : i32
    return %c0_i32, %arg0 : i32, i32
  }
  func.func @transform_5(%arg0: i32) -> (i32, i32) {
    %c0_i32 = arith.constant 0 : i32
    %c0_i32_0 = arith.constant 0 : i32
    return %c0_i32, %arg0 : i32, i32
  }
}

</mosaic_0001>

<bundles_post_ra>
// kernel: tpu_custom_call.1
= control target key start
LH: loop header
LB: loop body
LE: loop exit
PB: predicated region body
PF: predicated region fallthrough
CT: control target
= control target key end

     0   :  { %s9857_s0 = inlined_call_operand.hbm [shape: f32[2,2048], index: 0, kind: input, shape index: {}]   ;;  %s9858_s1 = inlined_call_operand.hbm [shape: f32[2,1000], index: 1, kind: input, shape index: {}]   ;;  %s9859_s2 = inlined_call_operand.hbm [shape: bf16[2,2048,512], index: 2, kind: input, shape index: {}]   ;;  %s9860_s3 = inlined_call_operand.hbm [shape: bf16[2,1000,512], index: 3, kind: input, shape index: {}]   ;;  %s9861_s4 = inlined_call_operand.hbm [shape: f32[1,1024], index: 4, kind: input, shape index: {}]   ;;  %s9862_s5 = inlined_call_operand.hbm [shape: f32[2,1024], index: 5, kind: output, shape index: {}]  }
   0x1   :  { %9876 = sst [smem:[#allocation17_spill]] %s9857_s0 }
   0x2   :  { %9877 = sst [smem:[#allocation18_spill]] %s9859_s2 }
   0x3   :  { %9878 = sst [smem:[#allocation19_spill]] %s9860_s3 }
   0x4   :  { %10 = vsyncpa [#allocation3], 0 }
   0x5   :  { %11 = vsyncpa [#allocation6], 0 }
   0x6   :  { %12 = vsyncpa [#allocation4], 0 }
   0x7   :  { %14 = vsyncpa [#allocation4 + $0x1], 0  ;;  %s8557_s18 = smov 0   ;;  %s8559_s19 = smov 0  }
   0x8   :  { %s8561_s20 = smov 0   ;;  %s8563_s21 = smov 0  }
   0x9 LB: > { %9879 = sst [smem:[#allocation15_spill]] %s8512_s20  ;;  %s8578_s22 = sadd.s32 4294967295, %s8516_s21   ;;  %s8516_s21 = sphi %s8563_s21, %s9913_s21   ;;  %s8512_s20 = sphi %s8561_s20, %s9910_s20   ;;  %s8508_s19 = sphi %s8559_s19, %s9912_s19   ;;  %s8504_s18 = sphi %s8557_s18, %s9911_s18  }
   0xa   : > { %s6269_s23 = sadd.s32 4294967294, %s8516_s21   ;;  %s8582_s24 = sadd.s32 1, %s8516_s21  }
   0xb   : > { %s69_s25 = sadd.s32 1, %s8512_s20  ;;  %s66_s26 = ssub.s32 %s8516_s21, %s8582_s24 }
   0xc   : > { %p76_p0 = scmp.ne.s32.totalorder %s8512_s20, %s8508_s19  ;;  %p67_p1 = scmp.eq.s32.totalorder %s66_s26, 0 }
   0xd   : > { %p77_p2 = scmp.eq.s32.totalorder %s8516_s21, 0  ;;  %p82_p3 = scmp.ne.s32.totalorder %s8508_s19, %s8504_s18 }
   0xe   : > { %p9863_p4 = scmp.eq.s32.totalorder %s8578_s22, 0  ;;  %p158_p7 = scmp.eq.s32.totalorder %s8578_s22, 1 }
   0xf   : > { %s8594_s27 = scalar_select %p67_p1, %s8512_s20, %s69_s25  }
  0x10   : > { %p8596_p5 = por %p77_p2, %p76_p0  ;;  %p8602_p6 = por %p9863_p4, %p82_p3 }
  0x11   : > { %9880 = sst [smem:[#allocation16_spill]] %s8594_s27  ;;  %p164_p8 = scmp.eq.s32.totalorder %s6269_s23, 1 }
  0x12   : > { %s9882_s29 = scalar_select %p8602_p6, 1, 0 }
  0x13   : > { %p6270_p9 = scmp.ge.s32.totalorder %s8516_s21, 1  ;;  %p171_p10 = scmp.lt.s32.totalorder %s8516_s21, 3 }
  0x14   : > { %p8609_p11 = por %p158_p7, %p76_p0  ;;  %p8613_p12 = por %p164_p8, %p82_p3 }
  0x15   : > { %p8617_p13 = pnand %p6270_p9, %p171_p10  ;;  %s8518_s8 = smov [#allocation2]  }
  0x16   : > { %s9883_s30 = scalar_select %p8609_p11, 1, 0 }
  0x17   : > { %s9884_s6 = scalar_select %p8613_p12, 1, 0 }
  0x18   : > { %s9885_s7 = scalar_select %p8617_p13, 1, 0 }
  0x19   : > { %p7082_p2 = pneg %p8617_p13  ;;  %s184_s9 = sshll.u32 %s8518_s8, 4  ;;  %s185_s9 = int_to_ptr.vmem [resolvable:$true] %s184_s9 }
  0x1a   : > { %p7105_p4 = scmp.lt.s32.totalorder %s8516_s21, 2  ;;  %p9886_p0 = scmp.eq.s32.totalorder %s8578_s22, 0 }
  0x1b   : > { %s206_s11 = sand.u32 1, %s8516_s21   ;;  %s8639_s13 = sand.u32 1, %s8512_s20  }
  0x1c   : > { %p8627_p7 = pnand %p7082_p2, %p9886_p0  ;;  %p8634_p3 = pnand %p7105_p4, %p8596_p5 }
  0x1d   : > { %s9889_s0 = sld [smem:[#allocation17_spill]] }
  0x1e   : > { %s9887_s10 = scalar_select %p8627_p7, 1, 0 }
  0x1f   : > { %s9888_s12 = scalar_select %p8634_p3, 1, 0 }
  0x20   : > { %p9868_p9 = pneg %p8627_p7 }
  0x23   : > { %s8296_s16 = scalar_lea.hbm %s9889_s0, 512 }
  0x24   : > { %p8297_p8 = scmp.ne.s32.totalorder %s9889_s0, %s8296_s16  ;;  %p8303_p4 = scmp.lt.u32.totalorder %s8296_s16, %s9889_s0 }
  0x26   : > { %p8299_p10 = pnand %p9868_p9, %p8297_p8 }
  0x28   : > { %p8300_p2 = pneg %p8299_p10 }
  0x2a   : > { %p8305_p5 = pnand %p8303_p4, %p8300_p2 }
  0x2c   : > { %8308 = shalt.err (!%p8305_p5)
}
  0x2d   : > { %s8309_s28 = scalar_lea.vmem %s185_s9, 512  ;;  %p8317_p11 = scmp.lt.s32.totalorder %s185_s9, %s185_s9 }
  0x2e   : > { %p8310_p0 = scmp.ne.s32.totalorder %s185_s9, %s8309_s28  ;;  %p8318_p6 = scmp.lt.s32.totalorder %s8309_s28, %s8309_s28 }
  0x30   : > { %p8312_p1 = pnand %p8310_p0, %p9868_p9  ;;  %p8319_p13 = por %p8318_p6, %p8317_p11 }
  0x32   : > { %p8313_p12 = pneg %p8312_p1 }
  0x34   : > { %p8320_p3 = pnand %p8319_p13, %p8313_p12 }
  0x36   : > { %8323 = shalt.err (!%p8320_p3)
}
  0x37   : > { %7085 = dma.hbm_to_vmem [thread:$0]  (!%p8627_p7), %s9889_s0, 512, %s185_s9, [#allocation3]  }
  0x38   : > { %s6274_s15 = sshll.u32 %s8639_s13, 12  ;;  %s7060_s16 = sshll.u32 %s8516_s21, 16 }
  0x39   : > { %s9890_s2 = sld [smem:[#allocation18_spill]]  ;;  %s210_s26 = scalar_lea.vmem [#allocation7], %s6274_s15 }
  0x3a   : > { %s217_s28 = sshll.u32 %s210_s26, 4  ;;  %s7063_s8 = smul.u32 2000, %s8639_s13  ;;  %s8670_s28 = int_to_ptr.vmem [resolvable:$true] %s217_s28 }
  0x3b   : > { %s8673_s14 = scalar_lea.sflag [#allocation3], %s206_s11  ;;  %p9891_p11 = scmp.ne.s32.totalorder %s9888_s12, 0 }
  0x3d   : > { %p8679_p12 = pneg %p9891_p11 }
  0x3f   : > { %s8668_s25 = scalar_lea.hbm %s9890_s2, %s7060_s16  ;;  %s8329_s15 = scalar_lea.hbm %s9890_s2, 131072 }
  0x40   : > { %s8324_s27 = scalar_lea.hbm %s8668_s25, 65536  ;;  %p8330_p3 = scmp.lt.u32.totalorder %s8668_s25, %s9890_s2 }
  0x41   : > { %p8325_p6 = scmp.ne.s32.totalorder %s8668_s25, %s8324_s27  ;;  %p8331_p8 = scmp.lt.u32.totalorder %s8329_s15, %s8324_s27 }
  0x42   : > { %s9892_s9 = scalar_select %p8679_p12, 1, 0 }
  0x43   : > { %p8327_p13 = pnand %p8679_p12, %p8325_p6  ;;  %p8332_p10 = por %p8331_p8, %p8330_p3 }
  0x44   : > { %p8333_p2 = scmp.lt.u32.totalorder %s8324_s27, %s8668_s25 }
  0x45   : > { %p8328_p1 = pneg %p8327_p13 }
  0x46   : > { %p8334_p4 = por %p8333_p2, %p8332_p10 }
  0x48   : > { %p8335_p5 = pnand %p8334_p4, %p8328_p1 }
  0x4a   : > { %8338 = shalt.err (!%p8335_p5)
}
  0x4b   : > { %s8339_s11 = scalar_lea.vmem %s8670_s28, 65536  ;;  %s8519_s16 = smov [#allocation7]  }
  0x4c   : > { %p8340_p0 = scmp.ne.s32.totalorder %s8670_s28, %s8339_s11  ;;  %s8344_s17 = sshll.u32 %s8519_s16, 4  ;;  %s8345_s17 = int_to_ptr.vmem [resolvable:$false] %s8344_s17 }
  0x4d   : > { %s8346_s23 = scalar_lea.vmem %s8345_s17, 131072  ;;  %p8347_p9 = scmp.lt.s32.totalorder %s8670_s28, %s8345_s17 }
  0x4e   : > { %p8342_p6 = pnand %p8340_p0, %p8679_p12  ;;  %p8348_p7 = scmp.lt.s32.totalorder %s8346_s23, %s8339_s11 }
  0x50   : > { %p8343_p13 = pneg %p8342_p6  ;;  %p8349_p3 = por %p8348_p7, %p8347_p9 }
  0x52   : > { %p8350_p8 = pnand %p8349_p3, %p8343_p13 }
  0x54   : > { %8353 = shalt.err (!%p8350_p8)
}
  0x55   : > { %s9871_s27 = smov 256   ;;  %s8521_s15 = smov 16  }
  0x56   : > { %7092 = dma.hbm_to_vmem [thread:$0]  (!%p9891_p11), %s8668_s25, 65536, %s8670_s28, %s8673_s14, %s9871_s27, %s9871_s27, %s8521_s15  }
  0x57   : > { %s7064_s26 = smul.u32 32000, %s8516_s21  ;;  %s231_s11 = scalar_lea.vmem [#allocation8], %s7063_s8 }
  0x58   : > { %s238_s16 = sshll.u32 %s231_s11, 4  ;;  %s9893_s3 = sld [smem:[#allocation19_spill]]  ;;  %s8714_s16 = int_to_ptr.vmem [resolvable:$true] %s238_s16 }
  0x5e   : > { %s8712_s0 = scalar_lea.hbm %s9893_s3, %s7064_s26  ;;  %s8359_s8 = scalar_lea.hbm %s9893_s3, 64000 }
  0x5f   : > { %s8354_s2 = scalar_lea.hbm %s8712_s0, 32000  ;;  %p8360_p10 = scmp.lt.u32.totalorder %s8712_s0, %s9893_s3 }
  0x60   : > { %p8355_p7 = scmp.ne.s32.totalorder %s8712_s0, %s8354_s2  ;;  %p8361_p2 = scmp.lt.u32.totalorder %s8359_s8, %s8354_s2 }
  0x61   : > { %p8363_p5 = scmp.lt.u32.totalorder %s8354_s2, %s8712_s0 }
  0x62   : > { %p8357_p9 = pnand %p8355_p7, %p8679_p12  ;;  %p8362_p4 = por %p8361_p2, %p8360_p10 }
  0x64   : > { %p8358_p1 = pneg %p8357_p9  ;;  %p8364_p0 = por %p8363_p5, %p8362_p4 }
  0x66   : > { %p8365_p6 = pnand %p8364_p0, %p8358_p1 }
  0x68   : > { %8368 = shalt.err (!%p8365_p6)
}
  0x69   : > { %s8369_s26 = scalar_lea.vmem %s8714_s16, 32000  ;;  %s8522_s17 = smov [#allocation8]  }
  0x6a   : > { %p8370_p13 = scmp.ne.s32.totalorder %s8714_s16, %s8369_s26  ;;  %s8374_s23 = sshll.u32 %s8522_s17, 4  ;;  %s8375_s23 = int_to_ptr.vmem [resolvable:$false] %s8374_s23 }
  0x6b   : > { %s8376_s27 = scalar_lea.vmem %s8375_s23, 64000  ;;  %p8377_p7 = scmp.lt.s32.totalorder %s8714_s16, %s8375_s23 }
  0x6c   : > { %p8372_p3 = pnand %p8370_p13, %p8679_p12  ;;  %p8378_p9 = scmp.lt.s32.totalorder %s8376_s27, %s8369_s26 }
  0x6e   : > { %p8373_p8 = pneg %p8372_p3  ;;  %p8379_p10 = por %p8378_p9, %p8377_p7 }
  0x70   : > { %p8380_p2 = pnand %p8379_p10, %p8373_p8 }
  0x72   : > { %8383 = shalt.err (!%p8380_p2)
}
  0x73   : > { %s9894_s2 = smov 256   ;;  %s8523_s25 = smov [#allocation5]  }
  0x74   : > { %7095 = dma.hbm_to_vmem [thread:$0]  (!%p9891_p11), %s8712_s0, 32000, %s8714_s16, %s8673_s14, %s9894_s2, %s9894_s2, %s8521_s15  }
  0x75   : > { %s195_s28 = sshll.u32 %s8523_s25, 4  ;;  %s6278_s8 = sshll.u32 %s8639_s13, 2  ;;  %s196_s28 = int_to_ptr.vmem [resolvable:$true] %s195_s28 }
  0x76   : > { %s8384_s17 = scalar_lea.hbm %s9858_s1, 256  ;;  %p9895_p4 = scmp.ne.s32.totalorder %s9887_s10, 0 }
  0x77   : > { %p8385_p1 = scmp.ne.s32.totalorder %s9858_s1, %s8384_s17  ;;  %p8391_p13 = scmp.lt.u32.totalorder %s8384_s17, %s9858_s1 }
  0x78   : > { %p9896_p5 = pneg %p9895_p4 }
  0x7a   : > { %p8387_p0 = pnand %p8385_p1, %p9896_p5 }
  0x7c   : > { %p8388_p6 = pneg %p8387_p0 }
  0x7e   : > { %p8393_p3 = pnand %p8391_p13, %p8388_p6 }
  0x80   : > { %8396 = shalt.err (!%p8393_p3)
}
  0x81   : > { %s8397_s0 = scalar_lea.vmem %s196_s28, 256  ;;  %p9897_p7 = pmov %p9896_p5 }
  0x82   : > { %p8398_p8 = scmp.ne.s32.totalorder %s196_s28, %s8397_s0  ;;  %p8405_p2 = scmp.lt.s32.totalorder %s196_s28, %s196_s28 }
  0x83   : > { %p8406_p11 = scmp.lt.s32.totalorder %s8397_s0, %s8397_s0 }
  0x84   : > { %p8400_p9 = pnand %p8398_p8, %p9897_p7 }
  0x85   : > { %p8407_p12 = por %p8406_p11, %p8405_p2 }
  0x86   : > { %p8401_p10 = pneg %p8400_p9 }
  0x88   : > { %p8408_p1 = pnand %p8407_p12, %p8401_p10 }
  0x8a   : > { %8411 = shalt.err (!%p8408_p1)
}
  0x8b   : > { %7088 = dma.hbm_to_vmem [thread:$0]  (!%p9895_p4), %s9858_s1, 256, %s196_s28, [#allocation6]  }
  0x8c   : > { %s7061_s3 = sshll.u32 %s8516_s21, 6  ;;  %s252_s20 = scalar_lea.vmem [#allocation9], %s6278_s8 }
  0x8d   : > { %s260_s16 = sshll.u32 %s252_s20, 4  ;;  %s258_s11 = scalar_lea.hbm %s9861_s4, %s7061_s3  ;;  %s261_s16 = int_to_ptr.vmem [resolvable:$true] %s260_s16 }
  0x8e   : > { %s8412_s26 = scalar_lea.hbm %s258_s11, 64  ;;  %p9898_p12 = scmp.ne.s32.totalorder %s9892_s9, 0 }
  0x8f   : > { %p8413_p11 = scmp.ne.s32.totalorder %s258_s11, %s8412_s26  ;;  %s8417_s23 = scalar_lea.hbm %s9861_s4, 128 }
  0x90   : > { %p8418_p4 = scmp.lt.u32.totalorder %s258_s11, %s9861_s4  ;;  %p8419_p6 = scmp.lt.u32.totalorder %s8417_s23, %s8412_s26 }
  0x91   : > { %p8415_p5 = pnand %p8413_p11, %p9898_p12  ;;  %p8421_p3 = scmp.lt.u32.totalorder %s8412_s26, %s258_s11 }
  0x92   : > { %p8420_p13 = por %p8419_p6, %p8418_p4 }
  0x93   : > { %p8416_p0 = pneg %p8415_p5 }
  0x94   : > { %p8422_p8 = por %p8421_p3, %p8420_p13 }
  0x96   : > { %p8423_p7 = pnand %p8422_p8, %p8416_p0 }
  0x98   : > { %8426 = shalt.err (!%p8423_p7)
}
  0x99   : > { %s8427_s28 = scalar_lea.vmem %s261_s16, 64  ;;  %s8524_s8 = smov [#allocation9]  }
  0x9a   : > { %p8428_p9 = scmp.ne.s32.totalorder %s261_s16, %s8427_s28  ;;  %s8432_s13 = sshll.u32 %s8524_s8, 4  ;;  %s8433_s13 = int_to_ptr.vmem [resolvable:$false] %s8432_s13 }
  0x9b   : > { %s8434_s15 = scalar_lea.vmem %s8433_s13, 128  ;;  %p8435_p1 = scmp.lt.s32.totalorder %s261_s16, %s8433_s13 }
  0x9c   : > { %p8430_p10 = pnand %p8428_p9, %p9898_p12  ;;  %p8436_p11 = scmp.lt.s32.totalorder %s8434_s15, %s8427_s28 }
  0x9e   : > { %p8431_p2 = pneg %p8430_p10  ;;  %p8437_p5 = por %p8436_p11, %p8435_p1 }
  0xa0   : > { %p8438_p4 = pnand %p8437_p5, %p8431_p2 }
  0xa2   : > { %8441 = shalt.err (!%p8438_p4)
}
  0xa3   : > { %p9899_p6 = scmp.ne.s32.totalorder %s9888_s12, 0  ;;  %p9900_p0 = scmp.ne.s32.totalorder %s9885_s7, 0 }
  0xa4   : > { %p9901_p13 = scmp.eq.s32.totalorder (!%p9900_p0), %s8578_s22, 0 }
  0xa5   : > { %7098 = dma.hbm_to_vmem [thread:$0]  (!%p9899_p6), %s258_s11, 64, %s261_s16, %s8673_s14  }
  0xa6   : > { %269 = sbr.rel (%p9900_p0) target bundleno = 1190 (0x4a6), region = 40 }
  0xad   : > { %8487 = dma.done.wait (%p9901_p13), [#allocation3], 512   ;;  %p9902_p12 = pmov %p9901_p13 }
  0xaf   : > { %8489 = vsyncadd (%p9902_p12), [#allocation3], 4294966784  ;;  %p9903_p3 = pmov %p9902_p12 }
  0xb1   : > { %8491 = dma.done.wait (%p9903_p3), [#allocation6], 256   ;;  %p9904_p8 = pmov %p9903_p3 }
  0xb2   : > { %s279_s12 = sand.u32 1, %s8578_s22   ;;  %s8791_s14 = sand.u32 1, %s8508_s19  }
  0xb3   : > { %8493 = vsyncadd (%p9904_p8), [#allocation6], 4294967040  ;;  %s6284_s7 = sshll.u32 %s8791_s14, 12  ;;  %s280_s9 = scalar_lea.sflag [#allocation3], %s279_s12 }
  0xb4   : > { %s8794_s3 = scalar_lea.vmem [#allocation7], %s6284_s7  ;;  %p9905_p7 = scmp.ne.s32.totalorder %s9882_s29, 0 }
  0xb6   : > { %8495 = dma.done.wait (%p9905_p7), %s280_s9, 97600  }
  0xb7   : > { %8497 = vsyncadd (%p9905_p7), %s280_s9, 4294869696  ;;  %s7065_s20 = smul.u32 2000, %s8791_s14  ;;  %v8525_v36 = vmov 1983009808   ;;  %v353_v38 = vlaneseq  ;;  %v449_v52 = vld [vmem:[#allocation5] sm:$0xff]  ;;  %vm2515_vm0 = vcmask 850944  }
  0xb8   : > { %v351_v37 = vunpack.c.l.s4 %v8525_v36  ;;  %v453_v55 = vcombine.high %v449_v52, %v449_v52  ;;  %vm2519_vm1 = vcmask 1043456   ;;  %s6285_s29 = sshll.u32 %s8791_s14, 2  ;;  %s6286_s25 = sshll.u32 %s8791_s14, 3 }
  0xb9   : > { %s8801_s16 = scalar_lea.vmem [#allocation8], %s7065_s20  ;;  %v8842_v43 = vshrl.u32 %v353_v38, 7  ;;  %v450_v38 = vld [vmem:[#allocation5 + $0x8] sm:$0xff]  ;;  %s301_s2 = scalar_lea.vmem [#allocation9], %s6285_s29 }
  0xba   : > { %v7146_v0 = vld [vmem:[%s8801_s16 + $0x4] ss:$16 sps:$4 sm:$0xff]   ;;  %v7150_v2 = vld [vmem:[%s8801_s16] ss:$16 sps:$4 sm:$0xff]   ;;  %v352_v42 = vunpack.c.0.s8 %v351_v37  ;;  %s7062_s11 = sshll.u32 %s8578_s22, 7  ;;  %s337_s26 = scalar_lea.vmem [#allocation10], %s6286_s25 }
  0xbb   : > { %v7148_v1 = vld [vmem:[%s8801_s16 + $0x204] ss:$16 sps:$4 sm:$0xff]   ;;  %2532 = vmatprep.subr.bf16.mxu0 %v7146_v0  ;;  %v7151_v3 = vld [vmem:[%s8801_s16 + $0x200] ss:$16 sps:$4 sm:$0xff]   ;;  %s6140_s10 = sshll.u32 %s337_s26, 4  ;;  %s9813_s27 = scalar_lea.hbm %s9862_s5, %s7062_s11  ;;  %s9815_s10 = int_to_ptr.vmem [resolvable:$true] %s6140_s10 }
  0xbc   : > { %2573 = vmatprep.subr.bf16.mxu1 %v7148_v1  ;;  %v7152_v4 = vld [vmem:[%s8801_s16 + $0x24] ss:$16 sps:$4 sm:$0xff]   ;;  %2533 = vmatpush1.bf16.msra.mxu0 %v7150_v2  ;;  %v7156_v6 = vld [vmem:[%s8801_s16 + $0x20] ss:$16 sps:$4 sm:$0xff]   ;;  %v8850_v49 = vsub.s32 %v352_v42, %v8842_v43  ;;  %s6126_s22 = scalar_lea.sflag [#allocation4], %s8791_s14  ;;  %s8442_s0 = scalar_lea.vmem %s9815_s10, 128 }
  0xbd   : > { %2574 = vmatpush1.bf16.msra.mxu1 %v7151_v3  ;;  %v7154_v5 = vld [vmem:[%s8801_s16 + $0x224] ss:$16 sps:$4 sm:$0xff]   ;;  %2534 = vmatprep.subr.bf16.mxu0 %v7152_v4  ;;  %v7157_v7 = vld [vmem:[%s8801_s16 + $0x220] ss:$16 sps:$4 sm:$0xff]   ;;  %p8443_p9 = scmp.ne.s32.totalorder %s9815_s10, %s8442_s0  ;;  %p9906_p10 = scmp.ne.s32.totalorder %s9883_s30, 0 }
  0xbe   : > { %2575 = vmatprep.subr.bf16.mxu1 %v7154_v5  ;;  %v7158_v8 = vld [vmem:[%s8801_s16 + $0x44] ss:$16 sps:$4 sm:$0xff]   ;;  %v7162_v10 = vld [vmem:[%s8801_s16 + $0x40] ss:$16 sps:$4 sm:$0xff]   ;;  %v460_v54 = vrot.slane %v449_v52, %v8850_v49  ;;  %v467_v60 = vrot.slane %v453_v55, %v8850_v49  ;;  %s8526_s28 = smov [#allocation10]  }
  0xbf   : > { %v7160_v9 = vld [vmem:[%s8801_s16 + $0x244] ss:$16 sps:$4 sm:$0xff]   ;;  %v7163_v11 = vld [vmem:[%s8801_s16 + $0x240] ss:$16 sps:$4 sm:$0xff]   ;;  %p8444_p2 = pnand %p8443_p9, %p9906_p10  ;;  %s8446_s8 = sshll.u32 %s8526_s28, 4  ;;  %s8447_s8 = int_to_ptr.vmem [resolvable:$false] %s8446_s8 }
  0xc0   : > { %2535 = vmatpush1.bf16.msra.mxu0 %v7156_v6  ;;  %v7164_v12 = vld [vmem:[%s8801_s16 + $0x64] ss:$16 sps:$4 sm:$0xff]   ;;  %v7168_v14 = vld [vmem:[%s8801_s16 + $0x60] ss:$16 sps:$4 sm:$0xff]   ;;  %v468_v59 = vcombine.high %v460_v54, %v460_v54  ;;  %v469_v63 = vcombine.high %v467_v60, %v467_v60  ;;  %s8448_s13 = scalar_lea.vmem %s8447_s8, 256  ;;  %p8449_p11 = scmp.lt.s32.totalorder %s9815_s10, %s8447_s8 }
  0xc1   : > { %2576 = vmatpush1.bf16.msra.mxu1 %v7157_v7  ;;  %2536 = vmatprep.subr.bf16.mxu0 %v7158_v8  ;;  %v7166_v13 = vld [vmem:[%s8801_s16 + $0x264] ss:$16 sps:$4 sm:$0xff]   ;;  %v7169_v15 = vld [vmem:[%s8801_s16 + $0x260] ss:$16 sps:$4 sm:$0xff]   ;;  %p8445_p1 = pneg %p8444_p2  ;;  %p8450_p5 = scmp.lt.s32.totalorder %s8448_s13, %s8442_s0 }
  0xc2   : > { %2577 = vmatprep.subr.bf16.mxu1 %v7160_v9  ;;  %v7170_v16 = vld [vmem:[%s8801_s16 + $0x84] ss:$16 sps:$4 sm:$0xff]   ;;  %v7174_v18 = vld [vmem:[%s8801_s16 + $0x80] ss:$16 sps:$4 sm:$0xff]   ;;  %v8861_v62 = vpack.c.bf16 %v468_v59, %v468_v59  ;;  %v8866_v3 = vpack.c.bf16 %v469_v63, %v469_v63 }
  0xc3   : > { %v7172_v17 = vld [vmem:[%s8801_s16 + $0x284] ss:$16 sps:$4 sm:$0xff]   ;;  %v7175_v19 = vld [vmem:[%s8801_s16 + $0x280] ss:$16 sps:$4 sm:$0xff]   ;;  %p8451_p4 = por %p8450_p5, %p8449_p11 }
  0xc4   : > { %2537 = vmatpush1.bf16.msra.mxu0 %v7162_v10  ;;  %v7176_v20 = vld [vmem:[%s8801_s16 + $0xa4] ss:$16 sps:$4 sm:$0xff]   ;;  %v7180_v22 = vld [vmem:[%s8801_s16 + $0xa0] ss:$16 sps:$4 sm:$0xff]   ;;  %2564 = vmatprep.mubr.bf16.mxu0 %v8861_v62 }
  0xc5   : > { %2578 = vmatpush1.bf16.msra.mxu1 %v7163_v11  ;;  %2538 = vmatprep.subr.bf16.mxu0 %v7164_v12  ;;  %v7178_v21 = vld [vmem:[%s8801_s16 + $0x2a4] ss:$16 sps:$4 sm:$0xff]   ;;  %v7181_v23 = vld [vmem:[%s8801_s16 + $0x2a0] ss:$16 sps:$4 sm:$0xff]   ;;  %p8452_p6 = pnand %p8451_p4, %p8445_p1 }
  0xc6   : > { %2579 = vmatprep.subr.bf16.mxu1 %v7166_v13  ;;  %v7182_v24 = vld [vmem:[%s8801_s16 + $0xc4] ss:$16 sps:$4 sm:$0xff]   ;;  %v7186_v26 = vld [vmem:[%s8801_s16 + $0xc0] ss:$16 sps:$4 sm:$0xff]   ;;  %2605 = vmatprep.mubr.bf16.mxu1 %v8866_v3 }
  0xc7   : > { %v7184_v25 = vld [vmem:[%s8801_s16 + $0x2c4] ss:$16 sps:$4 sm:$0xff]   ;;  %v7187_v27 = vld [vmem:[%s8801_s16 + $0x2c0] ss:$16 sps:$4 sm:$0xff]  }
  0xc8   : > { %2539 = vmatpush1.bf16.msra.mxu0 %v7168_v14  ;;  %v7188_v28 = vld [vmem:[%s8801_s16 + $0xe4] ss:$16 sps:$4 sm:$0xff]   ;;  %v7192_v30 = vld [vmem:[%s8801_s16 + $0xe0] ss:$16 sps:$4 sm:$0xff]  }
  0xc9   : > { %2580 = vmatpush1.bf16.msra.mxu1 %v7169_v15  ;;  %2540 = vmatprep.subr.bf16.mxu0 %v7170_v16  ;;  %v7190_v29 = vld [vmem:[%s8801_s16 + $0x2e4] ss:$16 sps:$4 sm:$0xff]   ;;  %v7193_v31 = vld [vmem:[%s8801_s16 + $0x2e0] ss:$16 sps:$4 sm:$0xff]   ;;  %v8882_v16 = vpack.c.bf16 %v460_v54, %v460_v54 }
  0xca   : > { %2581 = vmatprep.subr.bf16.mxu1 %v7172_v17  ;;  %v7194_v32 = vld [vmem:[%s8801_s16 + $0x104] ss:$16 sps:$4 sm:$0xff]   ;;  %v7198_v34 = vld [vmem:[%s8801_s16 + $0x100] ss:$16 sps:$4 sm:$0xff]   ;;  %v8884_v17 = vpack.c.bf16 %v467_v60, %v467_v60 }
  0xcb   : > { %v7196_v33 = vld [vmem:[%s8801_s16 + $0x304] ss:$16 sps:$4 sm:$0xff]   ;;  %v7199_v35 = vld [vmem:[%s8801_s16 + $0x300] ss:$16 sps:$4 sm:$0xff]  }
  0xcc   : > { %2541 = vmatpush1.bf16.msra.mxu0 %v7174_v18  ;;  %v7200_v39 = vld [vmem:[%s8801_s16 + $0x124] ss:$16 sps:$4 sm:$0xff]   ;;  %v7204_v41 = vld [vmem:[%s8801_s16 + $0x120] ss:$16 sps:$4 sm:$0xff]  }
  0xcd   : > { %2582 = vmatpush1.bf16.msra.mxu1 %v7175_v19  ;;  %2542 = vmatprep.subr.bf16.mxu0 %v7176_v20  ;;  %v7202_v40 = vld [vmem:[%s8801_s16 + $0x324] ss:$16 sps:$4 sm:$0xff]   ;;  %v7205_v44 = vld [vmem:[%s8801_s16 + $0x320] ss:$16 sps:$4 sm:$0xff]  }
  0xce   : > { %2583 = vmatprep.subr.bf16.mxu1 %v7178_v21  ;;  %v7206_v45 = vld [vmem:[%s8801_s16 + $0x144] ss:$16 sps:$4 sm:$0xff]   ;;  %v7210_v47 = vld [vmem:[%s8801_s16 + $0x140] ss:$16 sps:$4 sm:$0xff]  }
  0xcf   : > { %v7208_v46 = vld [vmem:[%s8801_s16 + $0x344] ss:$16 sps:$4 sm:$0xff]   ;;  %v7211_v48 = vld [vmem:[%s8801_s16 + $0x340] ss:$16 sps:$4 sm:$0xff]  }
  0xd0   : > { %2543 = vmatpush1.bf16.msra.mxu0 %v7180_v22  ;;  %v7212_v50 = vld [vmem:[%s8801_s16 + $0x164] ss:$16 sps:$4 sm:$0xff]   ;;  %v7216_v53 = vld [vmem:[%s8801_s16 + $0x160] ss:$16 sps:$4 sm:$0xff]  }
  0xd1   : > { %2584 = vmatpush1.bf16.msra.mxu1 %v7181_v23  ;;  %2544 = vmatprep.subr.bf16.mxu0 %v7182_v24  ;;  %v7214_v51 = vld [vmem:[%s8801_s16 + $0x364] ss:$16 sps:$4 sm:$0xff]   ;;  %v7217_v56 = vld [vmem:[%s8801_s16 + $0x360] ss:$16 sps:$4 sm:$0xff]  }
  0xd2   : > { %2585 = vmatprep.subr.bf16.mxu1 %v7184_v25  ;;  %v7218_v57 = vld [vmem:[%s8801_s16 + $0x184] ss:$16 sps:$4 sm:$0xff]   ;;  %v7222_v61 = vld [vmem:[%s8801_s16 + $0x180] ss:$16 sps:$4 sm:$0xff]  }
  0xd3   : > { %v7220_v58 = vld [vmem:[%s8801_s16 + $0x384] ss:$16 sps:$4 sm:$0xff]   ;;  %v7223_v0 = vld [vmem:[%s8801_s16 + $0x380] ss:$16 sps:$4 sm:$0xff]  }
  0xd4   : > { %2545 = vmatpush1.bf16.msra.mxu0 %v7186_v26  ;;  %v7224_v1 = vld [vmem:[%s8801_s16 + $0x1a4] ss:$16 sps:$4 sm:$0xff]   ;;  %v7228_v4 = vld [vmem:[%s8801_s16 + $0x1a0] ss:$16 sps:$4 sm:$0xff]  }
  0xd5   : > { %2586 = vmatpush1.bf16.msra.mxu1 %v7187_v27  ;;  %2546 = vmatprep.subr.bf16.mxu0 %v7188_v28  ;;  %v7226_v2 = vld [vmem:[%s8801_s16 + $0x3a4] ss:$16 sps:$4 sm:$0xff]   ;;  %v7229_v5 = vld [vmem:[%s8801_s16 + $0x3a0] ss:$16 sps:$4 sm:$0xff]  }
  0xd6   : > { %2587 = vmatprep.subr.bf16.mxu1 %v7190_v29  ;;  %v7230_v6 = vld [vmem:[%s8801_s16 + $0x1c4] ss:$16 sps:$4 sm:$0xff]   ;;  %v7234_v8 = vld [vmem:[%s8801_s16 + $0x1c0] ss:$16 sps:$4 sm:$0xff]  }
  0xd7   : > { %v7232_v7 = vld [vmem:[%s8801_s16 + $0x3c4] ss:$16 sps:$4 sm:$0xff]   ;;  %v7235_v9 = vld [vmem:[%s8801_s16 + $0x3c0] ss:$16 sps:$4 sm:$0xff]  }
  0xd8   : > { %2547 = vmatpush1.bf16.msra.mxu0 %v7192_v30  ;;  %v7236_v10 = vld [vmem:[%s8801_s16 + $0x1e4] ss:$16 sps:$4 sm:$0xff]   ;;  %v7240_v12 = vld [vmem:[%s8801_s16 + $0x1e0] ss:$16 sps:$4 sm:$0xff]  }
  0xd9   : > { %2588 = vmatpush1.bf16.msra.mxu1 %v7193_v31  ;;  %2548 = vmatprep.subr.bf16.mxu0 %v7194_v32  ;;  %v7238_v11 = vld [vmem:[%s8801_s16 + $0x3e4] ss:$16 sps:$4 sm:$0xff]   ;;  %v7241_v13 = vld [vmem:[%s8801_s16 + $0x3e0] ss:$16 sps:$4 sm:$0xff]  }
  0xda   : > { %2589 = vmatprep.subr.bf16.mxu1 %v7196_v33  ;;  %v7245_v14 = vld [vmem:[%s8801_s16 + $0x404] ss:$16 sps:$4 sm:$0xff]   ;;  %v7243_v18 = vld [vmem:[%s8801_s16 + $0x400] ss:$16 sps:$4 sm:$0xff]  }
  0xdb   : > { %v7248_v15 = vld [vmem:[%s8801_s16 + $0x604] ss:$16 sps:$4 sm:$0xff]   ;;  %v7246_v19 = vld [vmem:[%s8801_s16 + $0x600] ss:$16 sps:$4 sm:$0xff]  }
  0xdc   : > { %2549 = vmatpush1.bf16.msra.mxu0 %v7198_v34  ;;  %v7251_v20 = vld [vmem:[%s8801_s16 + $0x424] ss:$16 sps:$4 sm:$0xff]   ;;  %v7249_v22 = vld [vmem:[%s8801_s16 + $0x420] ss:$16 sps:$4 sm:$0xff]  }
  0xdd   : > { %2590 = vmatpush1.bf16.msra.mxu1 %v7199_v35  ;;  %2550 = vmatprep.subr.bf16.mxu0 %v7200_v39  ;;  %v7254_v21 = vld [vmem:[%s8801_s16 + $0x624] ss:$16 sps:$4 sm:$0xff]   ;;  %v7252_v23 = vld [vmem:[%s8801_s16 + $0x620] ss:$16 sps:$4 sm:$0xff]  }
  0xde   : > { %2591 = vmatprep.subr.bf16.mxu1 %v7202_v40  ;;  %v7257_v24 = vld [vmem:[%s8801_s16 + $0x444] ss:$16 sps:$4 sm:$0xff]   ;;  %v7255_v26 = vld [vmem:[%s8801_s16 + $0x440] ss:$16 sps:$4 sm:$0xff]   ;;  %v470_v40 = vcombine.high %v450_v38, %v450_v38 }
  0xdf   : > { %v7260_v25 = vld [vmem:[%s8801_s16 + $0x644] ss:$16 sps:$4 sm:$0xff]   ;;  %v7258_v27 = vld [vmem:[%s8801_s16 + $0x640] ss:$16 sps:$4 sm:$0xff]  }
  0xe0   : > { %2551 = vmatpush1.bf16.msra.mxu0 %v7204_v41  ;;  %v7263_v28 = vld [vmem:[%s8801_s16 + $0x464] ss:$16 sps:$4 sm:$0xff]   ;;  %v7261_v30 = vld [vmem:[%s8801_s16 + $0x460] ss:$16 sps:$4 sm:$0xff]   ;;  %v8910_v41 = vrot.slane %v450_v38, %v8850_v49  ;;  %v7347_v38 = vld [vmem:[%s8801_s16 + $0x4c] ss:$16 sps:$4 sm:$0xff]  }
  0xe1   : > { %2592 = vmatpush1.bf16.msra.mxu1 %v7205_v44  ;;  %2552 = vmatprep.subr.bf16.mxu0 %v7206_v45  ;;  %v7266_v29 = vld [vmem:[%s8801_s16 + $0x664] ss:$16 sps:$4 sm:$0xff]   ;;  %v7264_v31 = vld [vmem:[%s8801_s16 + $0x660] ss:$16 sps:$4 sm:$0xff]  }
  0xe2   : > { %2593 = vmatprep.subr.bf16.mxu1 %v7208_v46  ;;  %v7269_v32 = vld [vmem:[%s8801_s16 + $0x484] ss:$16 sps:$4 sm:$0xff]   ;;  %v7267_v34 = vld [vmem:[%s8801_s16 + $0x480] ss:$16 sps:$4 sm:$0xff]   ;;  %v8916_v46 = vrot.slane %v470_v40, %v8850_v49  ;;  %v7345_v40 = vld [vmem:[%s8801_s16 + $0x48] ss:$16 sps:$4 sm:$0xff]  }
  0xe3   : > { %v7272_v33 = vld [vmem:[%s8801_s16 + $0x684] ss:$16 sps:$4 sm:$0xff]   ;;  %v7270_v35 = vld [vmem:[%s8801_s16 + $0x680] ss:$16 sps:$4 sm:$0xff]  }
  0xe4   : > { %2553 = vmatpush1.bf16.msra.mxu0 %v7210_v47  ;;  %v7275_v36 = vld [vmem:[%s8801_s16 + $0x4a4] ss:$16 sps:$4 sm:$0xff]   ;;  %v7273_v39 = vld [vmem:[%s8801_s16 + $0x4a0] ss:$16 sps:$4 sm:$0xff]   ;;  %v485_v47 = vcombine.high %v8910_v41, %v8910_v41 }
  0xe5   : > { %2594 = vmatpush1.bf16.msra.mxu1 %v7211_v48  ;;  %2554 = vmatprep.subr.bf16.mxu0 %v7212_v50  ;;  %v7278_v37 = vld [vmem:[%s8801_s16 + $0x6a4] ss:$16 sps:$4 sm:$0xff]   ;;  %v7276_v42 = vld [vmem:[%s8801_s16 + $0x6a0] ss:$16 sps:$4 sm:$0xff]   ;;  %v486_v50 = vcombine.high %v8916_v46, %v8916_v46 }
  0xe6   : > { %2595 = vmatprep.subr.bf16.mxu1 %v7214_v51  ;;  %v7281_v44 = vld [vmem:[%s8801_s16 + $0x4c4] ss:$16 sps:$4 sm:$0xff]   ;;  %v7279_v48 = vld [vmem:[%s8801_s16 + $0x4c0] ss:$16 sps:$4 sm:$0xff]   ;;  %v8923_v51 = vpack.c.bf16 %v485_v47, %v485_v47  ;;  %v7362_v47 = vld [vmem:[%s8801_s16 + $0x26c] ss:$16 sps:$4 sm:$0xff]  }
  0xe7   : > { %v7284_v45 = vld [vmem:[%s8801_s16 + $0x6c4] ss:$16 sps:$4 sm:$0xff]   ;;  %v7282_v52 = vld [vmem:[%s8801_s16 + $0x6c0] ss:$16 sps:$4 sm:$0xff]   ;;  %v8928_v55 = vpack.c.bf16 %v486_v50, %v486_v50  ;;  %v7360_v50 = vld [vmem:[%s8801_s16 + $0x268] ss:$16 sps:$4 sm:$0xff]  }
  0xe8   : > { %2555 = vmatpush1.bf16.msra.mxu0 %v7216_v53  ;;  %v7287_v53 = vld [vmem:[%s8801_s16 + $0x4e4] ss:$16 sps:$4 sm:$0xff]   ;;  %v7291_v60 = vld [vmem:[%s8801_s16 + $0x500] ss:$16 sps:$4 sm:$0xff]  }
  0xe9   : > { %2596 = vmatpush1.bf16.msra.mxu1 %v7217_v56  ;;  %2556 = vmatprep.subr.bf16.mxu0 %v7218_v57  ;;  %v7290_v54 = vld [vmem:[%s8801_s16 + $0x6e4] ss:$16 sps:$4 sm:$0xff]   ;;  %v7285_v56 = vld [vmem:[%s8801_s16 + $0x4e0] ss:$16 sps:$4 sm:$0xff]  }
  0xea   : > { %2597 = vmatprep.subr.bf16.mxu1 %v7220_v58  ;;  %v7288_v57 = vld [vmem:[%s8801_s16 + $0x6e0] ss:$16 sps:$4 sm:$0xff]   ;;  %v7293_v58 = vld [vmem:[%s8801_s16 + $0x504] ss:$16 sps:$4 sm:$0xff]  }
  0xeb   : > { %v7296_v59 = vld [vmem:[%s8801_s16 + $0x704] ss:$16 sps:$4 sm:$0xff]  }
  0xec   : > { %2557 = vmatpush1.bf16.msra.mxu0 %v7222_v61  ;;  %v7294_v61 = vld [vmem:[%s8801_s16 + $0x700] ss:$16 sps:$4 sm:$0xff]   ;;  %v7299_v63 = vld [vmem:[%s8801_s16 + $0x524] ss:$16 sps:$4 sm:$0xff]  }
  0xed   : > { %2598 = vmatpush1.bf16.msra.mxu1 %v7223_v0  ;;  %2558 = vmatprep.subr.bf16.mxu0 %v7224_v1  ;;  %v7302_v0 = vld [vmem:[%s8801_s16 + $0x724] ss:$16 sps:$4 sm:$0xff]   ;;  %v7297_v1 = vld [vmem:[%s8801_s16 + $0x520] ss:$16 sps:$4 sm:$0xff]  }
  0xee   : > { %2599 = vmatprep.subr.bf16.mxu1 %v7226_v2  ;;  %v7300_v2 = vld [vmem:[%s8801_s16 + $0x720] ss:$16 sps:$4 sm:$0xff]  }
  0xf0   : > { %2559 = vmatpush1.bf16.msra.mxu0 %v7228_v4  ;;  %v7305_v4 = vld [vmem:[%s8801_s16 + $0x544] ss:$16 sps:$4 sm:$0xff]  }
  0xf1   : > { %2600 = vmatpush1.bf16.msra.mxu1 %v7229_v5  ;;  %2560 = vmatprep.subr.bf16.mxu0 %v7230_v6  ;;  %v7308_v5 = vld [vmem:[%s8801_s16 + $0x744] ss:$16 sps:$4 sm:$0xff]   ;;  %v7303_v6 = vld [vmem:[%s8801_s16 + $0x540] ss:$16 sps:$4 sm:$0xff]  }
  0xf2   : > { %2601 = vmatprep.subr.bf16.mxu1 %v7232_v7  ;;  %v7306_v7 = vld [vmem:[%s8801_s16 + $0x740] ss:$16 sps:$4 sm:$0xff]  }
  0xf4   : > { %2561 = vmatpush1.bf16.msra.mxu0 %v7234_v8  ;;  %v7311_v8 = vld [vmem:[%s8801_s16 + $0x564] ss:$16 sps:$4 sm:$0xff]  }
  0xf5   : > { %2602 = vmatpush1.bf16.msra.mxu1 %v7235_v9  ;;  %2562 = vmatprep.subr.bf16.mxu0 %v7236_v10  ;;  %v7314_v9 = vld [vmem:[%s8801_s16 + $0x764] ss:$16 sps:$4 sm:$0xff]   ;;  %v7309_v10 = vld [vmem:[%s8801_s16 + $0x560] ss:$16 sps:$4 sm:$0xff]  }
  0xf6   : > { %2603 = vmatprep.subr.bf16.mxu1 %v7238_v11  ;;  %v7312_v11 = vld [vmem:[%s8801_s16 + $0x760] ss:$16 sps:$4 sm:$0xff]  }
  0xf8   : > { %2563 = vmatpush1.bf16.msra.mxu0 %v7240_v12  ;;  %v7317_v12 = vld [vmem:[%s8801_s16 + $0x584] ss:$16 sps:$4 sm:$0xff]  }
  0xf9   : > { %2604 = vmatpush1.bf16.msra.mxu1 %v7241_v13  ;;  %2614 = vmatprep.subr.bf16.mxu0 %v7245_v14  ;;  %v7320_v13 = vld [vmem:[%s8801_s16 + $0x784] ss:$16 sps:$4 sm:$0xff]   ;;  %v7315_v14 = vld [vmem:[%s8801_s16 + $0x580] ss:$16 sps:$4 sm:$0xff]  }
  0xfa   : > { %2655 = vmatprep.subr.bf16.mxu1 %v7248_v15  ;;  %v7318_v15 = vld [vmem:[%s8801_s16 + $0x780] ss:$16 sps:$4 sm:$0xff]  }
  0xfb   : > { %2565 = vmatmul.mubr.bf16.vlgmr.msra.gmra.mrb[0].mxu0 %v8882_v16 }
  0xfc   : > { %2606 = vmatmul.mubr.bf16.vlgmr.msra.gmra.mrb[0].mxu1 %v8884_v17  ;;  %2615 = vmatpush1.bf16.msra.mxu0 %v7243_v18  ;;  %v7323_v18 = vld [vmem:[%s8801_s16 + $0x5a4] ss:$16 sps:$4 sm:$0xff]  }
  0xfd   : > { %2656 = vmatpush1.bf16.msra.mxu1 %v7246_v19  ;;  %2616 = vmatprep.subr.bf16.mxu0 %v7251_v20  ;;  %v7326_v19 = vld [vmem:[%s8801_s16 + $0x7a4] ss:$16 sps:$4 sm:$0xff]  }
  0xfe   : > { %2657 = vmatprep.subr.bf16.mxu1 %v7254_v21  ;;  %2646 = vmatprep.mubr.bf16.mxu0 %v8923_v51  ;;  %v1263_v20 = vld [vmem:[%s8801_s16 + $0x7c0] sm:$0xff] }
  0xff   : > { %6540 = vmatprep.mubr.msk.bf16.mxu1 %vm2515_vm0, %v8928_v55  ;;  %v7321_v21 = vld [vmem:[%s8801_s16 + $0x5a0] ss:$16 sps:$4 sm:$0xff]  }
 0x100   : > { %2617 = vmatpush1.bf16.msra.mxu0 %v7249_v22  ;;  %v7324_v22 = vld [vmem:[%s8801_s16 + $0x7a0] ss:$16 sps:$4 sm:$0xff]  }
 0x101   : > { %2658 = vmatpush1.bf16.msra.mxu1 %v7252_v23  ;;  %2618 = vmatprep.subr.bf16.mxu0 %v7257_v24  ;;  %v7329_v23 = vld [vmem:[%s8801_s16 + $0x5c4] ss:$16 sps:$4 sm:$0xff]   ;;  %v6536_v24 = vcombine.high %v1263_v20, %v1263_v20 }
 0x102   : > { %2659 = vmatprep.subr.bf16.mxu1 %v7260_v25  ;;  %v6535_v25 = vcombine.low %v1263_v20, %v1263_v20  ;;  %v7407_v20 = vld [vmem:[%s8801_s16 + $0x18c] ss:$16 sps:$4 sm:$0xff]  }
 0x104   : > { %2619 = vmatpush1.bf16.msra.mxu0 %v7255_v26  ;;  %v7327_v26 = vld [vmem:[%s8801_s16 + $0x5c0] ss:$16 sps:$4 sm:$0xff]  }
 0x105   : > { %2660 = vmatpush1.bf16.msra.mxu1 %v7258_v27  ;;  %2620 = vmatprep.subr.bf16.mxu0 %v7263_v28  ;;  %v7335_v27 = vld [vmem:[%s8801_s16 + $0x5e4] ss:$16 sps:$4 sm:$0xff]   ;;  %v2521_v28 = vsel %vm2519_vm1, %v6535_v25, 0  ;;  %v7416_v25 = vld [vmem:[%s8801_s16 + $0x38c] ss:$16 sps:$4 sm:$0xff]  }
 0x106   : > { %2661 = vmatprep.subr.bf16.mxu1 %v7266_v29  ;;  %v7338_v29 = vld [vmem:[%s8801_s16 + $0xc] ss:$16 sps:$4 sm:$0xff]  }
 0x108   : > { %2621 = vmatpush1.bf16.msra.mxu0 %v7261_v30  ;;  %v7333_v30 = vld [vmem:[%s8801_s16 + $0x5e0] ss:$16 sps:$4 sm:$0xff]  }
 0x109   : > { %2662 = vmatpush1.bf16.msra.mxu1 %v7264_v31  ;;  %2622 = vmatprep.subr.bf16.mxu0 %v7269_v32  ;;  %v8969_v31 = vpack.c.bf16 %v8916_v46, %v8916_v46  ;;  %v7336_v32 = vld [vmem:[%s8801_s16 + $0x8] ss:$16 sps:$4 sm:$0xff]   ;;  %v7359_v46 = vld [vmem:[%s8801_s16 + $0x8c] ss:$16 sps:$4 sm:$0xff]  }
 0x10a   : > { %2663 = vmatprep.subr.bf16.mxu1 %v7272_v33  ;;  %v7341_v33 = vld [vmem:[%s8801_s16 + $0x2c] ss:$16 sps:$4 sm:$0xff]  }
 0x10c   : > { %2623 = vmatpush1.bf16.msra.mxu0 %v7267_v34  ;;  %v7344_v34 = vld [vmem:[%s8801_s16 + $0x20c] ss:$16 sps:$4 sm:$0xff]  }
 0x10d   : > { %2664 = vmatpush1.bf16.msra.mxu1 %v7270_v35  ;;  %2624 = vmatprep.subr.bf16.mxu0 %v7275_v36  ;;  %v8977_v35 = vpack.c.bf16 %v8910_v41, %v8910_v41  ;;  %v7339_v36 = vld [vmem:[%s8801_s16 + $0x28] ss:$16 sps:$4 sm:$0xff]  }
 0x10e   : > { %2665 = vmatprep.subr.bf16.mxu1 %v7278_v37  ;;  %v7342_v37 = vld [vmem:[%s8801_s16 + $0x208] ss:$16 sps:$4 sm:$0xff]  }
 0x10f   : > { %v7348_v41 = vld [vmem:[%s8801_s16 + $0x228] ss:$16 sps:$4 sm:$0xff]  }
 0x110   : > { %2625 = vmatpush1.bf16.msra.mxu0 %v7273_v39  ;;  %v7350_v39 = vld [vmem:[%s8801_s16 + $0x22c] ss:$16 sps:$4 sm:$0xff]  }
 0x111   : > { %2666 = vmatpush1.bf16.msra.mxu1 %v7276_v42  ;;  %2626 = vmatprep.subr.bf16.mxu0 %v7281_v44  ;;  %v7353_v42 = vld [vmem:[%s8801_s16 + $0x6c] ss:$16 sps:$4 sm:$0xff]  }
 0x112   : > { %2667 = vmatprep.subr.bf16.mxu1 %v7284_v45  ;;  %v7356_v44 = vld [vmem:[%s8801_s16 + $0x24c] ss:$16 sps:$4 sm:$0xff]   ;;  %v7351_v45 = vld [vmem:[%s8801_s16 + $0x68] ss:$16 sps:$4 sm:$0xff]  }
 0x114   : > { %2627 = vmatpush1.bf16.msra.mxu0 %v7279_v48  ;;  %v7357_v48 = vld [vmem:[%s8801_s16 + $0x88] ss:$16 sps:$4 sm:$0xff]  }
 0x115   : > { %2668 = vmatpush1.bf16.msra.mxu1 %v7282_v52  ;;  %2628 = vmatprep.subr.bf16.mxu0 %v7287_v53  ;;  %v7368_v52 = vld [vmem:[%s8801_s16 + $0x28c] ss:$16 sps:$4 sm:$0xff]   ;;  %v7363_v53 = vld [vmem:[%s8801_s16 + $0xa8] ss:$16 sps:$4 sm:$0xff]  }
 0x116   : > { %2669 = vmatprep.subr.bf16.mxu1 %v7290_v54  ;;  %v7366_v54 = vld [vmem:[%s8801_s16 + $0x288] ss:$16 sps:$4 sm:$0xff]  }
 0x118   : > { %2629 = vmatpush1.bf16.msra.mxu0 %v7285_v56  ;;  %v7371_v56 = vld [vmem:[%s8801_s16 + $0xcc] ss:$16 sps:$4 sm:$0xff]  }
 0x119   : > { %2670 = vmatpush1.bf16.msra.mxu1 %v7288_v57  ;;  %2630 = vmatprep.subr.bf16.mxu0 %v7293_v58  ;;  %v7374_v57 = vld [vmem:[%s8801_s16 + $0x2ac] ss:$16 sps:$4 sm:$0xff]   ;;  %v7369_v58 = vld [vmem:[%s8801_s16 + $0xc8] ss:$16 sps:$4 sm:$0xff]  }
 0x11a   : > { %2671 = vmatprep.subr.bf16.mxu1 %v7296_v59  ;;  %v7372_v59 = vld [vmem:[%s8801_s16 + $0x2a8] ss:$16 sps:$4 sm:$0xff]  }
 0x11c   : > { %2631 = vmatpush1.bf16.msra.mxu0 %v7291_v60  ;;  %v7377_v60 = vld [vmem:[%s8801_s16 + $0xec] ss:$16 sps:$4 sm:$0xff]  }
 0x11d   : > { %2672 = vmatpush1.bf16.msra.mxu1 %v7294_v61  ;;  %2632 = vmatprep.subr.bf16.mxu0 %v7299_v63  ;;  %v7380_v61 = vld [vmem:[%s8801_s16 + $0x2cc] ss:$16 sps:$4 sm:$0xff]   ;;  %v7375_v63 = vld [vmem:[%s8801_s16 + $0xe8] ss:$16 sps:$4 sm:$0xff]  }
 0x11e   : > { %2673 = vmatprep.subr.bf16.mxu1 %v7302_v0  ;;  %v7378_v0 = vld [vmem:[%s8801_s16 + $0x2c8] ss:$16 sps:$4 sm:$0xff]  }
 0x120   : > { %2633 = vmatpush1.bf16.msra.mxu0 %v7297_v1  ;;  %v7383_v1 = vld [vmem:[%s8801_s16 + $0x10c] ss:$16 sps:$4 sm:$0xff]  }
 0x121   : > { %2674 = vmatpush1.bf16.msra.mxu1 %v7300_v2  ;;  %2634 = vmatprep.subr.bf16.mxu0 %v7305_v4  ;;  %v7386_v2 = vld [vmem:[%s8801_s16 + $0x2ec] ss:$16 sps:$4 sm:$0xff]   ;;  %v7381_v4 = vld [vmem:[%s8801_s16 + $0x108] ss:$16 sps:$4 sm:$0xff]  }
 0x122   : > { %2675 = vmatprep.subr.bf16.mxu1 %v7308_v5  ;;  %v7384_v5 = vld [vmem:[%s8801_s16 + $0x2e8] ss:$16 sps:$4 sm:$0xff]  }
 0x124   : > { %2635 = vmatpush1.bf16.msra.mxu0 %v7303_v6  ;;  %v7389_v6 = vld [vmem:[%s8801_s16 + $0x12c] ss:$16 sps:$4 sm:$0xff]  }
 0x125   : > { %2676 = vmatpush1.bf16.msra.mxu1 %v7306_v7  ;;  %2636 = vmatprep.subr.bf16.mxu0 %v7311_v8  ;;  %v7392_v7 = vld [vmem:[%s8801_s16 + $0x30c] ss:$16 sps:$4 sm:$0xff]   ;;  %v7387_v8 = vld [vmem:[%s8801_s16 + $0x128] ss:$16 sps:$4 sm:$0xff]  }
 0x126   : > { %2677 = vmatprep.subr.bf16.mxu1 %v7314_v9  ;;  %v7390_v9 = vld [vmem:[%s8801_s16 + $0x308] ss:$16 sps:$4 sm:$0xff]  }
 0x128   : > { %2637 = vmatpush1.bf16.msra.mxu0 %v7309_v10  ;;  %v7395_v10 = vld [vmem:[%s8801_s16 + $0x14c] ss:$16 sps:$4 sm:$0xff]  }
 0x129   : > { %2678 = vmatpush1.bf16.msra.mxu1 %v7312_v11  ;;  %2638 = vmatprep.subr.bf16.mxu0 %v7317_v12  ;;  %v7398_v11 = vld [vmem:[%s8801_s16 + $0x32c] ss:$16 sps:$4 sm:$0xff]   ;;  %v7393_v12 = vld [vmem:[%s8801_s16 + $0x148] ss:$16 sps:$4 sm:$0xff]  }
 0x12a   : > { %2679 = vmatprep.subr.bf16.mxu1 %v7320_v13  ;;  %v7396_v13 = vld [vmem:[%s8801_s16 + $0x328] ss:$16 sps:$4 sm:$0xff]  }
 0x12c   : > { %2639 = vmatpush1.bf16.msra.mxu0 %v7315_v14  ;;  %v7401_v14 = vld [vmem:[%s8801_s16 + $0x16c] ss:$16 sps:$4 sm:$0xff]  }
 0x12d   : > { %2680 = vmatpush1.bf16.msra.mxu1 %v7318_v15  ;;  %2640 = vmatprep.subr.bf16.mxu0 %v7323_v18  ;;  %v7404_v15 = vld [vmem:[%s8801_s16 + $0x34c] ss:$16 sps:$4 sm:$0xff]   ;;  %v7399_v18 = vld [vmem:[%s8801_s16 + $0x168] ss:$16 sps:$4 sm:$0xff]  }
 0x12e   : > { %2681 = vmatprep.subr.bf16.mxu1 %v7326_v19  ;;  %v7402_v19 = vld [vmem:[%s8801_s16 + $0x348] ss:$16 sps:$4 sm:$0xff]  }
 0x130   : > { %2641 = vmatpush1.bf16.msra.mxu0 %v7321_v21  ;;  %v7410_v21 = vld [vmem:[%s8801_s16 + $0x36c] ss:$16 sps:$4 sm:$0xff]  }
 0x131   : > { %2682 = vmatpush1.bf16.msra.mxu1 %v7324_v22  ;;  %2642 = vmatprep.subr.bf16.mxu0 %v7329_v23  ;;  %v7405_v22 = vld [vmem:[%s8801_s16 + $0x188] ss:$16 sps:$4 sm:$0xff]  }
 0x132   : > { %6539 = vmatprep.subr.msk.bf16.mxu1 %vm2519_vm1, %v6536_v24  ;;  %v7408_v23 = vld [vmem:[%s8801_s16 + $0x368] ss:$16 sps:$4 sm:$0xff]   ;;  %v7413_v24 = vld [vmem:[%s8801_s16 + $0x1ac] ss:$16 sps:$4 sm:$0xff]  }
 0x134   : > { %2643 = vmatpush1.bf16.msra.mxu0 %v7327_v26  ;;  %v7411_v26 = vld [vmem:[%s8801_s16 + $0x1a8] ss:$16 sps:$4 sm:$0xff]  }
 0x135   : > { %2684 = vmatpush1.bf16.msra.mxu1 %v2521_v28  ;;  %2644 = vmatprep.subr.bf16.mxu0 %v7335_v27  ;;  %v7414_v27 = vld [vmem:[%s8801_s16 + $0x388] ss:$16 sps:$4 sm:$0xff]   ;;  %v7419_v28 = vld [vmem:[%s8801_s16 + $0x1cc] ss:$16 sps:$4 sm:$0xff]  }
 0x136   : > { %2696 = vmatprep.subr.bf16.mxu1 %v7338_v29  ;;  %v7422_v29 = vld [vmem:[%s8801_s16 + $0x3ac] ss:$16 sps:$4 sm:$0xff]  }
 0x138   : > { %2688 = vmatmul.mubr.bf16.vlgmr.msra.gmra.mrb[4].mxu1 %v8969_v31  ;;  %2645 = vmatpush1.bf16.msra.mxu0 %v7333_v30  ;;  %v7417_v30 = vld [vmem:[%s8801_s16 + $0x1c8] ss:$16 sps:$4 sm:$0xff]  }
 0x139   : > { %2697 = vmatpush1.bf16.msra.mxu1 %v7336_v32  ;;  %2737 = vmatprep.subr.bf16.mxu0 %v7344_v34  ;;  %v7420_v32 = vld [vmem:[%s8801_s16 + $0x3a8] ss:$16 sps:$4 sm:$0xff]   ;;  %v7428_v34 = vld [vmem:[%s8801_s16 + $0x3cc] ss:$16 sps:$4 sm:$0xff]  }
 0x13a   : > { %2698 = vmatprep.subr.bf16.mxu1 %v7341_v33  ;;  %2728 = vmatprep.mubr.bf16.mxu1 %v8861_v62  ;;  %v7354_v62 = vld [vmem:[%s8801_s16 + $0x248] ss:$16 sps:$4 sm:$0xff]   ;;  %v7425_v33 = vld [vmem:[%s8801_s16 + $0x1ec] ss:$16 sps:$4 sm:$0xff]  }
 0x13b   : > { %2647 = vmatmul.mubr.bf16.vlgmr.msra.gmra.mrb[4].mxu0 %v8977_v35 }
 0x13c   : > { %2738 = vmatpush1.bf16.msra.mxu0 %v7342_v37  ;;  %2769 = vmatprep.mubr.bf16.mxu0 %v8866_v3  ;;  %v7365_v3 = vld [vmem:[%s8801_s16 + $0xac] ss:$16 sps:$4 sm:$0xff]   ;;  %v7426_v37 = vld [vmem:[%s8801_s16 + $0x3c8] ss:$16 sps:$4 sm:$0xff]  }
 0x13d   : > { %2699 = vmatpush1.bf16.msra.mxu1 %v7339_v36  ;;  %2739 = vmatprep.subr.bf16.mxu0 %v7350_v39  ;;  %v7423_v36 = vld [vmem:[%s8801_s16 + $0x1e8] ss:$16 sps:$4 sm:$0xff]   ;;  %v7434_v39 = vld [vmem:[%s8801_s16 + $0x40c] ss:$16 sps:$4 sm:$0xff]  }
 0x13e   : > { %2700 = vmatprep.subr.bf16.mxu1 %v7347_v38  ;;  %v7431_v38 = vld [vmem:[%s8801_s16 + $0x3ec] ss:$16 sps:$4 sm:$0xff]  }
 0x140   : > { %2740 = vmatpush1.bf16.msra.mxu0 %v7348_v41  ;;  %v7432_v41 = vld [vmem:[%s8801_s16 + $0x408] ss:$16 sps:$4 sm:$0xff]  }
 0x141   : > { %2701 = vmatpush1.bf16.msra.mxu1 %v7345_v40  ;;  %2741 = vmatprep.subr.bf16.mxu0 %v7356_v44  ;;  %v7429_v40 = vld [vmem:[%s8801_s16 + $0x3e8] ss:$16 sps:$4 sm:$0xff]   ;;  %v7440_v44 = vld [vmem:[%s8801_s16 + $0x60c] ss:$16 sps:$4 sm:$0xff]  }
 0x142   : > { %2702 = vmatprep.subr.bf16.mxu1 %v7353_v42  ;;  %v7437_v42 = vld [vmem:[%s8801_s16 + $0x42c] ss:$16 sps:$4 sm:$0xff]  }
 0x144   : > { %2742 = vmatpush1.bf16.msra.mxu0 %v7354_v62  ;;  %v7438_v62 = vld [vmem:[%s8801_s16 + $0x608] ss:$16 sps:$4 sm:$0xff]  }
 0x145   : > { %2703 = vmatpush1.bf16.msra.mxu1 %v7351_v45  ;;  %2743 = vmatprep.subr.bf16.mxu0 %v7362_v47  ;;  %v7435_v45 = vld [vmem:[%s8801_s16 + $0x428] ss:$16 sps:$4 sm:$0xff]   ;;  %v7446_v47 = vld [vmem:[%s8801_s16 + $0x62c] ss:$16 sps:$4 sm:$0xff]  }
 0x146   : > { %2704 = vmatprep.subr.bf16.mxu1 %v7359_v46  ;;  %v7443_v46 = vld [vmem:[%s8801_s16 + $0x44c] ss:$16 sps:$4 sm:$0xff]  }
 0x148   : > { %2744 = vmatpush1.bf16.msra.mxu0 %v7360_v50  ;;  %v7444_v50 = vld [vmem:[%s8801_s16 + $0x628] ss:$16 sps:$4 sm:$0xff]  }
 0x149   : > { %2705 = vmatpush1.bf16.msra.mxu1 %v7357_v48  ;;  %2745 = vmatprep.subr.bf16.mxu0 %v7368_v52  ;;  %v7441_v48 = vld [vmem:[%s8801_s16 + $0x448] ss:$16 sps:$4 sm:$0xff]  }
 0x14a   : > { %2706 = vmatprep.subr.bf16.mxu1 %v7365_v3  ;;  %v7452_v3 = vld [vmem:[%s8801_s16 + $0x64c] ss:$16 sps:$4 sm:$0xff]   ;;  %v7447_v52 = vld [vmem:[%s8801_s16 + $0x468] ss:$16 sps:$4 sm:$0xff]  }
 0x14c   : > { %2746 = vmatpush1.bf16.msra.mxu0 %v7366_v54  ;;  %v7453_v54 = vld [vmem:[%s8801_s16 + $0x488] ss:$16 sps:$4 sm:$0xff]  }
 0x14d   : > { %2707 = vmatpush1.bf16.msra.mxu1 %v7363_v53  ;;  %2747 = vmatprep.subr.bf16.mxu0 %v7374_v57  ;;  %v7458_v53 = vld [vmem:[%s8801_s16 + $0x66c] ss:$16 sps:$4 sm:$0xff]  }
 0x14e   : > { %2708 = vmatprep.subr.bf16.mxu1 %v7371_v56  ;;  %v7456_v56 = vld [vmem:[%s8801_s16 + $0x668] ss:$16 sps:$4 sm:$0xff]   ;;  %v7464_v57 = vld [vmem:[%s8801_s16 + $0x68c] ss:$16 sps:$4 sm:$0xff]  }
 0x150   : > { %2748 = vmatpush1.bf16.msra.mxu0 %v7372_v59  ;;  %v7462_v59 = vld [vmem:[%s8801_s16 + $0x688] ss:$16 sps:$4 sm:$0xff]  }
 0x151   : > { %2709 = vmatpush1.bf16.msra.mxu1 %v7369_v58  ;;  %2749 = vmatprep.subr.bf16.mxu0 %v7380_v61  ;;  %v7459_v58 = vld [vmem:[%s8801_s16 + $0x4a8] ss:$16 sps:$4 sm:$0xff]   ;;  %v7470_v61 = vld [vmem:[%s8801_s16 + $0x6ac] ss:$16 sps:$4 sm:$0xff]  }
 0x152   : > { %2710 = vmatprep.subr.bf16.mxu1 %v7377_v60  ;;  %v7467_v60 = vld [vmem:[%s8801_s16 + $0x4cc] ss:$16 sps:$4 sm:$0xff]  }
 0x154   : > { %2750 = vmatpush1.bf16.msra.mxu0 %v7378_v0  ;;  %v7468_v0 = vld [vmem:[%s8801_s16 + $0x6a8] ss:$16 sps:$4 sm:$0xff]  }
 0x155   : > { %2711 = vmatpush1.bf16.msra.mxu1 %v7375_v63  ;;  %2751 = vmatprep.subr.bf16.mxu0 %v7386_v2  ;;  %v7465_v63 = vld [vmem:[%s8801_s16 + $0x4c8] ss:$16 sps:$4 sm:$0xff]   ;;  %v7476_v2 = vld [vmem:[%s8801_s16 + $0x6cc] ss:$16 sps:$4 sm:$0xff]  }
 0x156   : > { %2712 = vmatprep.subr.bf16.mxu1 %v7383_v1  ;;  %v7473_v1 = vld [vmem:[%s8801_s16 + $0x4ec] ss:$16 sps:$4 sm:$0xff]  }
 0x158   : > { %2752 = vmatpush1.bf16.msra.mxu0 %v7384_v5  ;;  %v7474_v5 = vld [vmem:[%s8801_s16 + $0x6c8] ss:$16 sps:$4 sm:$0xff]  }
 0x159   : > { %2713 = vmatpush1.bf16.msra.mxu1 %v7381_v4  ;;  %2753 = vmatprep.subr.bf16.mxu0 %v7392_v7  ;;  %v7471_v4 = vld [vmem:[%s8801_s16 + $0x4e8] ss:$16 sps:$4 sm:$0xff]   ;;  %v7482_v7 = vld [vmem:[%s8801_s16 + $0x6ec] ss:$16 sps:$4 sm:$0xff]  }
 0x15a   : > { %2714 = vmatprep.subr.bf16.mxu1 %v7389_v6  ;;  %v7479_v6 = vld [vmem:[%s8801_s16 + $0x50c] ss:$16 sps:$4 sm:$0xff]  }
 0x15c   : > { %2754 = vmatpush1.bf16.msra.mxu0 %v7390_v9  ;;  %v7480_v9 = vld [vmem:[%s8801_s16 + $0x6e8] ss:$16 sps:$4 sm:$0xff]  }
 0x15d   : > { %2715 = vmatpush1.bf16.msra.mxu1 %v7387_v8  ;;  %2755 = vmatprep.subr.bf16.mxu0 %v7398_v11  ;;  %v7477_v8 = vld [vmem:[%s8801_s16 + $0x508] ss:$16 sps:$4 sm:$0xff]   ;;  %v7488_v11 = vld [vmem:[%s8801_s16 + $0x70c] ss:$16 sps:$4 sm:$0xff]  }
 0x15e   : > { %2716 = vmatprep.subr.bf16.mxu1 %v7395_v10  ;;  %v7485_v10 = vld [vmem:[%s8801_s16 + $0x52c] ss:$16 sps:$4 sm:$0xff]  }
 0x160   : > { %2756 = vmatpush1.bf16.msra.mxu0 %v7396_v13  ;;  %v7486_v13 = vld [vmem:[%s8801_s16 + $0x708] ss:$16 sps:$4 sm:$0xff]  }
 0x161   : > { %2717 = vmatpush1.bf16.msra.mxu1 %v7393_v12  ;;  %2757 = vmatprep.subr.bf16.mxu0 %v7404_v15  ;;  %v7483_v12 = vld [vmem:[%s8801_s16 + $0x528] ss:$16 sps:$4 sm:$0xff]   ;;  %v7494_v15 = vld [vmem:[%s8801_s16 + $0x72c] ss:$16 sps:$4 sm:$0xff]  }
 0x162   : > { %2718 = vmatprep.subr.bf16.mxu1 %v7401_v14  ;;  %v7491_v14 = vld [vmem:[%s8801_s16 + $0x54c] ss:$16 sps:$4 sm:$0xff]  }
 0x164   : > { %2758 = vmatpush1.bf16.msra.mxu0 %v7402_v19  ;;  %v7492_v19 = vld [vmem:[%s8801_s16 + $0x728] ss:$16 sps:$4 sm:$0xff]  }
 0x165   : > { %2719 = vmatpush1.bf16.msra.mxu1 %v7399_v18  ;;  %2759 = vmatprep.subr.bf16.mxu0 %v7410_v21  ;;  %v7489_v18 = vld [vmem:[%s8801_s16 + $0x548] ss:$16 sps:$4 sm:$0xff]   ;;  %v7500_v21 = vld [vmem:[%s8801_s16 + $0x74c] ss:$16 sps:$4 sm:$0xff]  }
 0x166   : > { %2720 = vmatprep.subr.bf16.mxu1 %v7407_v20  ;;  %v7497_v20 = vld [vmem:[%s8801_s16 + $0x56c] ss:$16 sps:$4 sm:$0xff]  }
 0x168   : > { %2760 = vmatpush1.bf16.msra.mxu0 %v7408_v23  ;;  %v7498_v23 = vld [vmem:[%s8801_s16 + $0x748] ss:$16 sps:$4 sm:$0xff]  }
 0x169   : > { %2721 = vmatpush1.bf16.msra.mxu1 %v7405_v22  ;;  %2761 = vmatprep.subr.bf16.mxu0 %v7416_v25  ;;  %v7495_v22 = vld [vmem:[%s8801_s16 + $0x568] ss:$16 sps:$4 sm:$0xff]   ;;  %v7506_v25 = vld [vmem:[%s8801_s16 + $0x76c] ss:$16 sps:$4 sm:$0xff]  }
 0x16a   : > { %2722 = vmatprep.subr.bf16.mxu1 %v7413_v24  ;;  %v7503_v24 = vld [vmem:[%s8801_s16 + $0x58c] ss:$16 sps:$4 sm:$0xff]  }
 0x16c   : > { %2762 = vmatpush1.bf16.msra.mxu0 %v7414_v27  ;;  %v7504_v27 = vld [vmem:[%s8801_s16 + $0x768] ss:$16 sps:$4 sm:$0xff]  }
 0x16d   : > { %2723 = vmatpush1.bf16.msra.mxu1 %v7411_v26  ;;  %2763 = vmatprep.subr.bf16.mxu0 %v7422_v29  ;;  %v7501_v26 = vld [vmem:[%s8801_s16 + $0x588] ss:$16 sps:$4 sm:$0xff]   ;;  %v7512_v29 = vld [vmem:[%s8801_s16 + $0x78c] ss:$16 sps:$4 sm:$0xff]  }
 0x16e   : > { %2724 = vmatprep.subr.bf16.mxu1 %v7419_v28  ;;  %v7509_v28 = vld [vmem:[%s8801_s16 + $0x5ac] ss:$16 sps:$4 sm:$0xff]  }
 0x170   : > { %2764 = vmatpush1.bf16.msra.mxu0 %v7420_v32  ;;  %v341_v32 = vld [vmem:[#allocation2] sm:$0xff] }
 0x171   : > { %2725 = vmatpush1.bf16.msra.mxu1 %v7417_v30  ;;  %2765 = vmatprep.subr.bf16.mxu0 %v7428_v34  ;;  %v7507_v30 = vld [vmem:[%s8801_s16 + $0x5a8] ss:$16 sps:$4 sm:$0xff]   ;;  %v7515_v34 = vld [vmem:[%s8801_s16 + $0x5cc] ss:$16 sps:$4 sm:$0xff]  }
 0x172   : > { %2726 = vmatprep.subr.bf16.mxu1 %v7425_v33  ;;  %v7510_v33 = vld [vmem:[%s8801_s16 + $0x788] ss:$16 sps:$4 sm:$0xff]  }
 0x174   : > { %2766 = vmatpush1.bf16.msra.mxu0 %v7426_v37  ;;  %v1264_v37 = vld [vmem:[%s8801_s16 + $0x7c8] sm:$0xff] }
 0x175   : > { %2727 = vmatpush1.bf16.msra.mxu1 %v7423_v36  ;;  %2767 = vmatprep.subr.bf16.mxu0 %v7431_v38  ;;  %v7518_v36 = vld [vmem:[%s8801_s16 + $0x7ac] ss:$16 sps:$4 sm:$0xff]   ;;  %v349_v38 = vcombine.high %v341_v32, %v341_v32 }
 0x176   : > { %2778 = vmatprep.subr.bf16.mxu1 %v7434_v39  ;;  %v7513_v39 = vld [vmem:[%s8801_s16 + $0x5c8] ss:$16 sps:$4 sm:$0xff]  }
 0x178   : > { %2729 = vmatmul.mubr.bf16.vlgmr.msra.gmra.mrb[8].mxu1 %v8882_v16  ;;  %2768 = vmatpush1.bf16.msra.mxu0 %v7429_v40  ;;  %v7449_v16 = vld [vmem:[%s8801_s16 + $0x46c] ss:$16 sps:$4 sm:$0xff]   ;;  %v7516_v40 = vld [vmem:[%s8801_s16 + $0x7a8] ss:$16 sps:$4 sm:$0xff]  }
 0x179   : > { %2779 = vmatpush1.bf16.msra.mxu1 %v7432_v41  ;;  %2819 = vmatprep.subr.bf16.mxu0 %v7440_v44  ;;  %v7521_v41 = vld [vmem:[%s8801_s16 + $0x5ec] ss:$16 sps:$4 sm:$0xff]   ;;  %v6537_v44 = vcombine.low %v1264_v37, %v1264_v37 }
 0x17a   : > { %2780 = vmatprep.subr.bf16.mxu1 %v7437_v42  ;;  %2810 = vmatprep.mubr.bf16.mxu1 %v8923_v51  ;;  %v7450_v51 = vld [vmem:[%s8801_s16 + $0x648] ss:$16 sps:$4 sm:$0xff]   ;;  %v6538_v42 = vcombine.high %v1264_v37, %v1264_v37  ;;  %v7583_v37 = vld [vmem:[%s8794_s3 + $0x324] ss:$16 sps:$4 sm:$0xff]  }
 0x17b   : > { %2770 = vmatmul.mubr.bf16.vlgmr.msra.gmra.mrb[8].mxu0 %v8884_v17  ;;  %v7455_v17 = vld [vmem:[%s8801_s16 + $0x48c] ss:$16 sps:$4 sm:$0xff]  }
 0x17c   : > { %2820 = vmatpush1.bf16.msra.mxu0 %v7438_v62  ;;  %6542 = vmatprep.mubr.msk.bf16.mxu0 %vm2515_vm0, %v8928_v55  ;;  %v7461_v55 = vld [vmem:[%s8801_s16 + $0x4ac] ss:$16 sps:$4 sm:$0xff]   ;;  %v9111_v62 = vrot.slane %v349_v38, %v8850_v49  ;;  %v7578_v38 = vld [vmem:[%s8794_s3 + $0x120] ss:$16 sps:$4 sm:$0xff]  }
 0x17d   : > { %2781 = vmatpush1.bf16.msra.mxu1 %v7435_v45  ;;  %2821 = vmatprep.subr.bf16.mxu0 %v7446_v47  ;;  %v9108_v45 = vrot.slane %v341_v32, %v8850_v49  ;;  %v2527_v47 = vsel %vm2519_vm1, %v6537_v44, 0  ;;  %v7577_v32 = vld [vmem:[%s8794_s3 + $0x304] ss:$16 sps:$4 sm:$0xff]   ;;  %v7587_v44 = vld [vmem:[%s8794_s3 + $0x340] ss:$16 sps:$4 sm:$0xff]  }
 0x17e   : > { %2782 = vmatprep.subr.bf16.mxu1 %v7443_v46  ;;  %v7519_v46 = vld [vmem:[%s8801_s16 + $0x5e8] ss:$16 sps:$4 sm:$0xff]  }
 0x180   : > { %2822 = vmatpush1.bf16.msra.mxu0 %v7444_v50  ;;  %v7529_v50 = vld [vmem:[%s8794_s3 + $0x204] ss:$16 sps:$4 sm:$0xff]  }
 0x181   : > { %2783 = vmatpush1.bf16.msra.mxu1 %v7441_v48  ;;  %2823 = vmatprep.subr.bf16.mxu0 %v7452_v3  ;;  %v7526_v48 = vld [vmem:[%s8794_s3 + $0x4] ss:$16 sps:$4 sm:$0xff]   ;;  %v365_v3 = vcombine.high %v9111_v62, %v9111_v62 }
 0x182   : > { %2784 = vmatprep.subr.bf16.mxu1 %v7449_v16  ;;  %v364_v16 = vcombine.high %v9108_v45, %v9108_v45 }
 0x184   : > { %2824 = vmatpush1.bf16.msra.mxu0 %v7450_v51  ;;  %v7527_v51 = vld [vmem:[%s8794_s3 + $0x200] ss:$16 sps:$4 sm:$0xff]  }
 0x185   : > { %2785 = vmatpush1.bf16.msra.mxu1 %v7447_v52  ;;  %2825 = vmatprep.subr.bf16.mxu0 %v7458_v53  ;;  %v7524_v52 = vld [vmem:[%s8794_s3] ss:$16 sps:$4 sm:$0xff]   ;;  %v7535_v53 = vld [vmem:[%s8794_s3 + $0x224] ss:$16 sps:$4 sm:$0xff]  }
 0x186   : > { %2786 = vmatprep.subr.bf16.mxu1 %v7455_v17  ;;  %v7532_v17 = vld [vmem:[%s8794_s3 + $0x24] ss:$16 sps:$4 sm:$0xff]  }
 0x188   : > { %2826 = vmatpush1.bf16.msra.mxu0 %v7456_v56  ;;  %v9128_v56 = vpack.c.bf16 %v365_v3, %v365_v3  ;;  %v7601_v3 = vld [vmem:[%s8794_s3 + $0x384] ss:$16 sps:$4 sm:$0xff]  }
 0x189   : > { %2787 = vmatpush1.bf16.msra.mxu1 %v7453_v54  ;;  %2827 = vmatprep.subr.bf16.mxu0 %v7464_v57  ;;  %v9126_v54 = vpack.c.bf16 %v364_v16, %v364_v16  ;;  %v7533_v57 = vld [vmem:[%s8794_s3 + $0x220] ss:$16 sps:$4 sm:$0xff]   ;;  %v7598_v16 = vld [vmem:[%s8794_s3 + $0x184] ss:$16 sps:$4 sm:$0xff]  }
 0x18a   : > { %2788 = vmatprep.subr.bf16.mxu1 %v7461_v55  ;;  %v7530_v55 = vld [vmem:[%s8794_s3 + $0x20] ss:$16 sps:$4 sm:$0xff]  }
 0x18c   : > { %2828 = vmatpush1.bf16.msra.mxu0 %v7462_v59  ;;  %v7541_v59 = vld [vmem:[%s8794_s3 + $0x244] ss:$16 sps:$4 sm:$0xff]  }
 0x18d   : > { %2789 = vmatpush1.bf16.msra.mxu1 %v7459_v58  ;;  %2829 = vmatprep.subr.bf16.mxu0 %v7470_v61  ;;  %v7538_v58 = vld [vmem:[%s8794_s3 + $0x44] ss:$16 sps:$4 sm:$0xff]  }
 0x18e   : > { %2790 = vmatprep.subr.bf16.mxu1 %v7467_v60  ;;  %v7544_v60 = vld [vmem:[%s8794_s3 + $0x64] ss:$16 sps:$4 sm:$0xff]  }
 0x18f   : > { %v7547_v61 = vld [vmem:[%s8794_s3 + $0x264] ss:$16 sps:$4 sm:$0xff]  }
 0x190   : > { %2830 = vmatpush1.bf16.msra.mxu0 %v7468_v0  ;;  %v7545_v0 = vld [vmem:[%s8794_s3 + $0x260] ss:$16 sps:$4 sm:$0xff]  }
 0x191   : > { %2791 = vmatpush1.bf16.msra.mxu1 %v7465_v63  ;;  %2831 = vmatprep.subr.bf16.mxu0 %v7476_v2  ;;  %v7542_v63 = vld [vmem:[%s8794_s3 + $0x60] ss:$16 sps:$4 sm:$0xff]   ;;  %v7553_v2 = vld [vmem:[%s8794_s3 + $0x284] ss:$16 sps:$4 sm:$0xff]  }
 0x192   : > { %2792 = vmatprep.subr.bf16.mxu1 %v7473_v1  ;;  %v7550_v1 = vld [vmem:[%s8794_s3 + $0x84] ss:$16 sps:$4 sm:$0xff]  }
 0x194   : > { %2832 = vmatpush1.bf16.msra.mxu0 %v7474_v5  ;;  %v7551_v5 = vld [vmem:[%s8794_s3 + $0x280] ss:$16 sps:$4 sm:$0xff]  }
 0x195   : > { %2793 = vmatpush1.bf16.msra.mxu1 %v7471_v4  ;;  %2833 = vmatprep.subr.bf16.mxu0 %v7482_v7  ;;  %v7548_v4 = vld [vmem:[%s8794_s3 + $0x80] ss:$16 sps:$4 sm:$0xff]   ;;  %v7559_v7 = vld [vmem:[%s8794_s3 + $0x2a4] ss:$16 sps:$4 sm:$0xff]  }
 0x196   : > { %2794 = vmatprep.subr.bf16.mxu1 %v7479_v6  ;;  %v7556_v6 = vld [vmem:[%s8794_s3 + $0xa4] ss:$16 sps:$4 sm:$0xff]  }
 0x198   : > { %2834 = vmatpush1.bf16.msra.mxu0 %v7480_v9  ;;  %v7557_v9 = vld [vmem:[%s8794_s3 + $0x2a0] ss:$16 sps:$4 sm:$0xff]  }
 0x199   : > { %2795 = vmatpush1.bf16.msra.mxu1 %v7477_v8  ;;  %2835 = vmatprep.subr.bf16.mxu0 %v7488_v11  ;;  %v7554_v8 = vld [vmem:[%s8794_s3 + $0xa0] ss:$16 sps:$4 sm:$0xff]   ;;  %v7565_v11 = vld [vmem:[%s8794_s3 + $0x2c4] ss:$16 sps:$4 sm:$0xff]  }
 0x19a   : > { %2796 = vmatprep.subr.bf16.mxu1 %v7485_v10  ;;  %v7562_v10 = vld [vmem:[%s8794_s3 + $0xc4] ss:$16 sps:$4 sm:$0xff]  }
 0x19c   : > { %2836 = vmatpush1.bf16.msra.mxu0 %v7486_v13  ;;  %v7563_v13 = vld [vmem:[%s8794_s3 + $0x2c0] ss:$16 sps:$4 sm:$0xff]  }
 0x19d   : > { %2797 = vmatpush1.bf16.msra.mxu1 %v7483_v12  ;;  %2837 = vmatprep.subr.bf16.mxu0 %v7494_v15  ;;  %v7560_v12 = vld [vmem:[%s8794_s3 + $0xc0] ss:$16 sps:$4 sm:$0xff]   ;;  %v7571_v15 = vld [vmem:[%s8794_s3 + $0x2e4] ss:$16 sps:$4 sm:$0xff]  }
 0x19e   : > { %2798 = vmatprep.subr.bf16.mxu1 %v7491_v14  ;;  %v7568_v14 = vld [vmem:[%s8794_s3 + $0xe4] ss:$16 sps:$4 sm:$0xff]  }
 0x1a0   : > { %2838 = vmatpush1.bf16.msra.mxu0 %v7492_v19 }
 0x1a1   : > { %2799 = vmatpush1.bf16.msra.mxu1 %v7489_v18  ;;  %2839 = vmatprep.subr.bf16.mxu0 %v7500_v21  ;;  %v7569_v21 = vld [vmem:[%s8794_s3 + $0x2e0] ss:$16 sps:$4 sm:$0xff]  }
 0x1a2   : > { %2800 = vmatprep.subr.bf16.mxu1 %v7497_v20  ;;  %v7566_v20 = vld [vmem:[%s8794_s3 + $0xe0] ss:$16 sps:$4 sm:$0xff]  }
 0x1a4   : > { %2840 = vmatpush1.bf16.msra.mxu0 %v7498_v23 }
 0x1a5   : > { %2801 = vmatpush1.bf16.msra.mxu1 %v7495_v22  ;;  %2841 = vmatprep.subr.bf16.mxu0 %v7506_v25 }
 0x1a6   : > { %2802 = vmatprep.subr.bf16.mxu1 %v7503_v24 }
 0x1a8   : > { %2842 = vmatpush1.bf16.msra.mxu0 %v7504_v27 }
 0x1a9   : > { %2803 = vmatpush1.bf16.msra.mxu1 %v7501_v26  ;;  %2843 = vmatprep.subr.bf16.mxu0 %v7512_v29 }
 0x1aa   : > { %2804 = vmatprep.subr.bf16.mxu1 %v7509_v28 }
 0x1ac   : > { %2844 = vmatpush1.bf16.msra.mxu0 %v7510_v33  ;;  %v7572_v33 = vld [vmem:[%s8794_s3 + $0x100] ss:$16 sps:$4 sm:$0xff]  }
 0x1ad   : > { %2805 = vmatpush1.bf16.msra.mxu1 %v7507_v30  ;;  %2845 = vmatprep.subr.bf16.mxu0 %v7518_v36  ;;  %v7574_v30 = vld [vmem:[%s8794_s3 + $0x104] ss:$16 sps:$4 sm:$0xff]  }
 0x1ae   : > { %2806 = vmatprep.subr.bf16.mxu1 %v7515_v34  ;;  %v7575_v34 = vld [vmem:[%s8794_s3 + $0x300] ss:$16 sps:$4 sm:$0xff]   ;;  %v7580_v36 = vld [vmem:[%s8794_s3 + $0x124] ss:$16 sps:$4 sm:$0xff]  }
 0x1b0   : > { %2846 = vmatpush1.bf16.msra.mxu0 %v7516_v40  ;;  %v7586_v40 = vld [vmem:[%s8794_s3 + $0x144] ss:$16 sps:$4 sm:$0xff]  }
 0x1b1   : > { %2807 = vmatpush1.bf16.msra.mxu1 %v7513_v39  ;;  %6541 = vmatprep.subr.msk.bf16.mxu0 %vm2519_vm1, %v6538_v42  ;;  %v7581_v39 = vld [vmem:[%s8794_s3 + $0x320] ss:$16 sps:$4 sm:$0xff]  }
 0x1b2   : > { %2808 = vmatprep.subr.bf16.mxu1 %v7521_v41  ;;  %v7589_v41 = vld [vmem:[%s8794_s3 + $0x344] ss:$16 sps:$4 sm:$0xff]   ;;  %v7584_v42 = vld [vmem:[%s8794_s3 + $0x140] ss:$16 sps:$4 sm:$0xff]  }
 0x1b4   : > { %2848 = vmatpush1.bf16.msra.mxu0 %v2527_v47  ;;  %v7595_v47 = vld [vmem:[%s8794_s3 + $0x364] ss:$16 sps:$4 sm:$0xff]  }
 0x1b5   : > { %2809 = vmatpush1.bf16.msra.mxu1 %v7519_v46  ;;  %5420 = vmatprep.subr.bf16.mxu0 %v7526_v48  ;;  %v7592_v46 = vld [vmem:[%s8794_s3 + $0x164] ss:$16 sps:$4 sm:$0xff]   ;;  %v7590_v48 = vld [vmem:[%s8794_s3 + $0x160] ss:$16 sps:$4 sm:$0xff]  }
 0x1b6   : > { %5461 = vmatprep.subr.bf16.mxu1 %v7529_v50  ;;  %v7593_v50 = vld [vmem:[%s8794_s3 + $0x360] ss:$16 sps:$4 sm:$0xff]  }
 0x1b7   : > { %2852 = vmatmul.mubr.bf16.vlgmr.msra.gmra.mrb[12].mxu0 %v8969_v31  ;;  %v7536_v31 = vld [vmem:[%s8794_s3 + $0x40] ss:$16 sps:$4 sm:$0xff]  }
 0x1b8   : > { %2811 = vmatmul.mubr.bf16.vlgmr.msra.gmra.mrb[12].mxu1 %v8977_v35  ;;  %5421 = vmatpush1.bf16.msra.mxu0 %v7524_v52  ;;  %v7539_v35 = vld [vmem:[%s8794_s3 + $0x240] ss:$16 sps:$4 sm:$0xff]  }
 0x1b9   : > { %5462 = vmatpush1.bf16.msra.mxu1 %v7527_v51  ;;  %5422 = vmatprep.subr.bf16.mxu0 %v7532_v17  ;;  %v7596_v52 = vld [vmem:[%s8794_s3 + $0x180] ss:$16 sps:$4 sm:$0xff]   ;;  %v7604_v17 = vld [vmem:[%s8794_s3 + $0x1a4] ss:$16 sps:$4 sm:$0xff]  }
 0x1ba   : > { %5463 = vmatprep.subr.bf16.mxu1 %v7535_v53  ;;  %5452 = vmatprep.mubr.bf16.mxu0 %v9126_v54  ;;  %v7599_v51 = vld [vmem:[%s8794_s3 + $0x380] ss:$16 sps:$4 sm:$0xff]   ;;  %v7607_v53 = vld [vmem:[%s8794_s3 + $0x3a4] ss:$16 sps:$4 sm:$0xff]  }
 0x1bb   : > { %5493 = vmatprep.mubr.bf16.mxu1 %v9128_v56 }
 0x1bc   : > { %5423 = vmatpush1.bf16.msra.mxu0 %v7530_v55  ;;  %v342_v55 = vld [vmem:[#allocation2 + $0x8] sm:$0xff] }
 0x1bd   : > { %5464 = vmatpush1.bf16.msra.mxu1 %v7533_v57  ;;  %5424 = vmatprep.subr.bf16.mxu0 %v7538_v58  ;;  %v7602_v57 = vld [vmem:[%s8794_s3 + $0x1a0] ss:$16 sps:$4 sm:$0xff]  }
 0x1be   : > { %5465 = vmatprep.subr.bf16.mxu1 %v7541_v59  ;;  %v7605_v58 = vld [vmem:[%s8794_s3 + $0x3a0] ss:$16 sps:$4 sm:$0xff]   ;;  %v7610_v59 = vld [vmem:[%s8794_s3 + $0x1c4] ss:$16 sps:$4 sm:$0xff]  }
 0x1c0   : > { %5425 = vmatpush1.bf16.msra.mxu0 %v7536_v31  ;;  %v7613_v31 = vld [vmem:[%s8794_s3 + $0x3c4] ss:$16 sps:$4 sm:$0xff]  }
 0x1c1   : > { %5466 = vmatpush1.bf16.msra.mxu1 %v7539_v35  ;;  %5426 = vmatprep.subr.bf16.mxu0 %v7544_v60  ;;  %v366_v35 = vcombine.high %v342_v55, %v342_v55  ;;  %v7608_v60 = vld [vmem:[%s8794_s3 + $0x1c0] ss:$16 sps:$4 sm:$0xff]  }
 0x1c2   : > { %5467 = vmatprep.subr.bf16.mxu1 %v7547_v61  ;;  %v7611_v61 = vld [vmem:[%s8794_s3 + $0x3c0] ss:$16 sps:$4 sm:$0xff]  }
 0x1c4   : > { %5427 = vmatpush1.bf16.msra.mxu0 %v7542_v63  ;;  %v7616_v63 = vld [vmem:[%s8794_s3 + $0x1e4] ss:$16 sps:$4 sm:$0xff]  }
 0x1c5   : > { %5468 = vmatpush1.bf16.msra.mxu1 %v7545_v0  ;;  %5428 = vmatprep.subr.bf16.mxu0 %v7550_v1  ;;  %v7619_v0 = vld [vmem:[%s8794_s3 + $0x3e4] ss:$16 sps:$4 sm:$0xff]   ;;  %v9195_v1 = vrot.slane %v342_v55, %v8850_v49 }
 0x1c6   : > { %5469 = vmatprep.subr.bf16.mxu1 %v7553_v2  ;;  %v9198_v2 = vrot.slane %v366_v35, %v8850_v49  ;;  %v7674_v35 = vld [vmem:[%s8794_s3 + $0x704] ss:$16 sps:$4 sm:$0xff]  }
 0x1c8   : > { %5429 = vmatpush1.bf16.msra.mxu0 %v7548_v4  ;;  %v7614_v4 = vld [vmem:[%s8794_s3 + $0x1e0] ss:$16 sps:$4 sm:$0xff]  }
 0x1c9   : > { %5470 = vmatpush1.bf16.msra.mxu1 %v7551_v5  ;;  %5430 = vmatprep.subr.bf16.mxu0 %v7556_v6  ;;  %v7617_v5 = vld [vmem:[%s8794_s3 + $0x3e0] ss:$16 sps:$4 sm:$0xff]   ;;  %v7623_v6 = vld [vmem:[%s8794_s3 + $0x404] ss:$16 sps:$4 sm:$0xff]  }
 0x1ca   : > { %5471 = vmatprep.subr.bf16.mxu1 %v7559_v7  ;;  %v7626_v7 = vld [vmem:[%s8794_s3 + $0x604] ss:$16 sps:$4 sm:$0xff]  }
 0x1cc   : > { %5431 = vmatpush1.bf16.msra.mxu0 %v7554_v8  ;;  %v7621_v8 = vld [vmem:[%s8794_s3 + $0x400] ss:$16 sps:$4 sm:$0xff]  }
 0x1cd   : > { %5472 = vmatpush1.bf16.msra.mxu1 %v7557_v9  ;;  %5432 = vmatprep.subr.bf16.mxu0 %v7562_v10  ;;  %v7624_v9 = vld [vmem:[%s8794_s3 + $0x600] ss:$16 sps:$4 sm:$0xff]   ;;  %v381_v10 = vcombine.high %v9195_v1, %v9195_v1 }
 0x1ce   : > { %5473 = vmatprep.subr.bf16.mxu1 %v7565_v11  ;;  %v2566_v18 = vpop.f32.mrb[0].mxu0  ;;  %v382_v11 = vcombine.high %v9198_v2, %v9198_v2 }
 0x1cf   : > { %v2607_v19 = vpop.f32.mrb[0].mxu1  ;;  %v2568_v23 = vpop.f32.mrb[1].mxu0 }
 0x1d0   : > { %v9160_v22 = vadd.f32 %v2607_v19, %v2566_v18  ;;  %v2609_v24 = vpop.f32.mrb[1].mxu1  ;;  %v2570_v26 = vpop.f32.mrb[2].mxu0  ;;  %5433 = vmatpush1.bf16.msra.mxu0 %v7560_v12  ;;  %v9212_v12 = vpack.c.bf16 %v9108_v45, %v9108_v45  ;;  %v9220_v18 = vpack.c.bf16 %v381_v10, %v381_v10  ;;  %v9222_v19 = vpack.c.bf16 %v382_v11, %v382_v11  ;;  %v7627_v45 = vld [vmem:[%s8794_s3 + $0x420] ss:$16 sps:$4 sm:$0xff]   ;;  %v7689_v10 = vld [vmem:[%s8794_s3 + $0x564] ss:$16 sps:$4 sm:$0xff]  }
 0x1d1   : > { %v9162_v25 = vadd.f32 %v2609_v24, %v2568_v23  ;;  %v2611_v27 = vpop.f32.mrb[2].mxu1  ;;  %5474 = vmatpush1.bf16.msra.mxu1 %v7563_v13  ;;  %v2571_v28 = vpop.f32.mrb[3].mxu0  ;;  %5434 = vmatprep.subr.bf16.mxu0 %v7568_v14  ;;  %v9216_v13 = vpack.c.bf16 %v9111_v62, %v9111_v62  ;;  %v7629_v14 = vld [vmem:[%s8794_s3 + $0x424] ss:$16 sps:$4 sm:$0xff]   ;;  %v7630_v62 = vld [vmem:[%s8794_s3 + $0x620] ss:$16 sps:$4 sm:$0xff]  }
 0x1d2   : > { %v2612_v29 = vpop.f32.mrb[3].mxu1  ;;  %5475 = vmatprep.subr.bf16.mxu1 %v7571_v15  ;;  %v7632_v15 = vld [vmem:[%s8794_s3 + $0x624] ss:$16 sps:$4 sm:$0xff]   ;;  %v7633_v23 = vld [vmem:[%s8794_s3 + $0x440] ss:$16 sps:$4 sm:$0xff]  }
 0x1d3   : > { %v7636_v24 = vld [vmem:[%s8794_s3 + $0x640] ss:$16 sps:$4 sm:$0xff]   ;;  %v7641_v26 = vld [vmem:[%s8794_s3 + $0x464] ss:$16 sps:$4 sm:$0xff]  }
 0x1d4   : > { %5435 = vmatpush1.bf16.msra.mxu0 %v7566_v20  ;;  %v7635_v20 = vld [vmem:[%s8794_s3 + $0x444] ss:$16 sps:$4 sm:$0xff]   ;;  %v7639_v28 = vld [vmem:[%s8794_s3 + $0x460] ss:$16 sps:$4 sm:$0xff]  }
 0x1d5   : > { %5476 = vmatpush1.bf16.msra.mxu1 %v7569_v21  ;;  %5436 = vmatprep.subr.bf16.mxu0 %v7574_v30  ;;  %v7638_v21 = vld [vmem:[%s8794_s3 + $0x644] ss:$16 sps:$4 sm:$0xff]   ;;  %v7642_v29 = vld [vmem:[%s8794_s3 + $0x660] ss:$16 sps:$4 sm:$0xff]  }
 0x1d6   : > { %5477 = vmatprep.subr.bf16.mxu1 %v7577_v32  ;;  %v7644_v27 = vld [vmem:[%s8794_s3 + $0x664] ss:$16 sps:$4 sm:$0xff]  }
 0x1d7   : > { %v7647_v30 = vld [vmem:[%s8794_s3 + $0x484] ss:$16 sps:$4 sm:$0xff]  }
 0x1d8   : > { %5437 = vmatpush1.bf16.msra.mxu0 %v7572_v33  ;;  %v7650_v32 = vld [vmem:[%s8794_s3 + $0x684] ss:$16 sps:$4 sm:$0xff]   ;;  %v7645_v33 = vld [vmem:[%s8794_s3 + $0x480] ss:$16 sps:$4 sm:$0xff]  }
 0x1d9   : > { %5478 = vmatpush1.bf16.msra.mxu1 %v7575_v34  ;;  %5438 = vmatprep.subr.bf16.mxu0 %v7580_v36  ;;  %v7648_v34 = vld [vmem:[%s8794_s3 + $0x680] ss:$16 sps:$4 sm:$0xff]   ;;  %v7653_v36 = vld [vmem:[%s8794_s3 + $0x4a4] ss:$16 sps:$4 sm:$0xff]  }
 0x1da   : > { %5479 = vmatprep.subr.bf16.mxu1 %v7583_v37  ;;  %v7656_v37 = vld [vmem:[%s8794_s3 + $0x6a4] ss:$16 sps:$4 sm:$0xff]  }
 0x1db   : > { %v7692_v11 = vld [vmem:[%s8794_s3 + $0x764] ss:$16 sps:$4 sm:$0xff]  }
 0x1dc   : > { %5439 = vmatpush1.bf16.msra.mxu0 %v7578_v38  ;;  %v7651_v38 = vld [vmem:[%s8794_s3 + $0x4a0] ss:$16 sps:$4 sm:$0xff]  }
 0x1dd   : > { %5480 = vmatpush1.bf16.msra.mxu1 %v7581_v39  ;;  %5440 = vmatprep.subr.bf16.mxu0 %v7586_v40  ;;  %v7654_v39 = vld [vmem:[%s8794_s3 + $0x6a0] ss:$16 sps:$4 sm:$0xff]   ;;  %v7659_v40 = vld [vmem:[%s8794_s3 + $0x4c4] ss:$16 sps:$4 sm:$0xff]  }
 0x1de   : > { %5481 = vmatprep.subr.bf16.mxu1 %v7589_v41  ;;  %v7662_v41 = vld [vmem:[%s8794_s3 + $0x6c4] ss:$16 sps:$4 sm:$0xff]  }
 0x1e0   : > { %5441 = vmatpush1.bf16.msra.mxu0 %v7584_v42 }
 0x1e1   : > { %5482 = vmatpush1.bf16.msra.mxu1 %v7587_v44  ;;  %5442 = vmatprep.subr.bf16.mxu0 %v7592_v46  ;;  %v7657_v44 = vld [vmem:[%s8794_s3 + $0x4c0] ss:$16 sps:$4 sm:$0xff]  }
 0x1e2   : > { %5483 = vmatprep.subr.bf16.mxu1 %v7595_v47  ;;  %v7660_v46 = vld [vmem:[%s8794_s3 + $0x6c0] ss:$16 sps:$4 sm:$0xff]  }
 0x1e4   : > { %5443 = vmatpush1.bf16.msra.mxu0 %v7590_v48 }
 0x1e5   : > { %5484 = vmatpush1.bf16.msra.mxu1 %v7593_v50  ;;  %5444 = vmatprep.subr.bf16.mxu0 %v7598_v16  ;;  %v7665_v16 = vld [vmem:[%s8794_s3 + $0x4e4] ss:$16 sps:$4 sm:$0xff]  }
 0x1e6   : > { %5485 = vmatprep.subr.bf16.mxu1 %v7601_v3  ;;  %v7668_v3 = vld [vmem:[%s8794_s3 + $0x6e4] ss:$16 sps:$4 sm:$0xff]  }
 0x1e8   : > { %5445 = vmatpush1.bf16.msra.mxu0 %v7596_v52 }
 0x1e9   : > { %5486 = vmatpush1.bf16.msra.mxu1 %v7599_v51  ;;  %5446 = vmatprep.subr.bf16.mxu0 %v7604_v17 }
 0x1ea   : > { %5487 = vmatprep.subr.bf16.mxu1 %v7607_v53 }
 0x1ec   : > { %5447 = vmatpush1.bf16.msra.mxu0 %v7602_v57  ;;  %v7663_v57 = vld [vmem:[%s8794_s3 + $0x4e0] ss:$16 sps:$4 sm:$0xff]  }
 0x1ed   : > { %5488 = vmatpush1.bf16.msra.mxu1 %v7605_v58  ;;  %5448 = vmatprep.subr.bf16.mxu0 %v7610_v59  ;;  %v7666_v58 = vld [vmem:[%s8794_s3 + $0x6e0] ss:$16 sps:$4 sm:$0xff]  }
 0x1ee   : > { %5489 = vmatprep.subr.bf16.mxu1 %v7613_v31  ;;  %v7671_v31 = vld [vmem:[%s8794_s3 + $0x504] ss:$16 sps:$4 sm:$0xff]  }
 0x1f0   : > { %5449 = vmatpush1.bf16.msra.mxu0 %v7608_v60 }
 0x1f1   : > { %5490 = vmatpush1.bf16.msra.mxu1 %v7611_v61  ;;  %5450 = vmatprep.subr.bf16.mxu0 %v7616_v63  ;;  %v7672_v61 = vld [vmem:[%s8794_s3 + $0x700] ss:$16 sps:$4 sm:$0xff]   ;;  %v7677_v63 = vld [vmem:[%s8794_s3 + $0x524] ss:$16 sps:$4 sm:$0xff]  }
 0x1f2   : > { %5491 = vmatprep.subr.bf16.mxu1 %v7619_v0  ;;  %v7680_v0 = vld [vmem:[%s8794_s3 + $0x724] ss:$16 sps:$4 sm:$0xff]  }
 0x1f4   : > { %5451 = vmatpush1.bf16.msra.mxu0 %v7614_v4  ;;  %v7675_v4 = vld [vmem:[%s8794_s3 + $0x520] ss:$16 sps:$4 sm:$0xff]  }
 0x1f5   : > { %5492 = vmatpush1.bf16.msra.mxu1 %v7617_v5  ;;  %5502 = vmatprep.subr.bf16.mxu0 %v7623_v6  ;;  %v7678_v5 = vld [vmem:[%s8794_s3 + $0x720] ss:$16 sps:$4 sm:$0xff]   ;;  %v7683_v6 = vld [vmem:[%s8794_s3 + $0x544] ss:$16 sps:$4 sm:$0xff]  }
 0x1f6   : > { %5543 = vmatprep.subr.bf16.mxu1 %v7626_v7  ;;  %v7686_v7 = vld [vmem:[%s8794_s3 + $0x744] ss:$16 sps:$4 sm:$0xff]  }
 0x1f7   : > { %5453 = vmatmul.mubr.bf16.vlgmr.msra.gmra.mrb[16].mxu0 %v9212_v12 }
 0x1f8   : > { %5494 = vmatmul.mubr.bf16.vlgmr.msra.gmra.mrb[16].mxu1 %v9216_v13  ;;  %5503 = vmatpush1.bf16.msra.mxu0 %v7621_v8  ;;  %v7681_v8 = vld [vmem:[%s8794_s3 + $0x540] ss:$16 sps:$4 sm:$0xff]  }
 0x1f9   : > { %5544 = vmatpush1.bf16.msra.mxu1 %v7624_v9  ;;  %5504 = vmatprep.subr.bf16.mxu0 %v7629_v14  ;;  %v7684_v9 = vld [vmem:[%s8794_s3 + $0x740] ss:$16 sps:$4 sm:$0xff]  }
 0x1fa   : > { %5545 = vmatprep.subr.bf16.mxu1 %v7632_v15  ;;  %5534 = vmatprep.mubr.bf16.mxu0 %v9220_v18  ;;  %v7687_v14 = vld [vmem:[%s8794_s3 + $0x560] ss:$16 sps:$4 sm:$0xff]  }
 0x1fb   : > { %5575 = vmatprep.mubr.bf16.mxu1 %v9222_v19  ;;  %v7690_v15 = vld [vmem:[%s8794_s3 + $0x760] ss:$16 sps:$4 sm:$0xff]  }
 0x1fc   : > { %5505 = vmatpush1.bf16.msra.mxu0 %v7627_v45  ;;  %v7695_v45 = vld [vmem:[%s8794_s3 + $0x584] ss:$16 sps:$4 sm:$0xff]  }
 0x1fd   : > { %5546 = vmatpush1.bf16.msra.mxu1 %v7630_v62  ;;  %5506 = vmatprep.subr.bf16.mxu0 %v7635_v20  ;;  %v7698_v62 = vld [vmem:[%s8794_s3 + $0x784] ss:$16 sps:$4 sm:$0xff]   ;;  %v7693_v20 = vld [vmem:[%s8794_s3 + $0x580] ss:$16 sps:$4 sm:$0xff]  }
 0x1fe   : > { %5547 = vmatprep.subr.bf16.mxu1 %v7638_v21  ;;  %v7696_v21 = vld [vmem:[%s8794_s3 + $0x780] ss:$16 sps:$4 sm:$0xff]  }
 0x200   : > { %5507 = vmatpush1.bf16.msra.mxu0 %v7633_v23  ;;  %v7701_v23 = vld [vmem:[%s8794_s3 + $0x5a4] ss:$16 sps:$4 sm:$0xff]  }
 0x201   : > { %5548 = vmatpush1.bf16.msra.mxu1 %v7636_v24  ;;  %5508 = vmatprep.subr.bf16.mxu0 %v7641_v26  ;;  %v7704_v24 = vld [vmem:[%s8794_s3 + $0x7a4] ss:$16 sps:$4 sm:$0xff]  }
 0x202   : > { %5549 = vmatprep.subr.bf16.mxu1 %v7644_v27  ;;  %v343_v26 = vld [vmem:[#allocation2 + $0x10] sm:$0xff] }
 0x203   : > { %v7699_v27 = vld [vmem:[%s8794_s3 + $0x5a0] ss:$16 sps:$4 sm:$0xff]  }
 0x204   : > { %5509 = vmatpush1.bf16.msra.mxu0 %v7639_v28  ;;  %v7702_v28 = vld [vmem:[%s8794_s3 + $0x7a0] ss:$16 sps:$4 sm:$0xff]  }
 0x205   : > { %5550 = vmatpush1.bf16.msra.mxu1 %v7642_v29  ;;  %5510 = vmatprep.subr.bf16.mxu0 %v7647_v30  ;;  %v7707_v29 = vld [vmem:[%s8794_s3 + $0x5c4] ss:$16 sps:$4 sm:$0xff]  }
 0x206   : > { %5551 = vmatprep.subr.bf16.mxu1 %v7650_v32  ;;  %v7710_v30 = vld [vmem:[%s8794_s3 + $0x7c4] ss:$16 sps:$4 sm:$0xff]   ;;  %v383_v32 = vcombine.high %v343_v26, %v343_v26 }
 0x208   : > { %5511 = vmatpush1.bf16.msra.mxu0 %v7645_v33  ;;  %v7705_v33 = vld [vmem:[%s8794_s3 + $0x5c0] ss:$16 sps:$4 sm:$0xff]  }
 0x209   : > { %5552 = vmatpush1.bf16.msra.mxu1 %v7648_v34  ;;  %5512 = vmatprep.subr.bf16.mxu0 %v7653_v36  ;;  %v7708_v34 = vld [vmem:[%s8794_s3 + $0x7c0] ss:$16 sps:$4 sm:$0xff]   ;;  %v7713_v36 = vld [vmem:[%s8794_s3 + $0x5e4] ss:$16 sps:$4 sm:$0xff]  }
 0x20a   : > { %5553 = vmatprep.subr.bf16.mxu1 %v7656_v37  ;;  %v7716_v37 = vld [vmem:[%s8794_s3 + $0x7e4] ss:$16 sps:$4 sm:$0xff]  }
 0x20b   : > { %v2689_v42 = vpop.f32.mrb[4].mxu1 }
 0x20c   : > { %v2691_v47 = vpop.f32.mrb[5].mxu1  ;;  %5513 = vmatpush1.bf16.msra.mxu0 %v7651_v38  ;;  %v9291_v38 = vrot.slane %v343_v26, %v8850_v49 }
 0x20d   : > { %v2693_v48 = vpop.f32.mrb[6].mxu1  ;;  %5554 = vmatpush1.bf16.msra.mxu1 %v7654_v39  ;;  %5514 = vmatprep.subr.bf16.mxu0 %v7659_v40  ;;  %v9294_v39 = vrot.slane %v383_v32, %v8850_v49  ;;  %v7711_v40 = vld [vmem:[%s8794_s3 + $0x5e0] ss:$16 sps:$4 sm:$0xff]  }
 0x20e   : > { %v2694_v50 = vpop.f32.mrb[7].mxu1  ;;  %5555 = vmatprep.subr.bf16.mxu1 %v7662_v41  ;;  %v2648_v52 = vpop.f32.mrb[4].mxu0  ;;  %v7714_v41 = vld [vmem:[%s8794_s3 + $0x7e0] ss:$16 sps:$4 sm:$0xff]   ;;  %v398_v48 = vcombine.high %v9291_v38, %v9291_v38 }
 0x20f   : > { %v2649_v51 = vadd.f32 %v2648_v52, %v9160_v22  ;;  %v2650_v17 = vpop.f32.mrb[5].mxu0  ;;  %v399_v50 = vcombine.high %v9294_v39, %v9294_v39  ;;  %v7726_v52 = vld [vmem:[%s8794_s3 + $0x824] ss:$16 sps:$4 sm:$0xff]   ;;  %v7760_v32 = vld [vmem:[%s8794_s3 + $0x8e0] ss:$16 sps:$4 sm:$0xff]  }
 0x210   : > { %v2651_v53 = vadd.f32 %v2650_v17, %v9162_v25  ;;  %v2652_v55 = vpop.f32.mrb[6].mxu0  ;;  %5515 = vmatpush1.bf16.msra.mxu0 %v7657_v44  ;;  %v7669_v25 = vld [vmem:[%s8794_s3 + $0x500] ss:$16 sps:$4 sm:$0xff]   ;;  %v7723_v44 = vld [vmem:[%s8794_s3 + $0xa04] ss:$16 sps:$4 sm:$0xff]   ;;  %v9316_v17 = vpack.c.bf16 %v398_v48, %v398_v48 }
 0x211   : > { %5556 = vmatpush1.bf16.msra.mxu1 %v7660_v46  ;;  %v2653_v59 = vpop.f32.mrb[7].mxu0  ;;  %5516 = vmatprep.subr.bf16.mxu0 %v7665_v16  ;;  %v9258_v22 = vadd.f32 %v2689_v42, %v2649_v51  ;;  %v7720_v42 = vld [vmem:[%s8794_s3 + $0x804] ss:$16 sps:$4 sm:$0xff]   ;;  %v7718_v46 = vld [vmem:[%s8794_s3 + $0x800] ss:$16 sps:$4 sm:$0xff]   ;;  %v9308_v16 = vpack.c.bf16 %v9195_v1, %v9195_v1 }
 0x212   : > { %5557 = vmatprep.subr.bf16.mxu1 %v7668_v3  ;;  %v9260_v60 = vadd.f32 %v2691_v47, %v2651_v53  ;;  %v7721_v47 = vld [vmem:[%s8794_s3 + $0xa00] ss:$16 sps:$4 sm:$0xff]   ;;  %v9312_v3 = vpack.c.bf16 %v9198_v2, %v9198_v2  ;;  %v7729_v51 = vld [vmem:[%s8794_s3 + $0xa24] ss:$16 sps:$4 sm:$0xff]   ;;  %v9318_v53 = vpack.c.bf16 %v399_v50, %v399_v50 }
 0x213   : > { %v7724_v1 = vld [vmem:[%s8794_s3 + $0x820] ss:$16 sps:$4 sm:$0xff]   ;;  %v7732_v55 = vld [vmem:[%s8794_s3 + $0x844] ss:$16 sps:$4 sm:$0xff]  }
 0x214   : > { %5517 = vmatpush1.bf16.msra.mxu0 %v7663_v57  ;;  %v7727_v2 = vld [vmem:[%s8794_s3 + $0xa20] ss:$16 sps:$4 sm:$0xff]   ;;  %v7735_v57 = vld [vmem:[%s8794_s3 + $0xa44] ss:$16 sps:$4 sm:$0xff]  }
 0x215   : > { %5558 = vmatpush1.bf16.msra.mxu1 %v7666_v58  ;;  %5518 = vmatprep.subr.bf16.mxu0 %v7671_v31  ;;  %v7730_v58 = vld [vmem:[%s8794_s3 + $0x840] ss:$16 sps:$4 sm:$0xff]   ;;  %v7738_v31 = vld [vmem:[%s8794_s3 + $0x864] ss:$16 sps:$4 sm:$0xff]  }
 0x216   : > { %5559 = vmatprep.subr.bf16.mxu1 %v7674_v35  ;;  %v7733_v59 = vld [vmem:[%s8794_s3 + $0xa40] ss:$16 sps:$4 sm:$0xff]   ;;  %v7741_v35 = vld [vmem:[%s8794_s3 + $0xa64] ss:$16 sps:$4 sm:$0xff]  }
 0x217   : > { %v7780_v48 = vld [vmem:[%s8794_s3 + $0x944] ss:$16 sps:$4 sm:$0xff]  }
 0x218   : > { %5519 = vmatpush1.bf16.msra.mxu0 %v7669_v25  ;;  %v7736_v25 = vld [vmem:[%s8794_s3 + $0x860] ss:$16 sps:$4 sm:$0xff]   ;;  %v7783_v50 = vld [vmem:[%s8794_s3 + $0xb44] ss:$16 sps:$4 sm:$0xff]  }
 0x219   : > { %5560 = vmatpush1.bf16.msra.mxu1 %v7672_v61  ;;  %5520 = vmatprep.subr.bf16.mxu0 %v7677_v63  ;;  %v7739_v61 = vld [vmem:[%s8794_s3 + $0xa60] ss:$16 sps:$4 sm:$0xff]   ;;  %v7744_v63 = vld [vmem:[%s8794_s3 + $0x884] ss:$16 sps:$4 sm:$0xff]  }
 0x21a   : > { %5561 = vmatprep.subr.bf16.mxu1 %v7680_v0  ;;  %v7747_v0 = vld [vmem:[%s8794_s3 + $0xa84] ss:$16 sps:$4 sm:$0xff]  }
 0x21c   : > { %5521 = vmatpush1.bf16.msra.mxu0 %v7675_v4  ;;  %v7742_v4 = vld [vmem:[%s8794_s3 + $0x880] ss:$16 sps:$4 sm:$0xff]  }
 0x21d   : > { %5562 = vmatpush1.bf16.msra.mxu1 %v7678_v5  ;;  %5522 = vmatprep.subr.bf16.mxu0 %v7683_v6  ;;  %v7745_v5 = vld [vmem:[%s8794_s3 + $0xa80] ss:$16 sps:$4 sm:$0xff]   ;;  %v7750_v6 = vld [vmem:[%s8794_s3 + $0x8a4] ss:$16 sps:$4 sm:$0xff]  }
 0x21e   : > { %5563 = vmatprep.subr.bf16.mxu1 %v7686_v7  ;;  %v7753_v7 = vld [vmem:[%s8794_s3 + $0xaa4] ss:$16 sps:$4 sm:$0xff]  }
 0x220   : > { %5523 = vmatpush1.bf16.msra.mxu0 %v7681_v8  ;;  %v7748_v8 = vld [vmem:[%s8794_s3 + $0x8a0] ss:$16 sps:$4 sm:$0xff]  }
 0x221   : > { %5564 = vmatpush1.bf16.msra.mxu1 %v7684_v9  ;;  %5524 = vmatprep.subr.bf16.mxu0 %v7689_v10  ;;  %v7751_v9 = vld [vmem:[%s8794_s3 + $0xaa0] ss:$16 sps:$4 sm:$0xff]   ;;  %v7756_v10 = vld [vmem:[%s8794_s3 + $0x8c4] ss:$16 sps:$4 sm:$0xff]  }
 0x222   : > { %5565 = vmatprep.subr.bf16.mxu1 %v7692_v11  ;;  %v7759_v11 = vld [vmem:[%s8794_s3 + $0xac4] ss:$16 sps:$4 sm:$0xff]  }
 0x224   : > { %5525 = vmatpush1.bf16.msra.mxu0 %v7687_v14 }
 0x225   : > { %5566 = vmatpush1.bf16.msra.mxu1 %v7690_v15  ;;  %5526 = vmatprep.subr.bf16.mxu0 %v7695_v45  ;;  %v7754_v15 = vld [vmem:[%s8794_s3 + $0x8c0] ss:$16 sps:$4 sm:$0xff]  }
 0x226   : > { %5567 = vmatprep.subr.bf16.mxu1 %v7698_v62  ;;  %v7757_v45 = vld [vmem:[%s8794_s3 + $0xac0] ss:$16 sps:$4 sm:$0xff]  }
 0x228   : > { %5527 = vmatpush1.bf16.msra.mxu0 %v7693_v20 }
 0x229   : > { %5568 = vmatpush1.bf16.msra.mxu1 %v7696_v21  ;;  %5528 = vmatprep.subr.bf16.mxu0 %v7701_v23  ;;  %v7762_v23 = vld [vmem:[%s8794_s3 + $0x8e4] ss:$16 sps:$4 sm:$0xff]  }
 0x22a   : > { %5569 = vmatprep.subr.bf16.mxu1 %v7704_v24  ;;  %v7765_v24 = vld [vmem:[%s8794_s3 + $0xae4] ss:$16 sps:$4 sm:$0xff]  }
 0x22c   : > { %5529 = vmatpush1.bf16.msra.mxu0 %v7699_v27 }
 0x22d   : > { %5570 = vmatpush1.bf16.msra.mxu1 %v7702_v28  ;;  %5530 = vmatprep.subr.bf16.mxu0 %v7707_v29 }
 0x22e   : > { %5571 = vmatprep.subr.bf16.mxu1 %v7710_v30 }
 0x230   : > { %5531 = vmatpush1.bf16.msra.mxu0 %v7705_v33  ;;  %v7763_v33 = vld [vmem:[%s8794_s3 + $0xae0] ss:$16 sps:$4 sm:$0xff]  }
 0x231   : > { %5572 = vmatpush1.bf16.msra.mxu1 %v7708_v34  ;;  %5532 = vmatprep.subr.bf16.mxu0 %v7713_v36  ;;  %v7768_v36 = vld [vmem:[%s8794_s3 + $0x904] ss:$16 sps:$4 sm:$0xff]  }
 0x232   : > { %5573 = vmatprep.subr.bf16.mxu1 %v7716_v37  ;;  %v7771_v37 = vld [vmem:[%s8794_s3 + $0xb04] ss:$16 sps:$4 sm:$0xff]  }
 0x234   : > { %5533 = vmatpush1.bf16.msra.mxu0 %v7711_v40  ;;  %v7766_v40 = vld [vmem:[%s8794_s3 + $0x900] ss:$16 sps:$4 sm:$0xff]  }
 0x235   : > { %5574 = vmatpush1.bf16.msra.mxu1 %v7714_v41  ;;  %5584 = vmatprep.subr.bf16.mxu0 %v7720_v42  ;;  %v7769_v41 = vld [vmem:[%s8794_s3 + $0xb00] ss:$16 sps:$4 sm:$0xff]   ;;  %v7774_v42 = vld [vmem:[%s8794_s3 + $0x924] ss:$16 sps:$4 sm:$0xff]  }
 0x236   : > { %5625 = vmatprep.subr.bf16.mxu1 %v7723_v44  ;;  %v7777_v44 = vld [vmem:[%s8794_s3 + $0xb24] ss:$16 sps:$4 sm:$0xff]  }
 0x237   : > { %5535 = vmatmul.mubr.bf16.vlgmr.msra.gmra.mrb[20].mxu0 %v9308_v16 }
 0x238   : > { %5576 = vmatmul.mubr.bf16.vlgmr.msra.gmra.mrb[20].mxu1 %v9312_v3  ;;  %5585 = vmatpush1.bf16.msra.mxu0 %v7718_v46  ;;  %v7772_v46 = vld [vmem:[%s8794_s3 + $0x920] ss:$16 sps:$4 sm:$0xff]  }
 0x239   : > { %5626 = vmatpush1.bf16.msra.mxu1 %v7721_v47  ;;  %5586 = vmatprep.subr.bf16.mxu0 %v7726_v52  ;;  %v7775_v47 = vld [vmem:[%s8794_s3 + $0xb20] ss:$16 sps:$4 sm:$0xff]  }
 0x23a   : > { %5627 = vmatprep.subr.bf16.mxu1 %v7729_v51  ;;  %5616 = vmatprep.mubr.bf16.mxu0 %v9316_v17  ;;  %v7778_v52 = vld [vmem:[%s8794_s3 + $0x940] ss:$16 sps:$4 sm:$0xff]  }
 0x23b   : > { %5657 = vmatprep.mubr.bf16.mxu1 %v9318_v53  ;;  %v7781_v51 = vld [vmem:[%s8794_s3 + $0xb40] ss:$16 sps:$4 sm:$0xff]  }
 0x23c   : > { %5587 = vmatpush1.bf16.msra.mxu0 %v7724_v1  ;;  %v7786_v1 = vld [vmem:[%s8794_s3 + $0x964] ss:$16 sps:$4 sm:$0xff]  }
 0x23d   : > { %5628 = vmatpush1.bf16.msra.mxu1 %v7727_v2  ;;  %5588 = vmatprep.subr.bf16.mxu0 %v7732_v55  ;;  %v7789_v2 = vld [vmem:[%s8794_s3 + $0xb64] ss:$16 sps:$4 sm:$0xff]   ;;  %v7784_v55 = vld [vmem:[%s8794_s3 + $0x960] ss:$16 sps:$4 sm:$0xff]  }
 0x23e   : > { %5629 = vmatprep.subr.bf16.mxu1 %v7735_v57  ;;  %v7787_v57 = vld [vmem:[%s8794_s3 + $0xb60] ss:$16 sps:$4 sm:$0xff]  }
 0x240   : > { %5589 = vmatpush1.bf16.msra.mxu0 %v7730_v58  ;;  %v7792_v58 = vld [vmem:[%s8794_s3 + $0x984] ss:$16 sps:$4 sm:$0xff]  }
 0x241   : > { %5630 = vmatpush1.bf16.msra.mxu1 %v7733_v59  ;;  %5590 = vmatprep.subr.bf16.mxu0 %v7738_v31  ;;  %v7795_v59 = vld [vmem:[%s8794_s3 + $0xb84] ss:$16 sps:$4 sm:$0xff]   ;;  %v7790_v31 = vld [vmem:[%s8794_s3 + $0x980] ss:$16 sps:$4 sm:$0xff]  }
 0x242   : > { %5631 = vmatprep.subr.bf16.mxu1 %v7741_v35  ;;  %v7793_v35 = vld [vmem:[%s8794_s3 + $0xb80] ss:$16 sps:$4 sm:$0xff]  }
 0x244   : > { %5591 = vmatpush1.bf16.msra.mxu0 %v7736_v25  ;;  %v7798_v25 = vld [vmem:[%s8794_s3 + $0x9a4] ss:$16 sps:$4 sm:$0xff]  }
 0x245   : > { %5632 = vmatpush1.bf16.msra.mxu1 %v7739_v61  ;;  %5592 = vmatprep.subr.bf16.mxu0 %v7744_v63  ;;  %v7801_v61 = vld [vmem:[%s8794_s3 + $0xba4] ss:$16 sps:$4 sm:$0xff]   ;;  %v344_v63 = vld [vmem:[#allocation2 + $0x18] sm:$0xff] }
 0x246   : > { %5633 = vmatprep.subr.bf16.mxu1 %v7747_v0  ;;  %v7796_v0 = vld [vmem:[%s8794_s3 + $0x9a0] ss:$16 sps:$4 sm:$0xff]  }
 0x248   : > { %5593 = vmatpush1.bf16.msra.mxu0 %v7742_v4  ;;  %v7799_v4 = vld [vmem:[%s8794_s3 + $0xba0] ss:$16 sps:$4 sm:$0xff]  }
 0x249   : > { %5634 = vmatpush1.bf16.msra.mxu1 %v7745_v5  ;;  %5594 = vmatprep.subr.bf16.mxu0 %v7750_v6  ;;  %v7804_v5 = vld [vmem:[%s8794_s3 + $0x9c4] ss:$16 sps:$4 sm:$0xff]  }
 0x24a   : > { %5635 = vmatprep.subr.bf16.mxu1 %v7753_v7  ;;  %v7807_v6 = vld [vmem:[%s8794_s3 + $0xbc4] ss:$16 sps:$4 sm:$0xff]   ;;  %v400_v7 = vcombine.high %v344_v63, %v344_v63 }
 0x24b   : > { %v2730_v14 = vpop.f32.mrb[8].mxu1 }
 0x24c   : > { %v2732_v62 = vpop.f32.mrb[9].mxu1  ;;  %5595 = vmatpush1.bf16.msra.mxu0 %v7748_v8  ;;  %v7802_v8 = vld [vmem:[%s8794_s3 + $0x9c0] ss:$16 sps:$4 sm:$0xff]  }
 0x24d   : > { %v2734_v20 = vpop.f32.mrb[10].mxu1  ;;  %5636 = vmatpush1.bf16.msra.mxu1 %v7751_v9  ;;  %5596 = vmatprep.subr.bf16.mxu0 %v7756_v10  ;;  %v7805_v9 = vld [vmem:[%s8794_s3 + $0xbc0] ss:$16 sps:$4 sm:$0xff]   ;;  %v7810_v10 = vld [vmem:[%s8794_s3 + $0x9e4] ss:$16 sps:$4 sm:$0xff]  }
 0x24e   : > { %v2735_v21 = vpop.f32.mrb[11].mxu1  ;;  %5637 = vmatprep.subr.bf16.mxu1 %v7759_v11  ;;  %v2771_v26 = vpop.f32.mrb[8].mxu0  ;;  %v7813_v11 = vld [vmem:[%s8794_s3 + $0xbe4] ss:$16 sps:$4 sm:$0xff]  }
 0x24f   : > { %v9348_v27 = vadd.f32 %v2771_v26, %v2730_v14  ;;  %v2773_v28 = vpop.f32.mrb[9].mxu0  ;;  %v9385_v14 = vrot.slane %v344_v63, %v8850_v49  ;;  %v7817_v20 = vld [vmem:[%s8794_s3 + $0xc04] ss:$16 sps:$4 sm:$0xff]  }
 0x250   : > { %v9350_v29 = vadd.f32 %v2773_v28, %v2732_v62  ;;  %v2775_v30 = vpop.f32.mrb[10].mxu0  ;;  %5597 = vmatpush1.bf16.msra.mxu0 %v7754_v15  ;;  %v9388_v15 = vrot.slane %v400_v7, %v8850_v49  ;;  %v7811_v62 = vld [vmem:[%s8794_s3 + $0xbe0] ss:$16 sps:$4 sm:$0xff]   ;;  %v7820_v21 = vld [vmem:[%s8794_s3 + $0xe04] ss:$16 sps:$4 sm:$0xff]  }
 0x251   : > { %5638 = vmatpush1.bf16.msra.mxu1 %v7757_v45  ;;  %v2776_v34 = vpop.f32.mrb[11].mxu0  ;;  %5598 = vmatprep.subr.bf16.mxu0 %v7762_v23  ;;  %v7808_v45 = vld [vmem:[%s8794_s3 + $0x9e0] ss:$16 sps:$4 sm:$0xff]   ;;  %v415_v26 = vcombine.high %v9385_v14, %v9385_v14  ;;  %v9402_v30 = vpack.c.bf16 %v9291_v38, %v9291_v38 }
 0x252   : > { %5639 = vmatprep.subr.bf16.mxu1 %v7765_v24  ;;  %v7815_v23 = vld [vmem:[%s8794_s3 + $0xc00] ss:$16 sps:$4 sm:$0xff]   ;;  %v416_v28 = vcombine.high %v9388_v15, %v9388_v15  ;;  %v7826_v34 = vld [vmem:[%s8794_s3 + $0xe24] ss:$16 sps:$4 sm:$0xff]  }
 0x253   : > { %v7818_v24 = vld [vmem:[%s8794_s3 + $0xe00] ss:$16 sps:$4 sm:$0xff]  }
 0x254   : > { %5599 = vmatpush1.bf16.msra.mxu0 %v7760_v32  ;;  %v9406_v32 = vpack.c.bf16 %v9294_v39, %v9294_v39  ;;  %v7821_v38 = vld [vmem:[%s8794_s3 + $0xc20] ss:$16 sps:$4 sm:$0xff]  }
 0x255   : > { %5640 = vmatpush1.bf16.msra.mxu1 %v7763_v33  ;;  %5600 = vmatprep.subr.bf16.mxu0 %v7768_v36  ;;  %v7823_v33 = vld [vmem:[%s8794_s3 + $0xc24] ss:$16 sps:$4 sm:$0xff]   ;;  %v9410_v36 = vpack.c.bf16 %v415_v26, %v415_v26  ;;  %v7824_v39 = vld [vmem:[%s8794_s3 + $0xe20] ss:$16 sps:$4 sm:$0xff]  }
 0x256   : > { %5641 = vmatprep.subr.bf16.mxu1 %v7771_v37  ;;  %v9412_v37 = vpack.c.bf16 %v416_v28, %v416_v28  ;;  %v7863_v26 = vld [vmem:[%s8794_s3 + $0xd00] ss:$16 sps:$4 sm:$0xff]  }
 0x257   : > { %v7866_v28 = vld [vmem:[%s8794_s3 + $0xf00] ss:$16 sps:$4 sm:$0xff]  }
 0x258   : > { %5601 = vmatpush1.bf16.msra.mxu0 %v7766_v40  ;;  %v7829_v40 = vld [vmem:[%s8794_s3 + $0xc44] ss:$16 sps:$4 sm:$0xff]  }
 0x259   : > { %5642 = vmatpush1.bf16.msra.mxu1 %v7769_v41  ;;  %5602 = vmatprep.subr.bf16.mxu0 %v7774_v42  ;;  %v7832_v41 = vld [vmem:[%s8794_s3 + $0xe44] ss:$16 sps:$4 sm:$0xff]   ;;  %v7827_v42 = vld [vmem:[%s8794_s3 + $0xc40] ss:$16 sps:$4 sm:$0xff]  }
 0x25a   : > { %5643 = vmatprep.subr.bf16.mxu1 %v7777_v44  ;;  %v7830_v44 = vld [vmem:[%s8794_s3 + $0xe40] ss:$16 sps:$4 sm:$0xff]  }
 0x25c   : > { %5603 = vmatpush1.bf16.msra.mxu0 %v7772_v46  ;;  %v7835_v46 = vld [vmem:[%s8794_s3 + $0xc64] ss:$16 sps:$4 sm:$0xff]  }
 0x25d   : > { %5644 = vmatpush1.bf16.msra.mxu1 %v7775_v47  ;;  %5604 = vmatprep.subr.bf16.mxu0 %v7780_v48  ;;  %v7838_v47 = vld [vmem:[%s8794_s3 + $0xe64] ss:$16 sps:$4 sm:$0xff]   ;;  %v7833_v48 = vld [vmem:[%s8794_s3 + $0xc60] ss:$16 sps:$4 sm:$0xff]  }
 0x25e   : > { %5645 = vmatprep.subr.bf16.mxu1 %v7783_v50  ;;  %v7836_v50 = vld [vmem:[%s8794_s3 + $0xe60] ss:$16 sps:$4 sm:$0xff]  }
 0x260   : > { %5605 = vmatpush1.bf16.msra.mxu0 %v7778_v52  ;;  %v7841_v52 = vld [vmem:[%s8794_s3 + $0xc84] ss:$16 sps:$4 sm:$0xff]  }
 0x261   : > { %5646 = vmatpush1.bf16.msra.mxu1 %v7781_v51  ;;  %5606 = vmatprep.subr.bf16.mxu0 %v7786_v1  ;;  %v7844_v51 = vld [vmem:[%s8794_s3 + $0xe84] ss:$16 sps:$4 sm:$0xff]   ;;  %v7839_v1 = vld [vmem:[%s8794_s3 + $0xc80] ss:$16 sps:$4 sm:$0xff]  }
 0x262   : > { %5647 = vmatprep.subr.bf16.mxu1 %v7789_v2  ;;  %v7842_v2 = vld [vmem:[%s8794_s3 + $0xe80] ss:$16 sps:$4 sm:$0xff]  }
 0x264   : > { %5607 = vmatpush1.bf16.msra.mxu0 %v7784_v55  ;;  %v7847_v55 = vld [vmem:[%s8794_s3 + $0xca4] ss:$16 sps:$4 sm:$0xff]  }
 0x265   : > { %5648 = vmatpush1.bf16.msra.mxu1 %v7787_v57  ;;  %5608 = vmatprep.subr.bf16.mxu0 %v7792_v58  ;;  %v7850_v57 = vld [vmem:[%s8794_s3 + $0xea4] ss:$16 sps:$4 sm:$0xff]   ;;  %v7845_v58 = vld [vmem:[%s8794_s3 + $0xca0] ss:$16 sps:$4 sm:$0xff]  }
 0x266   : > { %5649 = vmatprep.subr.bf16.mxu1 %v7795_v59  ;;  %v7848_v59 = vld [vmem:[%s8794_s3 + $0xea0] ss:$16 sps:$4 sm:$0xff]  }
 0x268   : > { %5609 = vmatpush1.bf16.msra.mxu0 %v7790_v31  ;;  %v7853_v31 = vld [vmem:[%s8794_s3 + $0xcc4] ss:$16 sps:$4 sm:$0xff]  }
 0x269   : > { %5650 = vmatpush1.bf16.msra.mxu1 %v7793_v35  ;;  %5610 = vmatprep.subr.bf16.mxu0 %v7798_v25  ;;  %v7856_v35 = vld [vmem:[%s8794_s3 + $0xec4] ss:$16 sps:$4 sm:$0xff]  }
 0x26a   : > { %5651 = vmatprep.subr.bf16.mxu1 %v7801_v61 }
 0x26c   : > { %5611 = vmatpush1.bf16.msra.mxu0 %v7796_v0 }
 0x26d   : > { %5652 = vmatpush1.bf16.msra.mxu1 %v7799_v4  ;;  %5612 = vmatprep.subr.bf16.mxu0 %v7804_v5 }
 0x26e   : > { %5653 = vmatprep.subr.bf16.mxu1 %v7807_v6 }
 0x270   : > { %5613 = vmatpush1.bf16.msra.mxu0 %v7802_v8  ;;  %v7851_v8 = vld [vmem:[%s8794_s3 + $0xcc0] ss:$16 sps:$4 sm:$0xff]  }
 0x271   : > { %5654 = vmatpush1.bf16.msra.mxu1 %v7805_v9  ;;  %5614 = vmatprep.subr.bf16.mxu0 %v7810_v10  ;;  %v7854_v9 = vld [vmem:[%s8794_s3 + $0xec0] ss:$16 sps:$4 sm:$0xff]  }
 0x272   : > { %5655 = vmatprep.subr.bf16.mxu1 %v7813_v11 }
 0x274   : > { %5615 = vmatpush1.bf16.msra.mxu0 %v7808_v45 }
 0x275   : > { %5656 = vmatpush1.bf16.msra.mxu1 %v7811_v62  ;;  %5666 = vmatprep.subr.bf16.mxu0 %v7817_v20  ;;  %v7857_v20 = vld [vmem:[%s8794_s3 + $0xce0] ss:$16 sps:$4 sm:$0xff]  }
 0x276   : > { %5707 = vmatprep.subr.bf16.mxu1 %v7820_v21  ;;  %v7860_v21 = vld [vmem:[%s8794_s3 + $0xee0] ss:$16 sps:$4 sm:$0xff]  }
 0x277   : > { %5617 = vmatmul.mubr.bf16.vlgmr.msra.gmra.mrb[24].mxu0 %v9402_v30 }
 0x278   : > { %5658 = vmatmul.mubr.bf16.vlgmr.msra.gmra.mrb[24].mxu1 %v9406_v32  ;;  %5667 = vmatpush1.bf16.msra.mxu0 %v7815_v23  ;;  %v7865_v23 = vld [vmem:[%s8794_s3 + $0xd04] ss:$16 sps:$4 sm:$0xff]  }
 0x279   : > { %5708 = vmatpush1.bf16.msra.mxu1 %v7818_v24  ;;  %5668 = vmatprep.subr.bf16.mxu0 %v7823_v33  ;;  %v7868_v24 = vld [vmem:[%s8794_s3 + $0xf04] ss:$16 sps:$4 sm:$0xff]  }
 0x27a   : > { %5709 = vmatprep.subr.bf16.mxu1 %v7826_v34  ;;  %5698 = vmatprep.mubr.bf16.mxu0 %v9410_v36  ;;  %v7871_v33 = vld [vmem:[%s8794_s3 + $0xd24] ss:$16 sps:$4 sm:$0xff]  }
 0x27b   : > { %5739 = vmatprep.mubr.bf16.mxu1 %v9412_v37  ;;  %v7874_v34 = vld [vmem:[%s8794_s3 + $0xf24] ss:$16 sps:$4 sm:$0xff]  }
 0x27c   : > { %5669 = vmatpush1.bf16.msra.mxu0 %v7821_v38  ;;  %v7869_v38 = vld [vmem:[%s8794_s3 + $0xd20] ss:$16 sps:$4 sm:$0xff]  }
 0x27d   : > { %5710 = vmatpush1.bf16.msra.mxu1 %v7824_v39  ;;  %5670 = vmatprep.subr.bf16.mxu0 %v7829_v40  ;;  %v7872_v39 = vld [vmem:[%s8794_s3 + $0xf20] ss:$16 sps:$4 sm:$0xff]   ;;  %v7877_v40 = vld [vmem:[%s8794_s3 + $0xd44] ss:$16 sps:$4 sm:$0xff]  }
 0x27e   : > { %5711 = vmatprep.subr.bf16.mxu1 %v7832_v41  ;;  %v7880_v41 = vld [vmem:[%s8794_s3 + $0xf44] ss:$16 sps:$4 sm:$0xff]  }
 0x280   : > { %5671 = vmatpush1.bf16.msra.mxu0 %v7827_v42  ;;  %v7875_v42 = vld [vmem:[%s8794_s3 + $0xd40] ss:$16 sps:$4 sm:$0xff]  }
 0x281   : > { %5712 = vmatpush1.bf16.msra.mxu1 %v7830_v44  ;;  %5672 = vmatprep.subr.bf16.mxu0 %v7835_v46  ;;  %v7878_v44 = vld [vmem:[%s8794_s3 + $0xf40] ss:$16 sps:$4 sm:$0xff]   ;;  %v7883_v46 = vld [vmem:[%s8794_s3 + $0xd64] ss:$16 sps:$4 sm:$0xff]  }
 0x282   : > { %5713 = vmatprep.subr.bf16.mxu1 %v7838_v47  ;;  %v7886_v47 = vld [vmem:[%s8794_s3 + $0xf64] ss:$16 sps:$4 sm:$0xff]  }
 0x284   : > { %5673 = vmatpush1.bf16.msra.mxu0 %v7833_v48  ;;  %v7881_v48 = vld [vmem:[%s8794_s3 + $0xd60] ss:$16 sps:$4 sm:$0xff]  }
 0x285   : > { %5714 = vmatpush1.bf16.msra.mxu1 %v7836_v50  ;;  %5674 = vmatprep.subr.bf16.mxu0 %v7841_v52  ;;  %v7884_v50 = vld [vmem:[%s8794_s3 + $0xf60] ss:$16 sps:$4 sm:$0xff]   ;;  %v7889_v52 = vld [vmem:[%s8794_s3 + $0xd84] ss:$16 sps:$4 sm:$0xff]  }
 0x286   : > { %5715 = vmatprep.subr.bf16.mxu1 %v7844_v51  ;;  %v7892_v51 = vld [vmem:[%s8794_s3 + $0xf84] ss:$16 sps:$4 sm:$0xff]  }
 0x288   : > { %5675 = vmatpush1.bf16.msra.mxu0 %v7839_v1  ;;  %v7887_v1 = vld [vmem:[%s8794_s3 + $0xd80] ss:$16 sps:$4 sm:$0xff]  }
 0x289   : > { %5716 = vmatpush1.bf16.msra.mxu1 %v7842_v2  ;;  %5676 = vmatprep.subr.bf16.mxu0 %v7847_v55  ;;  %v7890_v2 = vld [vmem:[%s8794_s3 + $0xf80] ss:$16 sps:$4 sm:$0xff]   ;;  %v7895_v55 = vld [vmem:[%s8794_s3 + $0xda4] ss:$16 sps:$4 sm:$0xff]  }
 0x28a   : > { %5717 = vmatprep.subr.bf16.mxu1 %v7850_v57  ;;  %v2853_v61 = vpop.f32.mrb[12].mxu0  ;;  %v7898_v57 = vld [vmem:[%s8794_s3 + $0xfa4] ss:$16 sps:$4 sm:$0xff]  }
 0x28b   : > { %v2812_v25 = vpop.f32.mrb[12].mxu1  ;;  %v2855_v4 = vpop.f32.mrb[13].mxu0 }
 0x28c   : > { %v2813_v63 = vadd.f32 %v2812_v25, %v9348_v27  ;;  %v2814_v0 = vpop.f32.mrb[13].mxu1  ;;  %v2857_v7 = vpop.f32.mrb[14].mxu0  ;;  %5677 = vmatpush1.bf16.msra.mxu0 %v7845_v58  ;;  %v7859_v27 = vld [vmem:[%s8794_s3 + $0xce4] ss:$16 sps:$4 sm:$0xff]   ;;  %v7893_v58 = vld [vmem:[%s8794_s3 + $0xda0] ss:$16 sps:$4 sm:$0xff]  }
 0x28d   : > { %v2815_v5 = vadd.f32 %v2814_v0, %v9350_v29  ;;  %v2816_v6 = vpop.f32.mrb[14].mxu1  ;;  %5718 = vmatpush1.bf16.msra.mxu1 %v7848_v59  ;;  %v2858_v45 = vpop.f32.mrb[15].mxu0  ;;  %5678 = vmatprep.subr.bf16.mxu0 %v7853_v31  ;;  %v7862_v29 = vld [vmem:[%s8794_s3 + $0xee4] ss:$16 sps:$4 sm:$0xff]   ;;  %v7896_v59 = vld [vmem:[%s8794_s3 + $0xfa0] ss:$16 sps:$4 sm:$0xff]  }
 0x28e   : > { %v9442_v10 = vadd.f32 %v2853_v61, %v2813_v63  ;;  %v2817_v11 = vpop.f32.mrb[15].mxu1  ;;  %5719 = vmatprep.subr.bf16.mxu1 %v7856_v35  ;;  %v7901_v31 = vld [vmem:[%s8794_s3 + $0xdc4] ss:$16 sps:$4 sm:$0xff]   ;;  %v7899_v25 = vld [vmem:[%s8794_s3 + $0xdc0] ss:$16 sps:$4 sm:$0xff]  }
 0x28f   : > { %v9446_v62 = vadd.f32 %v2855_v4, %v2815_v5  ;;  %v7904_v35 = vld [vmem:[%s8794_s3 + $0xfc4] ss:$16 sps:$4 sm:$0xff]   ;;  %v7902_v61 = vld [vmem:[%s8794_s3 + $0xfc0] ss:$16 sps:$4 sm:$0xff]   ;;  %v7914_v6 = vld [vmem:[%s8794_s3 + $0xc] ss:$16 sps:$4 sm:$0xff]  }
 0x290   : > { %5679 = vmatpush1.bf16.msra.mxu0 %v7851_v8  ;;  %v7907_v63 = vld [vmem:[%s8794_s3 + $0xde4] ss:$16 sps:$4 sm:$0xff]   ;;  %v7905_v4 = vld [vmem:[%s8794_s3 + $0xde0] ss:$16 sps:$4 sm:$0xff]   ;;  %v7917_v7 = vld [vmem:[%s8794_s3 + $0x20c] ss:$16 sps:$4 sm:$0xff]   ;;  %v9486_v8 = vpack.c.bf16 %v9385_v14, %v9385_v14 }
 0x291   : > { %5720 = vmatpush1.bf16.msra.mxu1 %v7854_v9  ;;  %5680 = vmatprep.subr.bf16.mxu0 %v7859_v27  ;;  %v7910_v0 = vld [vmem:[%s8794_s3 + $0xfe4] ss:$16 sps:$4 sm:$0xff]   ;;  %v7908_v5 = vld [vmem:[%s8794_s3 + $0xfe0] ss:$16 sps:$4 sm:$0xff]   ;;  %v9490_v9 = vpack.c.bf16 %v9388_v15, %v9388_v15  ;;  %v7912_v11 = vld [vmem:[%s8794_s3 + $0x8] ss:$16 sps:$4 sm:$0xff]  }
 0x292   : > { %5721 = vmatprep.subr.bf16.mxu1 %v7862_v29  ;;  %v7915_v45 = vld [vmem:[%s8794_s3 + $0x208] ss:$16 sps:$4 sm:$0xff]   ;;  %v7920_v27 = vld [vmem:[%s8794_s3 + $0x2c] ss:$16 sps:$4 sm:$0xff]  }
 0x293   : > { %v7923_v29 = vld [vmem:[%s8794_s3 + $0x22c] ss:$16 sps:$4 sm:$0xff]   ;;  %v7918_v14 = vld [vmem:[%s8794_s3 + $0x28] ss:$16 sps:$4 sm:$0xff]  }
 0x294   : > { %5681 = vmatpush1.bf16.msra.mxu0 %v7857_v20  ;;  %v7921_v15 = vld [vmem:[%s8794_s3 + $0x228] ss:$16 sps:$4 sm:$0xff]   ;;  %v7926_v20 = vld [vmem:[%s8794_s3 + $0x4c] ss:$16 sps:$4 sm:$0xff]  }
 0x295   : > { %5722 = vmatpush1.bf16.msra.mxu1 %v7860_v21  ;;  %5682 = vmatprep.subr.bf16.mxu0 %v7865_v23  ;;  %v7929_v21 = vld [vmem:[%s8794_s3 + $0x24c] ss:$16 sps:$4 sm:$0xff]   ;;  %v7924_v23 = vld [vmem:[%s8794_s3 + $0x48] ss:$16 sps:$4 sm:$0xff]  }
 0x296   : > { %5723 = vmatprep.subr.bf16.mxu1 %v7868_v24  ;;  %v7927_v24 = vld [vmem:[%s8794_s3 + $0x248] ss:$16 sps:$4 sm:$0xff]  }
 0x298   : > { %5683 = vmatpush1.bf16.msra.mxu0 %v7863_v26  ;;  %v7932_v26 = vld [vmem:[%s8794_s3 + $0x6c] ss:$16 sps:$4 sm:$0xff]  }
 0x299   : > { %5724 = vmatpush1.bf16.msra.mxu1 %v7866_v28  ;;  %5684 = vmatprep.subr.bf16.mxu0 %v7871_v33  ;;  %v7935_v28 = vld [vmem:[%s8794_s3 + $0x26c] ss:$16 sps:$4 sm:$0xff]   ;;  %v7930_v33 = vld [vmem:[%s8794_s3 + $0x68] ss:$16 sps:$4 sm:$0xff]  }
 0x29a   : > { %5725 = vmatprep.subr.bf16.mxu1 %v7874_v34  ;;  %v7941_v34 = vld [vmem:[%s8794_s3 + $0x28c] ss:$16 sps:$4 sm:$0xff]  }
 0x29c   : > { %5685 = vmatpush1.bf16.msra.mxu0 %v7869_v38  ;;  %v7936_v38 = vld [vmem:[%s8794_s3 + $0x88] ss:$16 sps:$4 sm:$0xff]  }
 0x29d   : > { %5726 = vmatpush1.bf16.msra.mxu1 %v7872_v39  ;;  %5686 = vmatprep.subr.bf16.mxu0 %v7877_v40  ;;  %v7939_v39 = vld [vmem:[%s8794_s3 + $0x288] ss:$16 sps:$4 sm:$0xff]   ;;  %v7944_v40 = vld [vmem:[%s8794_s3 + $0xac] ss:$16 sps:$4 sm:$0xff]  }
 0x29e   : > { %5727 = vmatprep.subr.bf16.mxu1 %v7880_v41  ;;  %v7947_v41 = vld [vmem:[%s8794_s3 + $0x2ac] ss:$16 sps:$4 sm:$0xff]  }
 0x2a0   : > { %5687 = vmatpush1.bf16.msra.mxu0 %v7875_v42  ;;  %v7942_v42 = vld [vmem:[%s8794_s3 + $0xa8] ss:$16 sps:$4 sm:$0xff]  }
 0x2a1   : > { %5728 = vmatpush1.bf16.msra.mxu1 %v7878_v44  ;;  %5688 = vmatprep.subr.bf16.mxu0 %v7883_v46  ;;  %v7945_v44 = vld [vmem:[%s8794_s3 + $0x2a8] ss:$16 sps:$4 sm:$0xff]   ;;  %v7950_v46 = vld [vmem:[%s8794_s3 + $0xcc] ss:$16 sps:$4 sm:$0xff]  }
 0x2a2   : > { %5729 = vmatprep.subr.bf16.mxu1 %v7886_v47  ;;  %v7953_v47 = vld [vmem:[%s8794_s3 + $0x2cc] ss:$16 sps:$4 sm:$0xff]  }
 0x2a4   : > { %5689 = vmatpush1.bf16.msra.mxu0 %v7881_v48 }
 0x2a5   : > { %5730 = vmatpush1.bf16.msra.mxu1 %v7884_v50  ;;  %5690 = vmatprep.subr.bf16.mxu0 %v7889_v52 }
 0x2a6   : > { %5731 = vmatprep.subr.bf16.mxu1 %v7892_v51 }
 0x2a8   : > { %5691 = vmatpush1.bf16.msra.mxu0 %v7887_v1 }
 0x2a9   : > { %5732 = vmatpush1.bf16.msra.mxu1 %v7890_v2  ;;  %5692 = vmatprep.subr.bf16.mxu0 %v7895_v55 }
 0x2aa   : > { %5733 = vmatprep.subr.bf16.mxu1 %v7898_v57 }
 0x2ac   : > { %5693 = vmatpush1.bf16.msra.mxu0 %v7893_v58  ;;  %v7948_v58 = vld [vmem:[%s8794_s3 + $0xc8] ss:$16 sps:$4 sm:$0xff]  }
 0x2ad   : > { %5734 = vmatpush1.bf16.msra.mxu1 %v7896_v59  ;;  %5694 = vmatprep.subr.bf16.mxu0 %v7901_v31  ;;  %v7951_v59 = vld [vmem:[%s8794_s3 + $0x2c8] ss:$16 sps:$4 sm:$0xff]  }
 0x2ae   : > { %5735 = vmatprep.subr.bf16.mxu1 %v7904_v35 }
 0x2b0   : > { %5695 = vmatpush1.bf16.msra.mxu0 %v7899_v25 }
 0x2b1   : > { %5736 = vmatpush1.bf16.msra.mxu1 %v7902_v61  ;;  %5696 = vmatprep.subr.bf16.mxu0 %v7907_v63  ;;  %v7954_v63 = vld [vmem:[%s8794_s3 + $0xe8] ss:$16 sps:$4 sm:$0xff]  }
 0x2b2   : > { %5737 = vmatprep.subr.bf16.mxu1 %v7910_v0  ;;  %v7957_v0 = vld [vmem:[%s8794_s3 + $0x2e8] ss:$16 sps:$4 sm:$0xff]  }
 0x2b4   : > { %5697 = vmatpush1.bf16.msra.mxu0 %v7905_v4  ;;  %v7962_v4 = vld [vmem:[%s8794_s3 + $0x10c] ss:$16 sps:$4 sm:$0xff]  }
 0x2b5   : > { %5738 = vmatpush1.bf16.msra.mxu1 %v7908_v5  ;;  %5748 = vmatprep.subr.bf16.mxu0 %v7914_v6  ;;  %v7965_v5 = vld [vmem:[%s8794_s3 + $0x30c] ss:$16 sps:$4 sm:$0xff]   ;;  %v7960_v6 = vld [vmem:[%s8794_s3 + $0x108] ss:$16 sps:$4 sm:$0xff]  }
 0x2b6   : > { %5789 = vmatprep.subr.bf16.mxu1 %v7917_v7  ;;  %v7963_v7 = vld [vmem:[%s8794_s3 + $0x308] ss:$16 sps:$4 sm:$0xff]  }
 0x2b7   : > { %5699 = vmatmul.mubr.bf16.vlgmr.msra.gmra.mrb[28].mxu0 %v9486_v8 }
 0x2b8   : > { %5740 = vmatmul.mubr.bf16.vlgmr.msra.gmra.mrb[28].mxu1 %v9490_v9  ;;  %5749 = vmatpush1.bf16.msra.mxu0 %v7912_v11  ;;  %v7968_v11 = vld [vmem:[%s8794_s3 + $0x12c] ss:$16 sps:$4 sm:$0xff]  }
 0x2b9   : > { %5790 = vmatpush1.bf16.msra.mxu1 %v7915_v45  ;;  %5750 = vmatprep.subr.bf16.mxu0 %v7920_v27  ;;  %v7971_v45 = vld [vmem:[%s8794_s3 + $0x32c] ss:$16 sps:$4 sm:$0xff]   ;;  %v7966_v27 = vld [vmem:[%s8794_s3 + $0x128] ss:$16 sps:$4 sm:$0xff]  }
 0x2ba   : > { %5791 = vmatprep.subr.bf16.mxu1 %v7923_v29  ;;  %5780 = vmatprep.mubr.bf16.mxu0 %v9126_v54  ;;  %v7933_v54 = vld [vmem:[%s8794_s3 + $0x268] ss:$16 sps:$4 sm:$0xff]  }
 0x2bb   : > { %5821 = vmatprep.mubr.bf16.mxu1 %v9128_v56  ;;  %v7938_v56 = vld [vmem:[%s8794_s3 + $0x8c] ss:$16 sps:$4 sm:$0xff]   ;;  %v7969_v29 = vld [vmem:[%s8794_s3 + $0x328] ss:$16 sps:$4 sm:$0xff]  }
 0x2bc   : > { %5751 = vmatpush1.bf16.msra.mxu0 %v7918_v14  ;;  %v7974_v14 = vld [vmem:[%s8794_s3 + $0x14c] ss:$16 sps:$4 sm:$0xff]  }
 0x2bd   : > { %5792 = vmatpush1.bf16.msra.mxu1 %v7921_v15  ;;  %5752 = vmatprep.subr.bf16.mxu0 %v7926_v20  ;;  %v7977_v15 = vld [vmem:[%s8794_s3 + $0x34c] ss:$16 sps:$4 sm:$0xff]   ;;  %v7972_v20 = vld [vmem:[%s8794_s3 + $0x148] ss:$16 sps:$4 sm:$0xff]  }
 0x2be   : > { %5793 = vmatprep.subr.bf16.mxu1 %v7929_v21  ;;  %v7975_v21 = vld [vmem:[%s8794_s3 + $0x348] ss:$16 sps:$4 sm:$0xff]  }
 0x2c0   : > { %5753 = vmatpush1.bf16.msra.mxu0 %v7924_v23  ;;  %v7980_v23 = vld [vmem:[%s8794_s3 + $0x16c] ss:$16 sps:$4 sm:$0xff]  }
 0x2c1   : > { %5794 = vmatpush1.bf16.msra.mxu1 %v7927_v24  ;;  %5754 = vmatprep.subr.bf16.mxu0 %v7932_v26  ;;  %v7983_v24 = vld [vmem:[%s8794_s3 + $0x36c] ss:$16 sps:$4 sm:$0xff]   ;;  %v7978_v26 = vld [vmem:[%s8794_s3 + $0x168] ss:$16 sps:$4 sm:$0xff]  }
 0x2c2   : > { %5795 = vmatprep.subr.bf16.mxu1 %v7935_v28  ;;  %v7981_v28 = vld [vmem:[%s8794_s3 + $0x368] ss:$16 sps:$4 sm:$0xff]  }
 0x2c4   : > { %5755 = vmatpush1.bf16.msra.mxu0 %v7930_v33  ;;  %v7986_v33 = vld [vmem:[%s8794_s3 + $0x18c] ss:$16 sps:$4 sm:$0xff]  }
 0x2c5   : > { %5796 = vmatpush1.bf16.msra.mxu1 %v7933_v54  ;;  %5756 = vmatprep.subr.bf16.mxu0 %v7938_v56  ;;  %v7989_v54 = vld [vmem:[%s8794_s3 + $0x38c] ss:$16 sps:$4 sm:$0xff]   ;;  %v7984_v56 = vld [vmem:[%s8794_s3 + $0x188] ss:$16 sps:$4 sm:$0xff]  }
 0x2c6   : > { %5797 = vmatprep.subr.bf16.mxu1 %v7941_v34  ;;  %v7987_v34 = vld [vmem:[%s8794_s3 + $0x388] ss:$16 sps:$4 sm:$0xff]  }
 0x2c8   : > { %5757 = vmatpush1.bf16.msra.mxu0 %v7936_v38  ;;  %v7992_v38 = vld [vmem:[%s8794_s3 + $0x1ac] ss:$16 sps:$4 sm:$0xff]  }
 0x2c9   : > { %5798 = vmatpush1.bf16.msra.mxu1 %v7939_v39  ;;  %5758 = vmatprep.subr.bf16.mxu0 %v7944_v40  ;;  %v7995_v39 = vld [vmem:[%s8794_s3 + $0x3ac] ss:$16 sps:$4 sm:$0xff]   ;;  %v7990_v40 = vld [vmem:[%s8794_s3 + $0x1a8] ss:$16 sps:$4 sm:$0xff]  }
 0x2ca   : > { %5799 = vmatprep.subr.bf16.mxu1 %v7947_v41  ;;  %v5454_v48 = vpop.f32.mrb[16].mxu0  ;;  %v7993_v41 = vld [vmem:[%s8794_s3 + $0x3a8] ss:$16 sps:$4 sm:$0xff]  }
 0x2cb   : > { %v5495_v50 = vpop.f32.mrb[16].mxu1  ;;  %v5455_v52 = vadd.f32 %v5454_v48, %v9258_v22  ;;  %v5456_v51 = vpop.f32.mrb[17].mxu0  ;;  %v7956_v22 = vld [vmem:[%s8794_s3 + $0xec] ss:$16 sps:$4 sm:$0xff]  }
 0x2cc   : > { %v5497_v1 = vpop.f32.mrb[17].mxu1  ;;  %v5457_v2 = vadd.f32 %v5456_v51, %v9260_v60  ;;  %v5458_v55 = vpop.f32.mrb[18].mxu0  ;;  %5759 = vmatpush1.bf16.msra.mxu0 %v7942_v42  ;;  %v7959_v60 = vld [vmem:[%s8794_s3 + $0x2ec] ss:$16 sps:$4 sm:$0xff]   ;;  %v8005_v51 = vld [vmem:[%s8794_s3 + $0x3e8] ss:$16 sps:$4 sm:$0xff]  }
 0x2cd   : > { %v5499_v57 = vpop.f32.mrb[18].mxu1  ;;  %5800 = vmatpush1.bf16.msra.mxu1 %v7945_v44  ;;  %v9524_v31 = vadd.f32 %v5495_v50, %v5455_v52  ;;  %v5459_v35 = vpop.f32.mrb[19].mxu0  ;;  %5760 = vmatprep.subr.bf16.mxu0 %v7950_v46  ;;  %v7998_v42 = vld [vmem:[%s8794_s3 + $0x1cc] ss:$16 sps:$4 sm:$0xff]   ;;  %v7996_v46 = vld [vmem:[%s8794_s3 + $0x1c8] ss:$16 sps:$4 sm:$0xff]  }
 0x2ce   : > { %v5500_v25 = vpop.f32.mrb[19].mxu1  ;;  %5801 = vmatprep.subr.bf16.mxu1 %v7953_v47  ;;  %v9528_v61 = vadd.f32 %v5497_v1, %v5457_v2  ;;  %v8001_v44 = vld [vmem:[%s8794_s3 + $0x3cc] ss:$16 sps:$4 sm:$0xff]   ;;  %v7999_v47 = vld [vmem:[%s8794_s3 + $0x3c8] ss:$16 sps:$4 sm:$0xff]  }
 0x2cf   : > { %v8004_v48 = vld [vmem:[%s8794_s3 + $0x1ec] ss:$16 sps:$4 sm:$0xff]   ;;  %v8002_v52 = vld [vmem:[%s8794_s3 + $0x1e8] ss:$16 sps:$4 sm:$0xff]  }
 0x2d0   : > { %5761 = vmatpush1.bf16.msra.mxu0 %v7948_v58  ;;  %v8007_v50 = vld [vmem:[%s8794_s3 + $0x3ec] ss:$16 sps:$4 sm:$0xff]   ;;  %v8008_v55 = vld [vmem:[%s8794_s3 + $0x408] ss:$16 sps:$4 sm:$0xff]  }
 0x2d1   : > { %5802 = vmatpush1.bf16.msra.mxu1 %v7951_v59  ;;  %5762 = vmatprep.subr.bf16.mxu0 %v7956_v22  ;;  %v8010_v1 = vld [vmem:[%s8794_s3 + $0x40c] ss:$16 sps:$4 sm:$0xff]   ;;  %v8011_v57 = vld [vmem:[%s8794_s3 + $0x608] ss:$16 sps:$4 sm:$0xff]  }
 0x2d2   : > { %5803 = vmatprep.subr.bf16.mxu1 %v7959_v60  ;;  %v8013_v2 = vld [vmem:[%s8794_s3 + $0x60c] ss:$16 sps:$4 sm:$0xff]   ;;  %v8014_v35 = vld [vmem:[%s8794_s3 + $0x428] ss:$16 sps:$4 sm:$0xff]  }
 0x2d3   : > { %v8016_v58 = vld [vmem:[%s8794_s3 + $0x42c] ss:$16 sps:$4 sm:$0xff]   ;;  %v8017_v25 = vld [vmem:[%s8794_s3 + $0x628] ss:$16 sps:$4 sm:$0xff]  }
 0x2d4   : > { %5763 = vmatpush1.bf16.msra.mxu0 %v7954_v63  ;;  %v8019_v59 = vld [vmem:[%s8794_s3 + $0x62c] ss:$16 sps:$4 sm:$0xff]  }
 0x2d5   : > { %5804 = vmatpush1.bf16.msra.mxu1 %v7957_v0  ;;  %5764 = vmatprep.subr.bf16.mxu0 %v7962_v4  ;;  %v8022_v22 = vld [vmem:[%s8794_s3 + $0x44c] ss:$16 sps:$4 sm:$0xff]   ;;  %v8026_v4 = vld [vmem:[%s8794_s3 + $0x468] ss:$16 sps:$4 sm:$0xff]  }
 0x2d6   : > { %5805 = vmatprep.subr.bf16.mxu1 %v7965_v5  ;;  %v8025_v60 = vld [vmem:[%s8794_s3 + $0x64c] ss:$16 sps:$4 sm:$0xff]  }
 0x2d7   : > { %v8028_v63 = vld [vmem:[%s8794_s3 + $0x46c] ss:$16 sps:$4 sm:$0xff]  }
 0x2d8   : > { %5765 = vmatpush1.bf16.msra.mxu0 %v7960_v6  ;;  %v8031_v0 = vld [vmem:[%s8794_s3 + $0x66c] ss:$16 sps:$4 sm:$0xff]   ;;  %v8032_v6 = vld [vmem:[%s8794_s3 + $0x488] ss:$16 sps:$4 sm:$0xff]  }
 0x2d9   : > { %5806 = vmatpush1.bf16.msra.mxu1 %v7963_v7  ;;  %5766 = vmatprep.subr.bf16.mxu0 %v7968_v11  ;;  %v8037_v5 = vld [vmem:[%s8794_s3 + $0x68c] ss:$16 sps:$4 sm:$0xff]   ;;  %v8035_v7 = vld [vmem:[%s8794_s3 + $0x688] ss:$16 sps:$4 sm:$0xff]  }
 0x2da   : > { %5807 = vmatprep.subr.bf16.mxu1 %v7971_v45  ;;  %v8040_v11 = vld [vmem:[%s8794_s3 + $0x4ac] ss:$16 sps:$4 sm:$0xff]  }
 0x2db   : > { %v8043_v45 = vld [vmem:[%s8794_s3 + $0x6ac] ss:$16 sps:$4 sm:$0xff]  }
 0x2dc   : > { %5767 = vmatpush1.bf16.msra.mxu0 %v7966_v27  ;;  %v8038_v27 = vld [vmem:[%s8794_s3 + $0x4a8] ss:$16 sps:$4 sm:$0xff]  }
 0x2dd   : > { %5808 = vmatpush1.bf16.msra.mxu1 %v7969_v29  ;;  %5768 = vmatprep.subr.bf16.mxu0 %v7974_v14  ;;  %v8041_v29 = vld [vmem:[%s8794_s3 + $0x6a8] ss:$16 sps:$4 sm:$0xff]   ;;  %v8046_v14 = vld [vmem:[%s8794_s3 + $0x4cc] ss:$16 sps:$4 sm:$0xff]  }
 0x2de   : > { %5809 = vmatprep.subr.bf16.mxu1 %v7977_v15  ;;  %v8049_v15 = vld [vmem:[%s8794_s3 + $0x6cc] ss:$16 sps:$4 sm:$0xff]  }
 0x2e0   : > { %5769 = vmatpush1.bf16.msra.mxu0 %v7972_v20 }
 0x2e1   : > { %5810 = vmatpush1.bf16.msra.mxu1 %v7975_v21  ;;  %5770 = vmatprep.subr.bf16.mxu0 %v7980_v23 }
 0x2e2   : > { %5811 = vmatprep.subr.bf16.mxu1 %v7983_v24 }
 0x2e4   : > { %5771 = vmatpush1.bf16.msra.mxu0 %v7978_v26 }
 0x2e5   : > { %5812 = vmatpush1.bf16.msra.mxu1 %v7981_v28  ;;  %5772 = vmatprep.subr.bf16.mxu0 %v7986_v33 }
 0x2e6   : > { %5813 = vmatprep.subr.bf16.mxu1 %v7989_v54 }
 0x2e8   : > { %5773 = vmatpush1.bf16.msra.mxu0 %v7984_v56  ;;  %v8044_v56 = vld [vmem:[%s8794_s3 + $0x4c8] ss:$16 sps:$4 sm:$0xff]  }
 0x2e9   : > { %5814 = vmatpush1.bf16.msra.mxu1 %v7987_v34  ;;  %5774 = vmatprep.subr.bf16.mxu0 %v7992_v38  ;;  %v8047_v34 = vld [vmem:[%s8794_s3 + $0x6c8] ss:$16 sps:$4 sm:$0xff]  }
 0x2ea   : > { %5815 = vmatprep.subr.bf16.mxu1 %v7995_v39 }
 0x2ec   : > { %5775 = vmatpush1.bf16.msra.mxu0 %v7990_v40 }
 0x2ed   : > { %5816 = vmatpush1.bf16.msra.mxu1 %v7993_v41  ;;  %5776 = vmatprep.subr.bf16.mxu0 %v7998_v42  ;;  %v8050_v42 = vld [vmem:[%s8794_s3 + $0x4e8] ss:$16 sps:$4 sm:$0xff]  }
 0x2ee   : > { %5817 = vmatprep.subr.bf16.mxu1 %v8001_v44  ;;  %v8053_v44 = vld [vmem:[%s8794_s3 + $0x6e8] ss:$16 sps:$4 sm:$0xff]  }
 0x2f0   : > { %5777 = vmatpush1.bf16.msra.mxu0 %v7996_v46  ;;  %v8058_v46 = vld [vmem:[%s8794_s3 + $0x50c] ss:$16 sps:$4 sm:$0xff]  }
 0x2f1   : > { %5818 = vmatpush1.bf16.msra.mxu1 %v7999_v47  ;;  %5778 = vmatprep.subr.bf16.mxu0 %v8004_v48  ;;  %v8061_v47 = vld [vmem:[%s8794_s3 + $0x70c] ss:$16 sps:$4 sm:$0xff]   ;;  %v8056_v48 = vld [vmem:[%s8794_s3 + $0x508] ss:$16 sps:$4 sm:$0xff]  }
 0x2f2   : > { %5819 = vmatprep.subr.bf16.mxu1 %v8007_v50  ;;  %v8059_v50 = vld [vmem:[%s8794_s3 + $0x708] ss:$16 sps:$4 sm:$0xff]  }
 0x2f4   : > { %5779 = vmatpush1.bf16.msra.mxu0 %v8002_v52  ;;  %v8064_v52 = vld [vmem:[%s8794_s3 + $0x52c] ss:$16 sps:$4 sm:$0xff]  }
 0x2f5   : > { %5820 = vmatpush1.bf16.msra.mxu1 %v8005_v51  ;;  %5830 = vmatprep.subr.bf16.mxu0 %v8010_v1  ;;  %v8067_v51 = vld [vmem:[%s8794_s3 + $0x72c] ss:$16 sps:$4 sm:$0xff]   ;;  %v8062_v1 = vld [vmem:[%s8794_s3 + $0x528] ss:$16 sps:$4 sm:$0xff]  }
 0x2f6   : > { %5871 = vmatprep.subr.bf16.mxu1 %v8013_v2  ;;  %v8065_v2 = vld [vmem:[%s8794_s3 + $0x728] ss:$16 sps:$4 sm:$0xff]  }
 0x2f7   : > { %5781 = vmatmul.mubr.bf16.vlgmr.msra.gmra.mrb[32].mxu0 %v9212_v12  ;;  %v8020_v12 = vld [vmem:[%s8794_s3 + $0x448] ss:$16 sps:$4 sm:$0xff]  }
 0x2f8   : > { %5822 = vmatmul.mubr.bf16.vlgmr.msra.gmra.mrb[32].mxu1 %v9216_v13  ;;  %5831 = vmatpush1.bf16.msra.mxu0 %v8008_v55  ;;  %v8023_v13 = vld [vmem:[%s8794_s3 + $0x648] ss:$16 sps:$4 sm:$0xff]   ;;  %v8070_v55 = vld [vmem:[%s8794_s3 + $0x54c] ss:$16 sps:$4 sm:$0xff]  }
 0x2f9   : > { %5872 = vmatpush1.bf16.msra.mxu1 %v8011_v57  ;;  %5832 = vmatprep.subr.bf16.mxu0 %v8016_v58  ;;  %v8073_v57 = vld [vmem:[%s8794_s3 + $0x74c] ss:$16 sps:$4 sm:$0xff]   ;;  %v8068_v58 = vld [vmem:[%s8794_s3 + $0x548] ss:$16 sps:$4 sm:$0xff]  }
 0x2fa   : > { %5873 = vmatprep.subr.bf16.mxu1 %v8019_v59  ;;  %5862 = vmatprep.mubr.bf16.mxu0 %v9220_v18  ;;  %v8029_v18 = vld [vmem:[%s8794_s3 + $0x668] ss:$16 sps:$4 sm:$0xff]  }
 0x2fb   : > { %5903 = vmatprep.mubr.bf16.mxu1 %v9222_v19  ;;  %v8034_v19 = vld [vmem:[%s8794_s3 + $0x48c] ss:$16 sps:$4 sm:$0xff]   ;;  %v8071_v59 = vld [vmem:[%s8794_s3 + $0x748] ss:$16 sps:$4 sm:$0xff]  }
 0x2fc   : > { %5833 = vmatpush1.bf16.msra.mxu0 %v8014_v35  ;;  %v8076_v35 = vld [vmem:[%s8794_s3 + $0x56c] ss:$16 sps:$4 sm:$0xff]  }
 0x2fd   : > { %5874 = vmatpush1.bf16.msra.mxu1 %v8017_v25  ;;  %5834 = vmatprep.subr.bf16.mxu0 %v8022_v22  ;;  %v8079_v25 = vld [vmem:[%s8794_s3 + $0x76c] ss:$16 sps:$4 sm:$0xff]   ;;  %v8074_v22 = vld [vmem:[%s8794_s3 + $0x568] ss:$16 sps:$4 sm:$0xff]  }
 0x2fe   : > { %5875 = vmatprep.subr.bf16.mxu1 %v8025_v60  ;;  %v8077_v60 = vld [vmem:[%s8794_s3 + $0x768] ss:$16 sps:$4 sm:$0xff]  }
 0x300   : > { %5835 = vmatpush1.bf16.msra.mxu0 %v8020_v12  ;;  %v8082_v12 = vld [vmem:[%s8794_s3 + $0x58c] ss:$16 sps:$4 sm:$0xff]  }
 0x301   : > { %5876 = vmatpush1.bf16.msra.mxu1 %v8023_v13  ;;  %5836 = vmatprep.subr.bf16.mxu0 %v8028_v63  ;;  %v8085_v13 = vld [vmem:[%s8794_s3 + $0x78c] ss:$16 sps:$4 sm:$0xff]   ;;  %v8080_v63 = vld [vmem:[%s8794_s3 + $0x588] ss:$16 sps:$4 sm:$0xff]  }
 0x302   : > { %5877 = vmatprep.subr.bf16.mxu1 %v8031_v0  ;;  %v8083_v0 = vld [vmem:[%s8794_s3 + $0x788] ss:$16 sps:$4 sm:$0xff]  }
 0x304   : > { %5837 = vmatpush1.bf16.msra.mxu0 %v8026_v4  ;;  %v8088_v4 = vld [vmem:[%s8794_s3 + $0x5ac] ss:$16 sps:$4 sm:$0xff]  }
 0x305   : > { %5878 = vmatpush1.bf16.msra.mxu1 %v8029_v18  ;;  %5838 = vmatprep.subr.bf16.mxu0 %v8034_v19  ;;  %v8091_v18 = vld [vmem:[%s8794_s3 + $0x7ac] ss:$16 sps:$4 sm:$0xff]   ;;  %v8086_v19 = vld [vmem:[%s8794_s3 + $0x5a8] ss:$16 sps:$4 sm:$0xff]  }
 0x306   : > { %5879 = vmatprep.subr.bf16.mxu1 %v8037_v5  ;;  %v8089_v5 = vld [vmem:[%s8794_s3 + $0x7a8] ss:$16 sps:$4 sm:$0xff]  }
 0x308   : > { %5839 = vmatpush1.bf16.msra.mxu0 %v8032_v6  ;;  %v8094_v6 = vld [vmem:[%s8794_s3 + $0x5cc] ss:$16 sps:$4 sm:$0xff]  }
 0x309   : > { %5880 = vmatpush1.bf16.msra.mxu1 %v8035_v7  ;;  %5840 = vmatprep.subr.bf16.mxu0 %v8040_v11  ;;  %v8097_v7 = vld [vmem:[%s8794_s3 + $0x7cc] ss:$16 sps:$4 sm:$0xff]   ;;  %v8092_v11 = vld [vmem:[%s8794_s3 + $0x5c8] ss:$16 sps:$4 sm:$0xff]  }
 0x30a   : > { %5881 = vmatprep.subr.bf16.mxu1 %v8043_v45  ;;  %v5536_v20 = vpop.f32.mrb[20].mxu0  ;;  %v8095_v45 = vld [vmem:[%s8794_s3 + $0x7c8] ss:$16 sps:$4 sm:$0xff]  }
 0x30b   : > { %v5577_v21 = vpop.f32.mrb[20].mxu1  ;;  %v5537_v23 = vadd.f32 %v5536_v20, %v9524_v31  ;;  %v5538_v24 = vpop.f32.mrb[21].mxu0  ;;  %v8052_v31 = vld [vmem:[%s8794_s3 + $0x4ec] ss:$16 sps:$4 sm:$0xff]  }
 0x30c   : > { %v5579_v26 = vpop.f32.mrb[21].mxu1  ;;  %v5539_v28 = vadd.f32 %v5538_v24, %v9528_v61  ;;  %v5540_v33 = vpop.f32.mrb[22].mxu0  ;;  %5841 = vmatpush1.bf16.msra.mxu0 %v8038_v27  ;;  %v8055_v61 = vld [vmem:[%s8794_s3 + $0x6ec] ss:$16 sps:$4 sm:$0xff]   ;;  %v8107_v24 = vld [vmem:[%s8794_s3 + $0xa08] ss:$16 sps:$4 sm:$0xff]  }
 0x30d   : > { %v5581_v54 = vpop.f32.mrb[22].mxu1  ;;  %5882 = vmatpush1.bf16.msra.mxu1 %v8041_v29  ;;  %v9598_v38 = vadd.f32 %v5577_v21, %v5537_v23  ;;  %v5541_v39 = vpop.f32.mrb[23].mxu0  ;;  %5842 = vmatprep.subr.bf16.mxu0 %v8046_v14  ;;  %v8100_v27 = vld [vmem:[%s8794_s3 + $0x5ec] ss:$16 sps:$4 sm:$0xff]   ;;  %v8098_v14 = vld [vmem:[%s8794_s3 + $0x5e8] ss:$16 sps:$4 sm:$0xff]  }
 0x30e   : > { %v5582_v40 = vpop.f32.mrb[23].mxu1  ;;  %5883 = vmatprep.subr.bf16.mxu1 %v8049_v15  ;;  %v9602_v41 = vadd.f32 %v5579_v26, %v5539_v28  ;;  %v8103_v29 = vld [vmem:[%s8794_s3 + $0x7ec] ss:$16 sps:$4 sm:$0xff]   ;;  %v8101_v15 = vld [vmem:[%s8794_s3 + $0x7e8] ss:$16 sps:$4 sm:$0xff]  }
 0x30f   : > { %v8106_v20 = vld [vmem:[%s8794_s3 + $0x80c] ss:$16 sps:$4 sm:$0xff]   ;;  %v8104_v23 = vld [vmem:[%s8794_s3 + $0x808] ss:$16 sps:$4 sm:$0xff]  }
 0x310   : > { %5843 = vmatpush1.bf16.msra.mxu0 %v8044_v56  ;;  %v8109_v21 = vld [vmem:[%s8794_s3 + $0xa0c] ss:$16 sps:$4 sm:$0xff]   ;;  %v8110_v33 = vld [vmem:[%s8794_s3 + $0x828] ss:$16 sps:$4 sm:$0xff]  }
 0x311   : > { %5884 = vmatpush1.bf16.msra.mxu1 %v8047_v34  ;;  %5844 = vmatprep.subr.bf16.mxu0 %v8052_v31  ;;  %v8112_v26 = vld [vmem:[%s8794_s3 + $0x82c] ss:$16 sps:$4 sm:$0xff]   ;;  %v8113_v54 = vld [vmem:[%s8794_s3 + $0xa28] ss:$16 sps:$4 sm:$0xff]  }
 0x312   : > { %5885 = vmatprep.subr.bf16.mxu1 %v8055_v61  ;;  %v8115_v28 = vld [vmem:[%s8794_s3 + $0xa2c] ss:$16 sps:$4 sm:$0xff]   ;;  %v8122_v31 = vld [vmem:[%s8794_s3 + $0x868] ss:$16 sps:$4 sm:$0xff]  }
 0x313   : > { %v8118_v56 = vld [vmem:[%s8794_s3 + $0x84c] ss:$16 sps:$4 sm:$0xff]  }
 0x314   : > { %5845 = vmatpush1.bf16.msra.mxu0 %v8050_v42  ;;  %v8121_v34 = vld [vmem:[%s8794_s3 + $0xa4c] ss:$16 sps:$4 sm:$0xff]   ;;  %v8128_v42 = vld [vmem:[%s8794_s3 + $0x888] ss:$16 sps:$4 sm:$0xff]  }
 0x315   : > { %5886 = vmatpush1.bf16.msra.mxu1 %v8053_v44  ;;  %5846 = vmatprep.subr.bf16.mxu0 %v8058_v46  ;;  %v8124_v39 = vld [vmem:[%s8794_s3 + $0x86c] ss:$16 sps:$4 sm:$0xff]   ;;  %v8131_v44 = vld [vmem:[%s8794_s3 + $0xa88] ss:$16 sps:$4 sm:$0xff]  }
 0x316   : > { %5887 = vmatprep.subr.bf16.mxu1 %v8061_v47  ;;  %v8127_v40 = vld [vmem:[%s8794_s3 + $0xa6c] ss:$16 sps:$4 sm:$0xff]  }
 0x317   : > { %v8133_v61 = vld [vmem:[%s8794_s3 + $0xa8c] ss:$16 sps:$4 sm:$0xff]  }
 0x318   : > { %5847 = vmatpush1.bf16.msra.mxu0 %v8056_v48  ;;  %v8136_v46 = vld [vmem:[%s8794_s3 + $0x8ac] ss:$16 sps:$4 sm:$0xff]   ;;  %v8134_v48 = vld [vmem:[%s8794_s3 + $0x8a8] ss:$16 sps:$4 sm:$0xff]  }
 0x319   : > { %5888 = vmatpush1.bf16.msra.mxu1 %v8059_v50  ;;  %5848 = vmatprep.subr.bf16.mxu0 %v8064_v52  ;;  %v8139_v47 = vld [vmem:[%s8794_s3 + $0xaac] ss:$16 sps:$4 sm:$0xff]   ;;  %v8137_v50 = vld [vmem:[%s8794_s3 + $0xaa8] ss:$16 sps:$4 sm:$0xff]  }
 0x31a   : > { %5889 = vmatprep.subr.bf16.mxu1 %v8067_v51  ;;  %v8142_v52 = vld [vmem:[%s8794_s3 + $0x8cc] ss:$16 sps:$4 sm:$0xff]  }
 0x31b   : > { %v8145_v51 = vld [vmem:[%s8794_s3 + $0xacc] ss:$16 sps:$4 sm:$0xff]  }
 0x31c   : > { %5849 = vmatpush1.bf16.msra.mxu0 %v8062_v1 }
 0x31d   : > { %5890 = vmatpush1.bf16.msra.mxu1 %v8065_v2  ;;  %5850 = vmatprep.subr.bf16.mxu0 %v8070_v55 }
 0x31e   : > { %5891 = vmatprep.subr.bf16.mxu1 %v8073_v57 }
 0x320   : > { %5851 = vmatpush1.bf16.msra.mxu0 %v8068_v58 }
 0x321   : > { %5892 = vmatpush1.bf16.msra.mxu1 %v8071_v59  ;;  %5852 = vmatprep.subr.bf16.mxu0 %v8076_v35 }
 0x322   : > { %5893 = vmatprep.subr.bf16.mxu1 %v8079_v25 }
 0x324   : > { %5853 = vmatpush1.bf16.msra.mxu0 %v8074_v22  ;;  %v8140_v22 = vld [vmem:[%s8794_s3 + $0x8c8] ss:$16 sps:$4 sm:$0xff]  }
 0x325   : > { %5894 = vmatpush1.bf16.msra.mxu1 %v8077_v60  ;;  %5854 = vmatprep.subr.bf16.mxu0 %v8082_v12  ;;  %v8143_v60 = vld [vmem:[%s8794_s3 + $0xac8] ss:$16 sps:$4 sm:$0xff]  }
 0x326   : > { %5895 = vmatprep.subr.bf16.mxu1 %v8085_v13 }
 0x328   : > { %5855 = vmatpush1.bf16.msra.mxu0 %v8080_v63 }
 0x329   : > { %5896 = vmatpush1.bf16.msra.mxu1 %v8083_v0  ;;  %5856 = vmatprep.subr.bf16.mxu0 %v8088_v4  ;;  %v8146_v4 = vld [vmem:[%s8794_s3 + $0x8e8] ss:$16 sps:$4 sm:$0xff]  }
 0x32a   : > { %5897 = vmatprep.subr.bf16.mxu1 %v8091_v18  ;;  %v8149_v18 = vld [vmem:[%s8794_s3 + $0xae8] ss:$16 sps:$4 sm:$0xff]  }
 0x32c   : > { %5857 = vmatpush1.bf16.msra.mxu0 %v8086_v19  ;;  %v8154_v19 = vld [vmem:[%s8794_s3 + $0x90c] ss:$16 sps:$4 sm:$0xff]  }
 0x32d   : > { %5898 = vmatpush1.bf16.msra.mxu1 %v8089_v5  ;;  %5858 = vmatprep.subr.bf16.mxu0 %v8094_v6  ;;  %v8157_v5 = vld [vmem:[%s8794_s3 + $0xb0c] ss:$16 sps:$4 sm:$0xff]   ;;  %v8152_v6 = vld [vmem:[%s8794_s3 + $0x908] ss:$16 sps:$4 sm:$0xff]  }
 0x32e   : > { %5899 = vmatprep.subr.bf16.mxu1 %v8097_v7  ;;  %v8155_v7 = vld [vmem:[%s8794_s3 + $0xb08] ss:$16 sps:$4 sm:$0xff]  }
 0x330   : > { %5859 = vmatpush1.bf16.msra.mxu0 %v8092_v11  ;;  %v8160_v11 = vld [vmem:[%s8794_s3 + $0x92c] ss:$16 sps:$4 sm:$0xff]  }
 0x331   : > { %5900 = vmatpush1.bf16.msra.mxu1 %v8095_v45  ;;  %5860 = vmatprep.subr.bf16.mxu0 %v8100_v27  ;;  %v8163_v45 = vld [vmem:[%s8794_s3 + $0xb2c] ss:$16 sps:$4 sm:$0xff]   ;;  %v8158_v27 = vld [vmem:[%s8794_s3 + $0x928] ss:$16 sps:$4 sm:$0xff]  }
 0x332   : > { %5901 = vmatprep.subr.bf16.mxu1 %v8103_v29  ;;  %v8161_v29 = vld [vmem:[%s8794_s3 + $0xb28] ss:$16 sps:$4 sm:$0xff]  }
 0x334   : > { %5861 = vmatpush1.bf16.msra.mxu0 %v8098_v14  ;;  %v8166_v14 = vld [vmem:[%s8794_s3 + $0x94c] ss:$16 sps:$4 sm:$0xff]  }
 0x335   : > { %5902 = vmatpush1.bf16.msra.mxu1 %v8101_v15  ;;  %5912 = vmatprep.subr.bf16.mxu0 %v8106_v20  ;;  %v8169_v15 = vld [vmem:[%s8794_s3 + $0xb4c] ss:$16 sps:$4 sm:$0xff]   ;;  %v8164_v20 = vld [vmem:[%s8794_s3 + $0x948] ss:$16 sps:$4 sm:$0xff]  }
 0x336   : > { %5953 = vmatprep.subr.bf16.mxu1 %v8109_v21  ;;  %v8167_v21 = vld [vmem:[%s8794_s3 + $0xb48] ss:$16 sps:$4 sm:$0xff]  }
 0x337   : > { %5863 = vmatmul.mubr.bf16.vlgmr.msra.gmra.mrb[36].mxu0 %v9308_v16  ;;  %v8116_v16 = vld [vmem:[%s8794_s3 + $0x848] ss:$16 sps:$4 sm:$0xff]  }
 0x338   : > { %5904 = vmatmul.mubr.bf16.vlgmr.msra.gmra.mrb[36].mxu1 %v9312_v3  ;;  %5913 = vmatpush1.bf16.msra.mxu0 %v8104_v23  ;;  %v8119_v3 = vld [vmem:[%s8794_s3 + $0xa48] ss:$16 sps:$4 sm:$0xff]   ;;  %v8172_v23 = vld [vmem:[%s8794_s3 + $0x96c] ss:$16 sps:$4 sm:$0xff]  }
 0x339   : > { %5954 = vmatpush1.bf16.msra.mxu1 %v8107_v24  ;;  %5914 = vmatprep.subr.bf16.mxu0 %v8112_v26  ;;  %v8175_v24 = vld [vmem:[%s8794_s3 + $0xb6c] ss:$16 sps:$4 sm:$0xff]   ;;  %v8170_v26 = vld [vmem:[%s8794_s3 + $0x968] ss:$16 sps:$4 sm:$0xff]  }
 0x33a   : > { %5955 = vmatprep.subr.bf16.mxu1 %v8115_v28  ;;  %5944 = vmatprep.mubr.bf16.mxu0 %v9316_v17  ;;  %v8125_v17 = vld [vmem:[%s8794_s3 + $0xa68] ss:$16 sps:$4 sm:$0xff]  }
 0x33b   : > { %5985 = vmatprep.mubr.bf16.mxu1 %v9318_v53  ;;  %v8130_v53 = vld [vmem:[%s8794_s3 + $0x88c] ss:$16 sps:$4 sm:$0xff]   ;;  %v8173_v28 = vld [vmem:[%s8794_s3 + $0xb68] ss:$16 sps:$4 sm:$0xff]  }
 0x33c   : > { %5915 = vmatpush1.bf16.msra.mxu0 %v8110_v33  ;;  %v8178_v33 = vld [vmem:[%s8794_s3 + $0x98c] ss:$16 sps:$4 sm:$0xff]  }
 0x33d   : > { %5956 = vmatpush1.bf16.msra.mxu1 %v8113_v54  ;;  %5916 = vmatprep.subr.bf16.mxu0 %v8118_v56  ;;  %v8181_v54 = vld [vmem:[%s8794_s3 + $0xb8c] ss:$16 sps:$4 sm:$0xff]   ;;  %v8176_v56 = vld [vmem:[%s8794_s3 + $0x988] ss:$16 sps:$4 sm:$0xff]  }
 0x33e   : > { %5957 = vmatprep.subr.bf16.mxu1 %v8121_v34  ;;  %v8179_v34 = vld [vmem:[%s8794_s3 + $0xb88] ss:$16 sps:$4 sm:$0xff]  }
 0x340   : > { %5917 = vmatpush1.bf16.msra.mxu0 %v8116_v16  ;;  %v8184_v16 = vld [vmem:[%s8794_s3 + $0x9ac] ss:$16 sps:$4 sm:$0xff]  }
 0x341   : > { %5958 = vmatpush1.bf16.msra.mxu1 %v8119_v3  ;;  %5918 = vmatprep.subr.bf16.mxu0 %v8124_v39  ;;  %v8187_v3 = vld [vmem:[%s8794_s3 + $0xbac] ss:$16 sps:$4 sm:$0xff]   ;;  %v8182_v39 = vld [vmem:[%s8794_s3 + $0x9a8] ss:$16 sps:$4 sm:$0xff]  }
 0x342   : > { %5959 = vmatprep.subr.bf16.mxu1 %v8127_v40  ;;  %v8185_v40 = vld [vmem:[%s8794_s3 + $0xba8] ss:$16 sps:$4 sm:$0xff]  }
 0x344   : > { %5919 = vmatpush1.bf16.msra.mxu0 %v8122_v31  ;;  %v8190_v31 = vld [vmem:[%s8794_s3 + $0x9cc] ss:$16 sps:$4 sm:$0xff]  }
 0x345   : > { %5960 = vmatpush1.bf16.msra.mxu1 %v8125_v17  ;;  %5920 = vmatprep.subr.bf16.mxu0 %v8130_v53  ;;  %v8193_v17 = vld [vmem:[%s8794_s3 + $0xbcc] ss:$16 sps:$4 sm:$0xff]   ;;  %v8188_v53 = vld [vmem:[%s8794_s3 + $0x9c8] ss:$16 sps:$4 sm:$0xff]  }
 0x346   : > { %5961 = vmatprep.subr.bf16.mxu1 %v8133_v61  ;;  %v8191_v61 = vld [vmem:[%s8794_s3 + $0xbc8] ss:$16 sps:$4 sm:$0xff]  }
 0x348   : > { %5921 = vmatpush1.bf16.msra.mxu0 %v8128_v42  ;;  %v8196_v42 = vld [vmem:[%s8794_s3 + $0x9ec] ss:$16 sps:$4 sm:$0xff]  }
 0x349   : > { %5962 = vmatpush1.bf16.msra.mxu1 %v8131_v44  ;;  %5922 = vmatprep.subr.bf16.mxu0 %v8136_v46  ;;  %v8199_v44 = vld [vmem:[%s8794_s3 + $0xbec] ss:$16 sps:$4 sm:$0xff]   ;;  %v8194_v46 = vld [vmem:[%s8794_s3 + $0x9e8] ss:$16 sps:$4 sm:$0xff]  }
 0x34a   : > { %5963 = vmatprep.subr.bf16.mxu1 %v8139_v47  ;;  %v5618_v1 = vpop.f32.mrb[24].mxu0  ;;  %v8197_v47 = vld [vmem:[%s8794_s3 + $0xbe8] ss:$16 sps:$4 sm:$0xff]  }
 0x34b   : > { %v5659_v2 = vpop.f32.mrb[24].mxu1  ;;  %v5619_v55 = vadd.f32 %v5618_v1, %v9598_v38  ;;  %v5620_v57 = vpop.f32.mrb[25].mxu0  ;;  %v8148_v38 = vld [vmem:[%s8794_s3 + $0x8ec] ss:$16 sps:$4 sm:$0xff]  }
 0x34c   : > { %v5661_v58 = vpop.f32.mrb[25].mxu1  ;;  %v5621_v59 = vadd.f32 %v5620_v57, %v9602_v41  ;;  %v5622_v35 = vpop.f32.mrb[26].mxu0  ;;  %5923 = vmatpush1.bf16.msra.mxu0 %v8134_v48  ;;  %v8151_v41 = vld [vmem:[%s8794_s3 + $0xaec] ss:$16 sps:$4 sm:$0xff]   ;;  %v8209_v57 = vld [vmem:[%s8794_s3 + $0xe28] ss:$16 sps:$4 sm:$0xff]  }
 0x34d   : > { %v5663_v25 = vpop.f32.mrb[26].mxu1  ;;  %5964 = vmatpush1.bf16.msra.mxu1 %v8137_v50  ;;  %v9672_v12 = vadd.f32 %v5659_v2, %v5619_v55  ;;  %v5623_v13 = vpop.f32.mrb[27].mxu0  ;;  %5924 = vmatprep.subr.bf16.mxu0 %v8142_v52  ;;  %v8202_v48 = vld [vmem:[%s8794_s3 + $0xc0c] ss:$16 sps:$4 sm:$0xff]   ;;  %v8200_v52 = vld [vmem:[%s8794_s3 + $0xc08] ss:$16 sps:$4 sm:$0xff]  }
 0x34e   : > { %v5664_v63 = vpop.f32.mrb[27].mxu1  ;;  %5965 = vmatprep.subr.bf16.mxu1 %v8145_v51  ;;  %v9676_v0 = vadd.f32 %v5661_v58, %v5621_v59  ;;  %v8205_v50 = vld [vmem:[%s8794_s3 + $0xe0c] ss:$16 sps:$4 sm:$0xff]   ;;  %v8203_v51 = vld [vmem:[%s8794_s3 + $0xe08] ss:$16 sps:$4 sm:$0xff]  }
 0x34f   : > { %v8208_v1 = vld [vmem:[%s8794_s3 + $0xc2c] ss:$16 sps:$4 sm:$0xff]   ;;  %v8206_v55 = vld [vmem:[%s8794_s3 + $0xc28] ss:$16 sps:$4 sm:$0xff]  }
 0x350   : > { %5925 = vmatpush1.bf16.msra.mxu0 %v8140_v22  ;;  %v8211_v2 = vld [vmem:[%s8794_s3 + $0xe2c] ss:$16 sps:$4 sm:$0xff]   ;;  %v8221_v22 = vld [vmem:[%s8794_s3 + $0xe68] ss:$16 sps:$4 sm:$0xff]  }
 0x351   : > { %5966 = vmatpush1.bf16.msra.mxu1 %v8143_v60  ;;  %5926 = vmatprep.subr.bf16.mxu0 %v8148_v38  ;;  %v8214_v58 = vld [vmem:[%s8794_s3 + $0xc4c] ss:$16 sps:$4 sm:$0xff]   ;;  %v8224_v13 = vld [vmem:[%s8794_s3 + $0xc88] ss:$16 sps:$4 sm:$0xff]  }
 0x352   : > { %5967 = vmatprep.subr.bf16.mxu1 %v8151_v41  ;;  %v8217_v59 = vld [vmem:[%s8794_s3 + $0xe4c] ss:$16 sps:$4 sm:$0xff]   ;;  %v8227_v63 = vld [vmem:[%s8794_s3 + $0xe88] ss:$16 sps:$4 sm:$0xff]  }
 0x353   : > { %v8220_v35 = vld [vmem:[%s8794_s3 + $0xc6c] ss:$16 sps:$4 sm:$0xff]  }
 0x354   : > { %5927 = vmatpush1.bf16.msra.mxu0 %v8146_v4  ;;  %v8223_v25 = vld [vmem:[%s8794_s3 + $0xe6c] ss:$16 sps:$4 sm:$0xff]   ;;  %v6080_v4 = vsub.s32 0, %v8842_v43 }
 0x355   : > { %5968 = vmatpush1.bf16.msra.mxu1 %v8149_v18  ;;  %5928 = vmatprep.subr.bf16.mxu0 %v8154_v19  ;;  %v8229_v60 = vld [vmem:[%s8794_s3 + $0xe8c] ss:$16 sps:$4 sm:$0xff]   ;;  %v8230_v18 = vld [vmem:[%s8794_s3 + $0xca8] ss:$16 sps:$4 sm:$0xff]   ;;  %v9741_v19 = vld [vmem:[%s301_s2] sm:$0xf] }
 0x356   : > { %5969 = vmatprep.subr.bf16.mxu1 %v8157_v5  ;;  %v8232_v38 = vld [vmem:[%s8794_s3 + $0xcac] ss:$16 sps:$4 sm:$0xff]   ;;  %v6084_v5 = vsub.s32 1, %v8842_v43 }
 0x357   : > { %v8235_v41 = vld [vmem:[%s8794_s3 + $0xeac] ss:$16 sps:$4 sm:$0xff]  }
 0x358   : > { %5929 = vmatpush1.bf16.msra.mxu0 %v8152_v6  ;;  %v8233_v6 = vld [vmem:[%s8794_s3 + $0xea8] ss:$16 sps:$4 sm:$0xff]  }
 0x359   : > { %5970 = vmatpush1.bf16.msra.mxu1 %v8155_v7  ;;  %5930 = vmatprep.subr.bf16.mxu0 %v8160_v11  ;;  %v8238_v7 = vld [vmem:[%s8794_s3 + $0xccc] ss:$16 sps:$4 sm:$0xff]  }
 0x35a   : > { %5971 = vmatprep.subr.bf16.mxu1 %v8163_v45  ;;  %v8241_v11 = vld [vmem:[%s8794_s3 + $0xecc] ss:$16 sps:$4 sm:$0xff]  }
 0x35c   : > { %5931 = vmatpush1.bf16.msra.mxu0 %v8158_v27 }
 0x35d   : > { %5972 = vmatpush1.bf16.msra.mxu1 %v8161_v29  ;;  %5932 = vmatprep.subr.bf16.mxu0 %v8166_v14  ;;  %v6081_v14 = vrot.slane %v9741_v19, %v6080_v4  ;;  %v8292_v4 = vld [vmem:[%s8794_s3 + $0xdec] ss:$16 sps:$4 sm:$0xff]  }
 0x35e   : > { %5973 = vmatprep.subr.bf16.mxu1 %v8169_v15 }
 0x360   : > { %5933 = vmatpush1.bf16.msra.mxu0 %v8164_v20 }
 0x361   : > { %5974 = vmatpush1.bf16.msra.mxu1 %v8167_v21  ;;  %5934 = vmatprep.subr.bf16.mxu0 %v8172_v23  ;;  %v6085_v23 = vrot.slane %v9741_v19, %v6084_v5  ;;  %v8290_v5 = vld [vmem:[%s8794_s3 + $0xde8] ss:$16 sps:$4 sm:$0xff]  }
 0x362   : > { %5975 = vmatprep.subr.bf16.mxu1 %v8175_v24 }
 0x364   : > { %5935 = vmatpush1.bf16.msra.mxu0 %v8170_v26 }
 0x365   : > { %5976 = vmatpush1.bf16.msra.mxu1 %v8173_v28  ;;  %5936 = vmatprep.subr.bf16.mxu0 %v8178_v33  ;;  %v8236_v28 = vld [vmem:[%s8794_s3 + $0xcc8] ss:$16 sps:$4 sm:$0xff]  }
 0x366   : > { %5977 = vmatprep.subr.bf16.mxu1 %v8181_v54  ;;  %v8239_v33 = vld [vmem:[%s8794_s3 + $0xec8] ss:$16 sps:$4 sm:$0xff]  }
 0x368   : > { %5937 = vmatpush1.bf16.msra.mxu0 %v8176_v56 }
 0x369   : > { %5978 = vmatpush1.bf16.msra.mxu1 %v8179_v34  ;;  %5938 = vmatprep.subr.bf16.mxu0 %v8184_v16  ;;  %v8244_v34 = vld [vmem:[%s8794_s3 + $0xcec] ss:$16 sps:$4 sm:$0xff]  }
 0x36a   : > { %5979 = vmatprep.subr.bf16.mxu1 %v8187_v3 }
 0x36c   : > { %5939 = vmatpush1.bf16.msra.mxu0 %v8182_v39 }
 0x36d   : > { %5980 = vmatpush1.bf16.msra.mxu1 %v8185_v40  ;;  %5940 = vmatprep.subr.bf16.mxu0 %v8190_v31  ;;  %v8242_v40 = vld [vmem:[%s8794_s3 + $0xce8] ss:$16 sps:$4 sm:$0xff]  }
 0x36e   : > { %5981 = vmatprep.subr.bf16.mxu1 %v8193_v17  ;;  %v8245_v31 = vld [vmem:[%s8794_s3 + $0xee8] ss:$16 sps:$4 sm:$0xff]   ;;  %v8250_v17 = vld [vmem:[%s8794_s3 + $0xd0c] ss:$16 sps:$4 sm:$0xff]  }
 0x370   : > { %5941 = vmatpush1.bf16.msra.mxu0 %v8188_v53  ;;  %v8253_v53 = vld [vmem:[%s8794_s3 + $0xf0c] ss:$16 sps:$4 sm:$0xff]  }
 0x371   : > { %5982 = vmatpush1.bf16.msra.mxu1 %v8191_v61  ;;  %5942 = vmatprep.subr.bf16.mxu0 %v8196_v42  ;;  %v8248_v42 = vld [vmem:[%s8794_s3 + $0xd08] ss:$16 sps:$4 sm:$0xff]  }
 0x372   : > { %5983 = vmatprep.subr.bf16.mxu1 %v8199_v44  ;;  %v8251_v44 = vld [vmem:[%s8794_s3 + $0xf08] ss:$16 sps:$4 sm:$0xff]  }
 0x374   : > { %5943 = vmatpush1.bf16.msra.mxu0 %v8194_v46  ;;  %v8256_v46 = vld [vmem:[%s8794_s3 + $0xd2c] ss:$16 sps:$4 sm:$0xff]  }
 0x375   : > { %5984 = vmatpush1.bf16.msra.mxu1 %v8197_v47  ;;  %5994 = vmatprep.subr.bf16.mxu0 %v8202_v48  ;;  %v8259_v47 = vld [vmem:[%s8794_s3 + $0xf2c] ss:$16 sps:$4 sm:$0xff]   ;;  %v8254_v48 = vld [vmem:[%s8794_s3 + $0xd28] ss:$16 sps:$4 sm:$0xff]  }
 0x376   : > { %6035 = vmatprep.subr.bf16.mxu1 %v8205_v50  ;;  %v8257_v50 = vld [vmem:[%s8794_s3 + $0xf28] ss:$16 sps:$4 sm:$0xff]  }
 0x377   : > { %5945 = vmatmul.mubr.bf16.vlgmr.msra.gmra.mrb[40].mxu0 %v9402_v30  ;;  %v8212_v30 = vld [vmem:[%s8794_s3 + $0xc48] ss:$16 sps:$4 sm:$0xff]  }
 0x378   : > { %5986 = vmatmul.mubr.bf16.vlgmr.msra.gmra.mrb[40].mxu1 %v9406_v32  ;;  %5995 = vmatpush1.bf16.msra.mxu0 %v8200_v52  ;;  %v8215_v32 = vld [vmem:[%s8794_s3 + $0xe48] ss:$16 sps:$4 sm:$0xff]   ;;  %v8262_v52 = vld [vmem:[%s8794_s3 + $0xd4c] ss:$16 sps:$4 sm:$0xff]  }
 0x379   : > { %6036 = vmatpush1.bf16.msra.mxu1 %v8203_v51  ;;  %5996 = vmatprep.subr.bf16.mxu0 %v8208_v1  ;;  %v8265_v51 = vld [vmem:[%s8794_s3 + $0xf4c] ss:$16 sps:$4 sm:$0xff]   ;;  %v8260_v1 = vld [vmem:[%s8794_s3 + $0xd48] ss:$16 sps:$4 sm:$0xff]  }
 0x37a   : > { %6037 = vmatprep.subr.bf16.mxu1 %v8211_v2  ;;  %6026 = vmatprep.mubr.bf16.mxu0 %v9410_v36  ;;  %v8218_v36 = vld [vmem:[%s8794_s3 + $0xc68] ss:$16 sps:$4 sm:$0xff]  }
 0x37b   : > { %6067 = vmatprep.mubr.bf16.mxu1 %v9412_v37  ;;  %v8226_v37 = vld [vmem:[%s8794_s3 + $0xc8c] ss:$16 sps:$4 sm:$0xff]   ;;  %v8263_v2 = vld [vmem:[%s8794_s3 + $0xf48] ss:$16 sps:$4 sm:$0xff]  }
 0x37c   : > { %5997 = vmatpush1.bf16.msra.mxu0 %v8206_v55  ;;  %v8268_v55 = vld [vmem:[%s8794_s3 + $0xd6c] ss:$16 sps:$4 sm:$0xff]  }
 0x37d   : > { %6038 = vmatpush1.bf16.msra.mxu1 %v8209_v57  ;;  %5998 = vmatprep.subr.bf16.mxu0 %v8214_v58  ;;  %v8271_v57 = vld [vmem:[%s8794_s3 + $0xf6c] ss:$16 sps:$4 sm:$0xff]   ;;  %v8266_v58 = vld [vmem:[%s8794_s3 + $0xd68] ss:$16 sps:$4 sm:$0xff]  }
 0x37e   : > { %6039 = vmatprep.subr.bf16.mxu1 %v8217_v59  ;;  %v8269_v59 = vld [vmem:[%s8794_s3 + $0xf68] ss:$16 sps:$4 sm:$0xff]  }
 0x380   : > { %5999 = vmatpush1.bf16.msra.mxu0 %v8212_v30  ;;  %v8274_v30 = vld [vmem:[%s8794_s3 + $0xd8c] ss:$16 sps:$4 sm:$0xff]  }
 0x381   : > { %6040 = vmatpush1.bf16.msra.mxu1 %v8215_v32  ;;  %6000 = vmatprep.subr.bf16.mxu0 %v8220_v35  ;;  %v8277_v32 = vld [vmem:[%s8794_s3 + $0xf8c] ss:$16 sps:$4 sm:$0xff]   ;;  %v8272_v35 = vld [vmem:[%s8794_s3 + $0xd88] ss:$16 sps:$4 sm:$0xff]  }
 0x382   : > { %6041 = vmatprep.subr.bf16.mxu1 %v8223_v25  ;;  %v8275_v25 = vld [vmem:[%s8794_s3 + $0xf88] ss:$16 sps:$4 sm:$0xff]  }
 0x384   : > { %6001 = vmatpush1.bf16.msra.mxu0 %v8218_v36  ;;  %v8280_v36 = vld [vmem:[%s8794_s3 + $0xdac] ss:$16 sps:$4 sm:$0xff]  }
 0x385   : > { %6042 = vmatpush1.bf16.msra.mxu1 %v8221_v22  ;;  %6002 = vmatprep.subr.bf16.mxu0 %v8226_v37  ;;  %v8283_v22 = vld [vmem:[%s8794_s3 + $0xfac] ss:$16 sps:$4 sm:$0xff]   ;;  %v8278_v37 = vld [vmem:[%s8794_s3 + $0xda8] ss:$16 sps:$4 sm:$0xff]  }
 0x386   : > { %6043 = vmatprep.subr.bf16.mxu1 %v8229_v60  ;;  %v8281_v60 = vld [vmem:[%s8794_s3 + $0xfa8] ss:$16 sps:$4 sm:$0xff]  }
 0x388   : > { %6003 = vmatpush1.bf16.msra.mxu0 %v8224_v13  ;;  %v8286_v13 = vld [vmem:[%s8794_s3 + $0xdcc] ss:$16 sps:$4 sm:$0xff]  }
 0x389   : > { %6044 = vmatpush1.bf16.msra.mxu1 %v8227_v63  ;;  %6004 = vmatprep.subr.bf16.mxu0 %v8232_v38  ;;  %v8289_v63 = vld [vmem:[%s8794_s3 + $0xfcc] ss:$16 sps:$4 sm:$0xff]   ;;  %v8284_v38 = vld [vmem:[%s8794_s3 + $0xdc8] ss:$16 sps:$4 sm:$0xff]  }
 0x38a   : > { %6045 = vmatprep.subr.bf16.mxu1 %v8235_v41  ;;  %v5700_v45 = vpop.f32.mrb[28].mxu0  ;;  %v8287_v41 = vld [vmem:[%s8794_s3 + $0xfc8] ss:$16 sps:$4 sm:$0xff]  }
 0x38b   : > { %v5741_v27 = vpop.f32.mrb[28].mxu1  ;;  %v5701_v29 = vadd.f32 %v5700_v45, %v9672_v12  ;;  %v5702_v15 = vpop.f32.mrb[29].mxu0 }
 0x38c   : > { %v5743_v20 = vpop.f32.mrb[29].mxu1  ;;  %v5703_v21 = vadd.f32 %v5702_v15, %v9676_v0  ;;  %v5704_v24 = vpop.f32.mrb[30].mxu0  ;;  %6005 = vmatpush1.bf16.msra.mxu0 %v8230_v18  ;;  %v8247_v0 = vld [vmem:[%s8794_s3 + $0xeec] ss:$16 sps:$4 sm:$0xff]  }
 0x38d   : > { %v5745_v26 = vpop.f32.mrb[30].mxu1  ;;  %6046 = vmatpush1.bf16.msra.mxu1 %v8233_v6  ;;  %v5742_v54 = vadd.f32 %v5741_v27, %v5701_v29  ;;  %v5705_v12 = vpop.f32.mrb[31].mxu0  ;;  %6006 = vmatprep.subr.bf16.mxu0 %v8238_v7  ;;  %v8295_v18 = vld [vmem:[%s8794_s3 + $0xfec] ss:$16 sps:$4 sm:$0xff]   ;;  %v8293_v6 = vld [vmem:[%s8794_s3 + $0xfe8] ss:$16 sps:$4 sm:$0xff]  }
 0x38e   : > { %v5746_v56 = vpop.f32.mrb[31].mxu1  ;;  %6047 = vmatprep.subr.bf16.mxu1 %v8241_v11  ;;  %v5744_v16 = vadd.f32 %v5743_v20, %v5703_v21 }
 0x38f   : > { %v9755_v3 = vadd.f32 %v6081_v14, %v5742_v54 }
 0x390   : > { %v9757_v39 = vadd.f32 %v6085_v23, %v5744_v16  ;;  %6007 = vmatpush1.bf16.msra.mxu0 %v8236_v28 }
 0x391   : > { %6048 = vmatpush1.bf16.msra.mxu1 %v8239_v33  ;;  %6008 = vmatprep.subr.bf16.mxu0 %v8244_v34 }
 0x392   : > { %6049 = vmatprep.subr.bf16.mxu1 %v8247_v0  ;;  %v6106_v61 = vcombine.low %v9755_v3, %v9757_v39 }
 0x394   : > { %6009 = vmatpush1.bf16.msra.mxu0 %v8242_v40 }
 0x395   : > { %6050 = vmatpush1.bf16.msra.mxu1 %v8245_v31  ;;  %6010 = vmatprep.subr.bf16.mxu0 %v8250_v17 }
 0x396   : > { %6051 = vmatprep.subr.bf16.mxu1 %v8253_v53 }
 0x398   : > { %6011 = vmatpush1.bf16.msra.mxu0 %v8248_v42 }
 0x399   : > { %6052 = vmatpush1.bf16.msra.mxu1 %v8251_v44  ;;  %6012 = vmatprep.subr.bf16.mxu0 %v8256_v46 }
 0x39a   : > { %6053 = vmatprep.subr.bf16.mxu1 %v8259_v47 }
 0x39c   : > { %6013 = vmatpush1.bf16.msra.mxu0 %v8254_v48 }
 0x39d   : > { %6054 = vmatpush1.bf16.msra.mxu1 %v8257_v50  ;;  %6014 = vmatprep.subr.bf16.mxu0 %v8262_v52 }
 0x39e   : > { %6055 = vmatprep.subr.bf16.mxu1 %v8265_v51 }
 0x3a0   : > { %6015 = vmatpush1.bf16.msra.mxu0 %v8260_v1  ;;  %v6088_v1 = vsub.s32 2, %v8842_v43 }
 0x3a1   : > { %6056 = vmatpush1.bf16.msra.mxu1 %v8263_v2  ;;  %6016 = vmatprep.subr.bf16.mxu0 %v8268_v55  ;;  %v6092_v2 = vsub.s32 3, %v8842_v43 }
 0x3a2   : > { %6057 = vmatprep.subr.bf16.mxu1 %v8271_v57 }
 0x3a4   : > { %6017 = vmatpush1.bf16.msra.mxu0 %v8266_v58 }
 0x3a5   : > { %6058 = vmatpush1.bf16.msra.mxu1 %v8269_v59  ;;  %6018 = vmatprep.subr.bf16.mxu0 %v8274_v30  ;;  %v6089_v59 = vrot.slane %v9741_v19, %v6088_v1 }
 0x3a6   : > { %6059 = vmatprep.subr.bf16.mxu1 %v8277_v32 }
 0x3a8   : > { %6019 = vmatpush1.bf16.msra.mxu0 %v8272_v35 }
 0x3a9   : > { %6060 = vmatpush1.bf16.msra.mxu1 %v8275_v25  ;;  %6020 = vmatprep.subr.bf16.mxu0 %v8280_v36  ;;  %v6093_v25 = vrot.slane %v9741_v19, %v6092_v2  ;;  %v6114_v19 = vrot.slane %v6106_v61, %v8850_v49 }
 0x3aa   : > { %6061 = vmatprep.subr.bf16.mxu1 %v8283_v22 }
 0x3ac   : > { %6021 = vmatpush1.bf16.msra.mxu0 %v8278_v37 }
 0x3ad   : > { %6062 = vmatpush1.bf16.msra.mxu1 %v8281_v60  ;;  %6022 = vmatprep.subr.bf16.mxu0 %v8286_v13 }
 0x3ae   : > { %6063 = vmatprep.subr.bf16.mxu1 %v8289_v63 }
 0x3b0   : > { %6023 = vmatpush1.bf16.msra.mxu0 %v8284_v38 }
 0x3b1   : > { %6064 = vmatpush1.bf16.msra.mxu1 %v8287_v41  ;;  %6024 = vmatprep.subr.bf16.mxu0 %v8292_v4 }
 0x3b2   : > { %6065 = vmatprep.subr.bf16.mxu1 %v8295_v18 }
 0x3b4   : > { %6025 = vmatpush1.bf16.msra.mxu0 %v8290_v5 }
 0x3b5   : > { %6066 = vmatpush1.bf16.msra.mxu1 %v8293_v6 }
 0x3b7   : > { %6027 = vmatmul.mubr.bf16.vlgmr.msra.gmra.mrb[44].mxu0 %v9486_v8 }
 0x3b8   : > { %6068 = vmatmul.mubr.bf16.vlgmr.msra.gmra.mrb[44].mxu1 %v9490_v9 }
 0x3ca   : > { %v5782_v7 = vpop.f32.mrb[32].mxu0 }
 0x3cb   : > { %v5823_v11 = vpop.f32.mrb[32].mxu1  ;;  %v5783_v45 = vadd.f32 %v5782_v7, %v9442_v10  ;;  %v5784_v27 = vpop.f32.mrb[33].mxu0 }
 0x3cc   : > { %v5825_v29 = vpop.f32.mrb[33].mxu1  ;;  %v5785_v14 = vadd.f32 %v5784_v27, %v9446_v62  ;;  %v5786_v15 = vpop.f32.mrb[34].mxu0 }
 0x3cd   : > { %v5827_v20 = vpop.f32.mrb[34].mxu1  ;;  %v5824_v21 = vadd.f32 %v5823_v11, %v5783_v45  ;;  %v5787_v23 = vpop.f32.mrb[35].mxu0 }
 0x3ce   : > { %v5828_v24 = vpop.f32.mrb[35].mxu1  ;;  %v5826_v26 = vadd.f32 %v5825_v29, %v5785_v14 }
 0x40a   : > { %v5864_v28 = vpop.f32.mrb[36].mxu0 }
 0x40b   : > { %v5905_v33 = vpop.f32.mrb[36].mxu1  ;;  %v5865_v54 = vadd.f32 %v5864_v28, %v5824_v21  ;;  %v5866_v8 = vpop.f32.mrb[37].mxu0 }
 0x40c   : > { %v5907_v12 = vpop.f32.mrb[37].mxu1  ;;  %v5867_v9 = vadd.f32 %v5866_v8, %v5826_v26  ;;  %v5868_v56 = vpop.f32.mrb[38].mxu0 }
 0x40d   : > { %v5909_v34 = vpop.f32.mrb[38].mxu1  ;;  %v5906_v0 = vadd.f32 %v5905_v33, %v5865_v54  ;;  %v5869_v10 = vpop.f32.mrb[39].mxu0 }
 0x40e   : > { %v5910_v16 = vpop.f32.mrb[39].mxu1  ;;  %v5908_v40 = vadd.f32 %v5907_v12, %v5867_v9 }
 0x44a   : > { %v5946_v31 = vpop.f32.mrb[40].mxu0 }
 0x44b   : > { %v5987_v62 = vpop.f32.mrb[40].mxu1  ;;  %v5947_v17 = vadd.f32 %v5946_v31, %v5906_v0  ;;  %v5948_v53 = vpop.f32.mrb[41].mxu0 }
 0x44c   : > { %v5989_v42 = vpop.f32.mrb[41].mxu1  ;;  %v5949_v44 = vadd.f32 %v5948_v53, %v5908_v40  ;;  %v5950_v46 = vpop.f32.mrb[42].mxu0 }
 0x44d   : > { %v5991_v47 = vpop.f32.mrb[42].mxu1  ;;  %v5988_v48 = vadd.f32 %v5987_v62, %v5947_v17  ;;  %v5951_v50 = vpop.f32.mrb[43].mxu0 }
 0x44e   : > { %v5992_v52 = vpop.f32.mrb[43].mxu1  ;;  %v5990_v51 = vadd.f32 %v5989_v42, %v5949_v44 }
 0x48a   : > { %v6028_v55 = vpop.f32.mrb[44].mxu0 }
 0x48b   : > { %v6069_v57 = vpop.f32.mrb[44].mxu1  ;;  %v6029_v58 = vadd.f32 %v6028_v55, %v5988_v48  ;;  %v6030_v30 = vpop.f32.mrb[45].mxu0 }
 0x48c   : > { %v6071_v32 = vpop.f32.mrb[45].mxu1  ;;  %v6031_v35 = vadd.f32 %v6030_v30, %v5990_v51  ;;  %v6032_v36 = vpop.f32.mrb[46].mxu0 }
 0x48d   : > { %v6073_v22 = vpop.f32.mrb[46].mxu1  ;;  %v6070_v37 = vadd.f32 %v6069_v57, %v6029_v58  ;;  %v6033_v60 = vpop.f32.mrb[47].mxu0 }
 0x48e   : > { %v6074_v13 = vpop.f32.mrb[47].mxu1  ;;  %v6072_v63 = vadd.f32 %v6071_v32, %v6031_v35 }
 0x48f   : > { %v6100_v43 = vadd.f32 %v6089_v59, %v6070_v37 }
 0x490   : > { %v6101_v38 = vadd.f32 %v6093_v25, %v6072_v63 }
 0x492   : > { %v6107_v41 = vcombine.low %v6100_v43, %v6101_v38 }
 0x494   : > { %v6121_v4 = vrot.slane %v6107_v41, %v8850_v49 }
 0x496   : > { %v6122_v18 = vcombine.low %v6114_v19, %v6121_v4 }
 0x498   : > { %6124 = vst [vmem:[%s337_s26] sm:$0xff] %v6122_v18 }
 0x499   : > { %8455 = shalt.err (!%p8452_p6)
}
 0x49a   : > { %s8456_s15 = scalar_lea.hbm %s9813_s27, 128  ;;  %s8460_s7 = scalar_lea.hbm %s9862_s5, 256 }
 0x49b   : > { %p8457_p0 = scmp.ne.s32.totalorder %s9813_s27, %s8456_s15  ;;  %p8461_p3 = scmp.lt.u32.totalorder %s9813_s27, %s9862_s5 }
 0x49c   : > { %p8462_p8 = scmp.lt.u32.totalorder %s8460_s7, %s8456_s15  ;;  %p8464_p9 = scmp.lt.u32.totalorder %s8456_s15, %s9813_s27 }
 0x49d   : > { %p8458_p13 = pnand %p8457_p0, %p9906_p10 }
 0x49e   : > { %p8463_p7 = por %p8462_p8, %p8461_p3 }
 0x49f   : > { %p8459_p12 = pneg %p8458_p13 }
 0x4a0   : > { %p8465_p2 = por %p8464_p9, %p8463_p7 }
 0x4a2   : > { %p8466_p1 = pnand %p8465_p2, %p8459_p12 }
 0x4a4   : > { %8469 = shalt.err (!%p8466_p1)
}
 0x4a5   : > { %7080 = dma.vmem_to_hbm [thread:$0]  (%p9906_p10), %s9815_s10, 128, %s9813_s27, %s6126_s22  }
 0x4a6 PF: > { %s6152_s20 = sand.u32 1, %s8504_s18   ;;  %p9907_p11 = scmp.ne.s32.totalorder %s9884_s6, 0 }
 0x4a7   : > { %p9908_p5 = scmp.ge.s32.totalorder %s8516_s21, 2  ;;  %s6153_s16 = scalar_lea.sflag [#allocation4], %s6152_s20 }
 0x4a9   : > { %p7100_p4 = pnand %p9908_p5, %p9907_p11 }
 0x4ab   : > { %8499 = dma.done.wait (!%p7100_p4), %s6153_s16, 128  }
 0x4ac   : > { %8501 = vsyncadd (!%p7100_p4), %s6153_s16, 4294967168  ;;  %s9909_s29 = sld [smem:[#allocation15_spill]]  ;;  %s9910_s20 = sld [smem:[#allocation16_spill]] }
 0x4ad   : > { %p17_p6 = scmp.ge.s32.totalorder %s8582_s24, 4   ;;  %s9911_s18 = smov %s8508_s19 }
 0x4ae   : > { %s9913_s21 = smov %s8582_s24 }
 0x4af   :  { %19 = sbr.rel (!%p17_p6) target bundleno = 9 (0x9), region = 114 }
 0x4b2   : > { %s9912_s19 = smov %s9909_s29 }
 0x4b6   :  { %6158 = vsyncpa [#allocation3], 1 }
 0x4b7   :  { %6160 = vsyncpa [#allocation3 + $0x1], 1 }
 0x4b8   :  { %6161 = vsyncpa [#allocation6], 1 }
 0x4b9   :  { %6162 = vsyncpa [#allocation4], 1 }
 0x4ba   :  { %6164 = vsyncpa [#allocation4 + $0x1], 1 }

</bundles_post_ra>
